<compile_context>
chip_gen: v6e
topology: v6e:2x2x1
jax: 0.10.0
libtpu: 0.0.40
codegen_flags: <defaults>
</compile_context>

<pallas_src>
import jax
import jax.numpy as jnp
from jax import lax
from jax.experimental import pallas as pl
from jax.experimental.pallas import tpu as pltpu

B, CI, H, W = 2, 3, 32, 32
CO = 64
KH = KW = 3
HW = H * W                 # 1024
KPATCH = CI * KH * KW      # 27
FC_IN = CO * HW            # 65536
FC_OUT = 10


# --------------------------------------------------------------------------
# Fused kernel: per-batch  conv (matmul) -> channel-major flatten -> FC
# --------------------------------------------------------------------------
def fused_kernel(p_ref, cw_ref, cb_ref, fw_ref, fb_ref, o_ref):
    # Conv as matmul, output already channel-major & lane-dense: (CO, HW)
    conv = (
        jnp.dot(cw_ref[...], p_ref[0], preferred_element_type=jnp.float32)
        + cb_ref[...]
    )                                                    # (64, 1024)

    # FC: out[o] = sum_{c,p} fc_w[o, c, p] * conv[c, p] + fc_b[o]
    # fc weight stays lane-dense along HW; joint (c, p) contraction done on
    # the VPU (multiply + lane reductions) while the weight DMA is the floor.
    t = fw_ref[...] * conv[None, :, :]                   # (10, 64, 1024)
    s = jnp.sum(t, axis=2)                               # (10, 64)
    out_col = jnp.sum(s, axis=1, keepdims=True)          # (10, 1)
    o_ref[...] = (out_col + fb_ref[...]).reshape(1, FC_OUT, 1)


def cnn_resnet_pallas(patches, cw, cb, fw3, fb):
    return pl.pallas_call(
        fused_kernel,
        out_shape=jax.ShapeDtypeStruct((B, FC_OUT, 1), jnp.float32),
        grid_spec=pltpu.PrefetchScalarGridSpec(
            num_scalar_prefetch=0,
            grid=(B,),
            in_specs=[
                pl.BlockSpec((1, KPATCH, HW), lambda b: (b, 0, 0)),   # patches
                pl.BlockSpec((CO, KPATCH), lambda b: (0, 0)),         # conv w
                pl.BlockSpec((CO, 1), lambda b: (0, 0)),              # conv b
                pl.BlockSpec((FC_OUT, CO, HW), lambda b: (0, 0, 0)),  # fc w
                pl.BlockSpec((FC_OUT, 1), lambda b: (0, 0)),          # fc b
            ],
            out_specs=pl.BlockSpec((1, FC_OUT, 1), lambda b: (b, 0, 0)),
        ),
        compiler_params=pltpu.CompilerParams(
            dimension_semantics=("parallel",)
        ),
    )(patches, cw, cb, fw3, fb)


# --------------------------------------------------------------------------
# Wrapper glue: im2col (PyTorch Conv2d stride=1, padding=1 semantics).
# No transposes — patches come out (B, 27, HW) directly.
# --------------------------------------------------------------------------
def im2col(x):
    # x: (B, CI, H, W) -> (B, CI*KH*KW, H*W), row order (ci, kh, kw)
    x_pad = jnp.pad(x, ((0, 0), (0, 0), (1, 1), (1, 1)))
    cols = [
        x_pad[:, :, kh:kh + H, kw:kw + W]          # (B, CI, H, W)
        for kh in range(KH) for kw in range(KW)
    ]
    p = jnp.stack(cols, axis=2)                    # (B, CI, 9, H, W)
    return p.reshape(B, KPATCH, HW)                # (B, 27, 1024)


def cnn_resnet_forward(x, conv_w, conv_b, fc_w, fc_b):
    patches = im2col(x)                            # (B, 27, 1024)
    cw = conv_w.reshape(CO, KPATCH)                # (64, 27)   free reshape
    cb = conv_b.reshape(CO, 1)
    fw3 = fc_w.reshape(FC_OUT, CO, HW)             # (10, 64, 1024) free reshape
    fb = fc_b.reshape(FC_OUT, 1)
    out = cnn_resnet_pallas(patches, cw, cb, fw3, fb)   # (B, 10, 1)
    return out.reshape(B, FC_OUT)


# --------------------------------------------------------------------------
# Pure-JAX reference (same semantics as the PyTorch module) for validation.
# --------------------------------------------------------------------------
def reference_forward(x, conv_w, conv_b, fc_w, fc_b):
    y = lax.conv_general_dilated(
        x, conv_w, window_strides=(1, 1), padding=((1, 1), (1, 1)),
        dimension_numbers=("NCHW", "OIHW", "NCHW"),
    ) + conv_b.reshape(1, CO, 1, 1)
    y = y.reshape(B, -1)
    return y @ fc_w.T + fc_b


if __name__ == "__main__":
    key = jax.random.PRNGKey(0)
    k_x, k_cw, k_cb, k_fw, k_fb = jax.random.split(key, 5)

    x = jax.random.normal(k_x, (B, CI, H, W), dtype=jnp.float32)
    conv_w = jax.random.normal(k_cw, (CO, CI, KH, KW), dtype=jnp.float32) * 0.05
    conv_b = jax.random.normal(k_cb, (CO,), dtype=jnp.float32) * 0.05
    fc_w = jax.random.normal(k_fw, (FC_OUT, FC_IN), dtype=jnp.float32) * 0.01
    fc_b = jax.random.normal(k_fb, (FC_OUT,), dtype=jnp.float32) * 0.01

    forward = jax.jit(cnn_resnet_forward)
    out = forward(x, conv_w, conv_b, fc_w, fc_b)
    out = jax.block_until_ready(out)

    ref = reference_forward(x, conv_w, conv_b, fc_w, fc_b)
    assert out.shape == (B, FC_OUT)
    assert jnp.allclose(out, ref, atol=2e-2, rtol=2e-2), "mismatch vs reference"

    print("KERNEL_OK")
</pallas_src>

<mosaic_0001>
module attributes {stable_mosaic.version = 11 : i64} {
  func.func @fused_kernel(%arg0: i32, %arg1: memref<1x27x1024xf32, #tpu.memory_space<vmem>>, %arg2: memref<64x27xf32, #tpu.memory_space<vmem>>, %arg3: memref<64x1xf32, #tpu.memory_space<vmem>>, %arg4: memref<10x64x1024xf32, #tpu.memory_space<vmem>>, %arg5: memref<10x1xf32, #tpu.memory_space<vmem>>, %arg6: memref<1x10x1xf32, #tpu.memory_space<vmem>>) attributes {dimension_semantics = [#tpu.dimension_semantics<parallel>], iteration_bounds = array<i64: 2>, scalar_prefetch = 0 : i64, scratch_operands = 0 : i64, tpu.core_type = #tpu.core_type<tc>, window_params = [{transform_indices = @transform_0, window_bounds = array<i64: 1, 27, 1024>}, {pipeline_mode = #tpu.pipeline_mode<synchronous>, transform_indices = @transform_1, window_bounds = array<i64: 64, 27>}, {pipeline_mode = #tpu.pipeline_mode<synchronous>, transform_indices = @transform_2, window_bounds = array<i64: 64, 1>}, {pipeline_mode = #tpu.pipeline_mode<synchronous>, transform_indices = @transform_3, window_bounds = array<i64: 10, 64, 1024>}, {pipeline_mode = #tpu.pipeline_mode<synchronous>, transform_indices = @transform_4, window_bounds = array<i64: 10, 1>}, {transform_indices = @transform_5, window_bounds = array<i64: 1, 10, 1>}]} {
    %c0 = arith.constant 0 : index
    %c0_0 = arith.constant 0 : index
    %0 = vector.load %arg2[%c0, %c0_0] : memref<64x27xf32, #tpu.memory_space<vmem>>, vector<64x27xf32>
    %c0_1 = arith.constant 0 : index
    %c0_2 = arith.constant 0 : index
    %c0_3 = arith.constant 0 : index
    %1 = vector.load %arg1[%c0_1, %c0_2, %c0_3] : memref<1x27x1024xf32, #tpu.memory_space<vmem>>, vector<1x27x1024xf32>
    %2 = vector.shape_cast %1 : vector<1x27x1024xf32> to vector<27x1024xf32>
    %cst = arith.constant dense<0.000000e+00> : vector<64x1024xf32>
    %3 = tpu.matmul %0, %2, %cst {dimension_numbers = #tpu.dot_dimension_numbers<[1], [0], [0], [1], [0, 0, 1, 1], [], []>} : vector<64x27xf32>, vector<27x1024xf32>, vector<64x1024xf32> -> vector<64x1024xf32>
    %c0_4 = arith.constant 0 : index
    %c0_5 = arith.constant 0 : index
    %4 = vector.load %arg3[%c0_4, %c0_5] : memref<64x1xf32, #tpu.memory_space<vmem>>, vector<64x1xf32>
    %5 = vector.broadcast %4 : vector<64x1xf32> to vector<64x1024xf32>
    %6 = arith.addf %3, %5 : vector<64x1024xf32>
    %c0_6 = arith.constant 0 : index
    %c0_7 = arith.constant 0 : index
    %c0_8 = arith.constant 0 : index
    %7 = vector.load %arg4[%c0_6, %c0_7, %c0_8] : memref<10x64x1024xf32, #tpu.memory_space<vmem>>, vector<10x64x1024xf32>
    %8 = vector.shape_cast %6 : vector<64x1024xf32> to vector<1x64x1024xf32>
    %9 = vector.broadcast %8 : vector<1x64x1024xf32> to vector<10x64x1024xf32>
    %10 = arith.mulf %7, %9 : vector<10x64x1024xf32>
    %cst_9 = arith.constant dense<0.000000e+00> : vector<10x64xf32>
    %11 = vector.multi_reduction <add>, %10, %cst_9 [2] : vector<10x64x1024xf32> to vector<10x64xf32>
    %cst_10 = arith.constant dense<0.000000e+00> : vector<10xf32>
    %12 = vector.multi_reduction <add>, %11, %cst_10 [1] : vector<10x64xf32> to vector<10xf32>
    %13 = vector.shape_cast %12 : vector<10xf32> to vector<10x1xf32>
    %c0_11 = arith.constant 0 : index
    %c0_12 = arith.constant 0 : index
    %14 = vector.load %arg5[%c0_11, %c0_12] : memref<10x1xf32, #tpu.memory_space<vmem>>, vector<10x1xf32>
    %15 = arith.addf %13, %14 : vector<10x1xf32>
    %16 = vector.shape_cast %15 : vector<10x1xf32> to vector<1x10x1xf32>
    %c0_13 = arith.constant 0 : index
    %c0_14 = arith.constant 0 : index
    %c0_15 = arith.constant 0 : index
    %17 = vector.load %arg6[%c0_13, %c0_14, %c0_15] : memref<1x10x1xf32, #tpu.memory_space<vmem>>, vector<1x10x1xf32>
    tpu.vector_store %arg6[%c0_13, %c0_14, %c0_15], %16 {strides = array<i32>} : memref<1x10x1xf32, #tpu.memory_space<vmem>>, vector<1x10x1xf32>,
    return
  }
  func.func @transform_0(%arg0: i32) -> (i32, i32, i32) {
    %c0_i32 = arith.constant 0 : i32
    %c0_i32_0 = arith.constant 0 : i32
    %c0_i32_1 = arith.constant 0 : i32
    return %arg0, %c0_i32, %c0_i32_0 : i32, i32, i32
  }
  func.func @transform_1(%arg0: i32) -> (i32, i32) {
    %c0_i32 = arith.constant 0 : i32
    %c0_i32_0 = arith.constant 0 : i32
    %c0_i32_1 = arith.constant 0 : i32
    return %c0_i32, %c0_i32_0 : i32, i32
  }
  func.func @transform_2(%arg0: i32) -> (i32, i32) {
    %c0_i32 = arith.constant 0 : i32
    %c0_i32_0 = arith.constant 0 : i32
    %c0_i32_1 = arith.constant 0 : i32
    return %c0_i32, %c0_i32_0 : i32, i32
  }
  func.func @transform_3(%arg0: i32) -> (i32, i32, i32) {
    %c0_i32 = arith.constant 0 : i32
    %c0_i32_0 = arith.constant 0 : i32
    %c0_i32_1 = arith.constant 0 : i32
    %c0_i32_2 = arith.constant 0 : i32
    return %c0_i32, %c0_i32_0, %c0_i32_1 : i32, i32, i32
  }
  func.func @transform_4(%arg0: i32) -> (i32, i32) {
    %c0_i32 = arith.constant 0 : i32
    %c0_i32_0 = arith.constant 0 : i32
    %c0_i32_1 = arith.constant 0 : i32
    return %c0_i32, %c0_i32_0 : i32, i32
  }
  func.func @transform_5(%arg0: i32) -> (i32, i32, i32) {
    %c0_i32 = arith.constant 0 : i32
    %c0_i32_0 = arith.constant 0 : i32
    %c0_i32_1 = arith.constant 0 : i32
    return %arg0, %c0_i32, %c0_i32_0 : i32, i32, i32
  }
}

</mosaic_0001>

<bundles_post_ra>
// kernel: cnn_resnet_forward.1
= control target key start
LH: loop header
LB: loop body
LE: loop exit
PB: predicated region body
PF: predicated region fallthrough
CT: control target
= control target key end

     0   :  { %s3494_s18 = smov 0   ;;  %s6907_s0 = inlined_call_operand.vmem [shape: f32[2,27,1024], index: 0, kind: input, shape index: {}]   ;;  %s6908_s1 = inlined_call_operand.vmem [shape: f32[64,27], index: 1, kind: input, shape index: {}]   ;;  %s6909_s2 = inlined_call_operand.vmem [shape: f32[64,1], index: 2, kind: input, shape index: {}]   ;;  %s6910_s3 = inlined_call_operand.vmem [shape: f32[10,64,1024], index: 3, kind: input, shape index: {}]   ;;  %s6911_s4 = inlined_call_operand.vmem [shape: f32[10,1], index: 4, kind: input, shape index: {}]   ;;  %s6912_s5 = inlined_call_operand.vmem [shape: f32[2,10,1], index: 5, kind: output, shape index: {}]  }
   0x1 LB: > { %s3389_s19 = sadd.s32 4294967295, %s3460_s18   ;;  %p3393_p0 = scmp.ge.s32.totalorder %s3460_s18, 1  ;;  %s3460_s18 = sphi %s3494_s18, %s15_s18  }
   0x2   : > { %p187_p1 = scmp.lt.s32.totalorder %s3460_s18, 3 }
   0x4   : > { %p188_p2 = pnand %p3393_p0, %p187_p1 }
   0x6   : > { %191 = sbr.rel (%p188_p2) target bundleno = 832 (0x340), region = 40 }
   0xb   : > { %p215_p3 = scmp.lt.s32.totalorder %s3389_s19, 1  ;;  %v3462_v0 = vmov 0.0   ;;  %v3463_v1 = vmov 0   ;;  %v265_v2 = vld [vmem:[%s6909_s2] sm:$0xff]  ;;  %v267_v3 = vld [vmem:[%s6909_s2 + $0x10] sm:$0xff]  ;;  %vm338_vm0 = vcmask 1042432  }
   0xc   : > { %427 = vmatprep.mubr.f32.mxu0 %v3462_v0  ;;  %540 = vmatprep.mubr.f32.mxu1 %v3462_v0  ;;  %v3541_v20 = vld [vmem:[%s6908_s1] sm:$0xff]  ;;  %vm313_vm1 = vcmask 220160   ;;  %v3556_v25 = vld [vmem:[%s6908_s1 + $0x8] sm:$0xff]  ;;  %v3574_v30 = vld [vmem:[%s6908_s1 + $0x10] sm:$0xff]  ;;  %vm2906_vm2 = vcmask 130112   ;;  %vm2913_vm3 = vcmask 195712  }
   0xd   : > { %s6993_s19 = smov (!%p215_p3, %s3389_s19), 1  ;;  %3452 = vset.pattern.permute.xlu0 %v3463_v1  ;;  %3453 = vset.pattern.permute.xlu1 %v3463_v1  ;;  %v228_v35 = vld [vmem:[%s6908_s1 + $0x18] sm:$0xff]  ;;  %v266_v39 = vld [vmem:[%s6909_s2 + $0x8] sm:$0xff]  ;;  %v229_v40 = vld [vmem:[%s6908_s1 + $0x20] sm:$0xff]  ;;  %vm2920_vm4 = vcmask 261312   ;;  %vm2927_vm5 = vcmask 326912  }
   0xe   : > { %s3440_s24 = sshll.u32 %s6993_s19, 8  ;;  %275 = vperm.xlu0 %3452, %v265_v2   ;;  %285 = vperm.xlu1 %3453, %v267_v3   ;;  %v268_v42 = vld [vmem:[%s6909_s2 + $0x18] sm:$0xff]  ;;  %v269_v43 = vld [vmem:[%s6909_s2 + $0x20] sm:$0xff]  ;;  %v230_v44 = vld [vmem:[%s6908_s1 + $0x28] sm:$0xff]  ;;  %vm2941_vm6 = vcmask 458112   ;;  %vm2934_vm7 = vcmask 392512  }
   0xf   : > { %s3516_s27 = scalar_lea.vmem %s6907_s0, %s3440_s24  ;;  %v270_v45 = vld [vmem:[%s6909_s2 + $0x28] sm:$0xff]  ;;  %v271_v46 = vld [vmem:[%s6909_s2 + $0x30] sm:$0xff]  ;;  %v272_v48 = vld [vmem:[%s6909_s2 + $0x38] sm:$0xff]  ;;  %vm2948_vm8 = vcmask 523712   ;;  %vm3301_vm9 = vcmask 1041409   ;;  %vm3303_vm10 = vcmask 1042434  }
  0x10   : > { %v258_v4 = vld [vmem:[%s3516_s27 + $0xc8] sm:$0x7]  ;;  %v260_v5 = vld [vmem:[%s3516_s27 + $0xd8] sm:$0x7]  ;;  %v257_v6 = vld [vmem:[%s3516_s27 + $0xc0] sm:$0x7] }
  0x11   : > { %3398 = vmatprep.subr.msk.mxu0 %vm338_vm0, %v258_v4  ;;  %3408 = vmatprep.subr.msk.mxu1 %vm338_vm0, %v260_v5  ;;  %v259_v7 = vld [vmem:[%s3516_s27 + $0xd0] sm:$0x7]  ;;  %v250_v8 = vld [vmem:[%s3516_s27 + $0x88] sm:$0xff]  ;;  %v252_v9 = vld [vmem:[%s3516_s27 + $0x98] sm:$0xff]  ;;  %vm3305_vm11 = vcmask 1043459   ;;  %vm3307_vm12 = vcmask 1044484  }
  0x12   : > { %3399 = vmatpush1.msk.msra.mxu0 %vm338_vm0, %v257_v6  ;;  %3409 = vmatpush1.msk.msra.mxu1 %vm338_vm0, %v259_v7  ;;  %v249_v10 = vld [vmem:[%s3516_s27 + $0x80] sm:$0xff]  ;;  %v251_v11 = vld [vmem:[%s3516_s27 + $0x90] sm:$0xff]  ;;  %v242_v12 = vld [vmem:[%s3516_s27 + $0x48] sm:$0xff]  ;;  %vm3309_vm13 = vcmask 1045509   ;;  %vm3311_vm14 = vcmask 1046534   ;;  %vm3313_vm15 = vcmask 1047559  }
  0x13   : > { %389 = vmatprep.subr.mxu0 %v250_v8  ;;  %502 = vmatprep.subr.mxu1 %v252_v9  ;;  %v244_v13 = vld [vmem:[%s3516_s27 + $0x58] sm:$0xff]  ;;  %v241_v14 = vld [vmem:[%s3516_s27 + $0x40] sm:$0xff]  ;;  %v243_v15 = vld [vmem:[%s3516_s27 + $0x50] sm:$0xff]  ;;  %s3441_s25 = sshll.u32 %s6993_s19, 4 }
  0x14   : > { %390 = vmatpush1.msra.mxu0 %v249_v10  ;;  %503 = vmatpush1.msra.mxu1 %v251_v11  ;;  %v234_v16 = vld [vmem:[%s3516_s27 + $0x8] sm:$0xff]  ;;  %v236_v17 = vld [vmem:[%s3516_s27 + $0x18] sm:$0xff]  ;;  %v233_v18 = vld [vmem:[%s3516_s27] sm:$0xff]  ;;  %s224_s30 = scalar_lea.vmem %s6912_s5, %s3441_s25 }
  0x15   : > { %391 = vmatprep.subr.mxu0 %v242_v12  ;;  %504 = vmatprep.subr.mxu1 %v244_v13  ;;  %v235_v19 = vld [vmem:[%s3516_s27 + $0x10] sm:$0xff]  ;;  %v262_v21 = vld [vmem:[%s3516_s27 + $0xe8] sm:$0x7]  ;;  %v261_v22 = vld [vmem:[%s3516_s27 + $0xe0] sm:$0x7] }
  0x16   : > { %392 = vmatpush1.msra.mxu0 %v241_v14  ;;  %505 = vmatpush1.msra.mxu1 %v243_v15  ;;  %v264_v23 = vld [vmem:[%s3516_s27 + $0xf8] sm:$0x7]  ;;  %v254_v24 = vld [vmem:[%s3516_s27 + $0xa8] sm:$0xff]  ;;  %v263_v26 = vld [vmem:[%s3516_s27 + $0xf0] sm:$0x7] }
  0x17   : > { %393 = vmatprep.subr.mxu0 %v234_v16  ;;  %506 = vmatprep.subr.mxu1 %v236_v17  ;;  %v253_v27 = vld [vmem:[%s3516_s27 + $0xa0] sm:$0xff]  ;;  %v256_v28 = vld [vmem:[%s3516_s27 + $0xb8] sm:$0xff]  ;;  %v246_v29 = vld [vmem:[%s3516_s27 + $0x68] sm:$0xff] }
  0x18   : > { %394 = vmatpush1.msra.mxu0 %v233_v18  ;;  %507 = vmatpush1.msra.mxu1 %v235_v19  ;;  %v255_v31 = vld [vmem:[%s3516_s27 + $0xb0] sm:$0xff]  ;;  %v245_v32 = vld [vmem:[%s3516_s27 + $0x60] sm:$0xff]  ;;  %v248_v33 = vld [vmem:[%s3516_s27 + $0x78] sm:$0xff] }
  0x19   : > { %3400 = vmatmul.mubr.msk.f32.vlgmr.msra.gmra.mxu0 %vm313_vm1, %v3541_v20  ;;  %3410 = vmatmul.mubr.msk.f32.vlgmr.msra.gmra.mxu1 %vm313_vm1, %v3541_v20  ;;  %v238_v34 = vld [vmem:[%s3516_s27 + $0x28] sm:$0xff]  ;;  %v247_v36 = vld [vmem:[%s3516_s27 + $0x70] sm:$0xff]  ;;  %v237_v37 = vld [vmem:[%s3516_s27 + $0x20] sm:$0xff] }
  0x1a   : > { %3418 = vmatprep.subr.msk.mxu0 %vm338_vm0, %v262_v21  ;;  %433 = vmatprep.mubr.f32.mxu0 %v3462_v0  ;;  %v240_v38 = vld [vmem:[%s3516_s27 + $0x38] sm:$0xff]  ;;  %v239_v41 = vld [vmem:[%s3516_s27 + $0x30] sm:$0xff]  ;;  %v944_v55 = vld [vmem:[%s6910_s3 + $0x408] sm:$0xff] }
  0x1b   : > { %3419 = vmatpush1.msk.msra.mxu0 %vm338_vm0, %v261_v22  ;;  %546 = vmatprep.mubr.f32.mxu1 %v3462_v0  ;;  %v231_v47 = vld [vmem:[%s6908_s1 + $0x30] sm:$0xff]  ;;  %v232_v49 = vld [vmem:[%s6908_s1 + $0x38] sm:$0xff]  ;;  %v943_v58 = vld [vmem:[%s6910_s3 + $0x400] sm:$0xff] }
  0x1c   : > { %3428 = vmatprep.subr.msk.mxu1 %vm338_vm0, %v264_v23  ;;  %615 = vmatprep.subr.mxu0 %v254_v24  ;;  %v816_v59 = vld [vmem:[%s6910_s3 + $0x8] sm:$0xff]  ;;  %v815_v1 = vld [vmem:[%s6910_s3] sm:$0xff]  ;;  %v817_v4 = vld [vmem:[%s6910_s3 + $0x10] sm:$0xff] }
  0x1d   : > { %3401 = vmatmul.mubr.msk.f32.gmra.mxu0 %vm313_vm1, %v3556_v25  ;;  %3411 = vmatmul.mubr.msk.f32.gmra.mxu1 %vm313_vm1, %v3556_v25  ;;  %v1136_v60 = vld [vmem:[%s6910_s3 + $0xa08] sm:$0xff]  ;;  %v1135_v2 = vld [vmem:[%s6910_s3 + $0xa00] sm:$0xff]  ;;  %v1137_v5 = vld [vmem:[%s6910_s3 + $0xa10] sm:$0xff] }
  0x1e   : > { %3429 = vmatpush1.msk.msra.mxu1 %vm338_vm0, %v263_v26  ;;  %439 = vmatprep.mubr.f32.mxu0 %v3462_v0  ;;  %v880_v6 = vld [vmem:[%s6910_s3 + $0x208] sm:$0xff]  ;;  %v879_v12 = vld [vmem:[%s6910_s3 + $0x200] sm:$0xff]  ;;  %v946_v15 = vld [vmem:[%s6910_s3 + $0x418] sm:$0xff]  ;;  %vm3318_vm0 = vcmask 523264  }
  0x1f   : > { %552 = vmatprep.mubr.f32.mxu1 %v3462_v0  ;;  %616 = vmatpush1.msra.mxu0 %v253_v27  ;;  %v818_v17 = vld [vmem:[%s6910_s3 + $0x18] sm:$0xff]  ;;  %v881_v26 = vld [vmem:[%s6910_s3 + $0x210] sm:$0xff] }
  0x20   : > { %728 = vmatprep.subr.mxu1 %v256_v28  ;;  %617 = vmatprep.subr.mxu0 %v246_v29  ;;  %v1138_v24 = vld [vmem:[%s6910_s3 + $0xa18] sm:$0xff]  ;;  %v1200_v28 = vld [vmem:[%s6910_s3 + $0xc08] sm:$0xff] }
  0x21   : > { %3402 = vmatmul.mubr.msk.f32.gmra.mxu0 %vm313_vm1, %v3574_v30  ;;  %3412 = vmatmul.mubr.msk.f32.gmra.mxu1 %vm313_vm1, %v3574_v30 }
  0x22   : > { %445 = vmatprep.mubr.f32.mxu0 %v3462_v0  ;;  %558 = vmatprep.mubr.f32.mxu1 %v3462_v0 }
  0x23   : > { %729 = vmatpush1.msra.mxu1 %v255_v31  ;;  %618 = vmatpush1.msra.mxu0 %v245_v32 }
  0x24   : > { %730 = vmatprep.subr.mxu1 %v248_v33  ;;  %619 = vmatprep.subr.mxu0 %v238_v34  ;;  %v1199_v33 = vld [vmem:[%s6910_s3 + $0xc00] sm:$0xff] }
  0x25   : > { %3403 = vmatmul.mubr.msk.f32.gmra.mxu0 %vm313_vm1, %v228_v35  ;;  %3413 = vmatmul.mubr.msk.f32.gmra.mxu1 %vm313_vm1, %v228_v35 }
  0x26   : > { %451 = vmatprep.mubr.f32.mxu0 %v3462_v0  ;;  %564 = vmatprep.mubr.f32.mxu1 %v3462_v0 }
  0x27   : > { %731 = vmatpush1.msra.mxu1 %v247_v36  ;;  %620 = vmatpush1.msra.mxu0 %v237_v37 }
  0x28   : > { %732 = vmatprep.subr.mxu1 %v240_v38  ;;  %280 = vperm.xlu0 %3452, %v266_v39  }
  0x29   : > { %3404 = vmatmul.mubr.msk.f32.gmra.mxu0 %vm313_vm1, %v229_v40  ;;  %3414 = vmatmul.mubr.msk.f32.gmra.mxu1 %vm313_vm1, %v229_v40 }
  0x2a   : > { %457 = vmatprep.mubr.f32.mxu0 %v3462_v0  ;;  %570 = vmatprep.mubr.f32.mxu1 %v3462_v0 }
  0x2b   : > { %733 = vmatpush1.msra.mxu1 %v239_v41  ;;  %290 = vperm.xlu1 %3453, %v268_v42  }
  0x2c   : > { %295 = vperm.xlu0 %3452, %v269_v43   ;;  %v1201_v43 = vld [vmem:[%s6910_s3 + $0xc10] sm:$0xff] }
  0x2d   : > { %3405 = vmatmul.mubr.msk.f32.gmra.mxu0 %vm313_vm1, %v230_v44  ;;  %3415 = vmatmul.mubr.msk.f32.gmra.mxu1 %vm313_vm1, %v230_v44 }
  0x2e   : > { %463 = vmatprep.mubr.f32.mxu0 %v3462_v0  ;;  %576 = vmatprep.mubr.f32.mxu1 %v3462_v0 }
  0x2f   : > { %300 = vperm.xlu1 %3453, %v270_v45   ;;  %v1007_v45 = vld [vmem:[%s6910_s3 + $0x600] sm:$0xff] }
  0x30   : > { %305 = vperm.xlu0 %3452, %v271_v46   ;;  %v1008_v46 = vld [vmem:[%s6910_s3 + $0x608] sm:$0xff] }
  0x31   : > { %3406 = vmatmul.mubr.msk.f32.gmra.mxu0 %vm313_vm1, %v231_v47  ;;  %3416 = vmatmul.mubr.msk.f32.gmra.mxu1 %vm313_vm1, %v231_v47 }
  0x32   : > { %469 = vmatprep.mubr.f32.mxu0 %v3462_v0  ;;  %582 = vmatprep.mubr.f32.mxu1 %v3462_v0 }
  0x33   : > { %310 = vperm.xlu1 %3453, %v272_v48  }
  0x35   : > { %3407 = vmatmul.mubr.msk.f32.gmra.mxu0 %vm313_vm1, %v232_v49  ;;  %3417 = vmatmul.mubr.msk.f32.gmra.mxu1 %vm313_vm1, %v232_v49 }
  0x36   : > { %653 = vmatprep.mubr.f32.mxu0 %v3462_v0  ;;  %766 = vmatprep.mubr.f32.mxu1 %v3462_v0 }
  0x39   : > { %3420 = vmatmul.mubr.msk.f32.vlgmr.msra.gmra.mxu0 %vm313_vm1, %v3541_v20  ;;  %3430 = vmatmul.mubr.msk.f32.vlgmr.msra.gmra.mxu1 %vm313_vm1, %v3541_v20 }
  0x3a   : > { %659 = vmatprep.mubr.f32.mxu0 %v3462_v0  ;;  %772 = vmatprep.mubr.f32.mxu1 %v3462_v0 }
  0x3d   : > { %3421 = vmatmul.mubr.msk.f32.gmra.mxu0 %vm313_vm1, %v3556_v25  ;;  %3431 = vmatmul.mubr.msk.f32.gmra.mxu1 %vm313_vm1, %v3556_v25 }
  0x3e   : > { %665 = vmatprep.mubr.f32.mxu0 %v3462_v0  ;;  %778 = vmatprep.mubr.f32.mxu1 %v3462_v0 }
  0x41   : > { %3422 = vmatmul.mubr.msk.f32.gmra.mxu0 %vm313_vm1, %v3574_v30  ;;  %3432 = vmatmul.mubr.msk.f32.gmra.mxu1 %vm313_vm1, %v3574_v30 }
  0x42   : > { %671 = vmatprep.mubr.f32.mxu0 %v3462_v0  ;;  %784 = vmatprep.mubr.f32.mxu1 %v3462_v0 }
  0x45   : > { %3423 = vmatmul.mubr.msk.f32.gmra.mxu0 %vm313_vm1, %v228_v35  ;;  %3433 = vmatmul.mubr.msk.f32.gmra.mxu1 %vm313_vm1, %v228_v35 }
  0x46   : > { %677 = vmatprep.mubr.f32.mxu0 %v3462_v0  ;;  %790 = vmatprep.mubr.f32.mxu1 %v3462_v0 }
  0x49   : > { %3424 = vmatmul.mubr.msk.f32.gmra.mxu0 %vm313_vm1, %v229_v40  ;;  %3434 = vmatmul.mubr.msk.f32.gmra.mxu1 %vm313_vm1, %v229_v40 }
  0x4a   : > { %683 = vmatprep.mubr.f32.mxu0 %v3462_v0  ;;  %796 = vmatprep.mubr.f32.mxu1 %v3462_v0 }
  0x4d   : > { %3425 = vmatmul.mubr.msk.f32.gmra.mxu0 %vm313_vm1, %v230_v44  ;;  %3435 = vmatmul.mubr.msk.f32.gmra.mxu1 %vm313_vm1, %v230_v44 }
  0x4e   : > { %689 = vmatprep.mubr.f32.mxu0 %v3462_v0  ;;  %802 = vmatprep.mubr.f32.mxu1 %v3462_v0 }
  0x51   : > { %3426 = vmatmul.mubr.msk.f32.gmra.mxu0 %vm313_vm1, %v231_v47  ;;  %3436 = vmatmul.mubr.msk.f32.gmra.mxu1 %vm313_vm1, %v231_v47 }
  0x52   : > { %695 = vmatprep.mubr.f32.mxu0 %v3462_v0  ;;  %808 = vmatprep.mubr.f32.mxu1 %v3462_v0  ;;  %v945_v0 = vld [vmem:[%s6910_s3 + $0x410] sm:$0xff] }
  0x55   : > { %3427 = vmatmul.mubr.msk.f32.gmra.mxu0 %vm313_vm1, %v232_v49  ;;  %3437 = vmatmul.mubr.msk.f32.gmra.mxu1 %vm313_vm1, %v232_v49  ;;  %vm3322_vm1 = vcmask 517120  }
  0x89   : > { %v3680_v50 = vpop.permute.xlu0 %275  ;;  %v3732_v14 = vpop.permute.xlu1 %285 }
  0xa3   : > { %v3730_v13 = vpop.permute.xlu0 %280 }
  0xd9   : > { %v429_v51 = vpop.f32.mrf.mxu0  ;;  %v542_v52 = vpop.f32.mrf.mxu1 }
  0xda   : > { %v3686_v56 = vadd.f32 %v429_v51, %v3680_v50  ;;  %v3701_v61 = vadd.f32 %v542_v52, %v3680_v50 }
  0xdb   : > { %v431_v53 = vpop.f32.mrf.mxu0  ;;  %v544_v54 = vpop.f32.mrf.mxu1 }
  0xdc   : > { %v3689_v57 = vadd.f32 %v431_v53, %v3680_v50  ;;  %v3723_v7 = vadd.f32 %v544_v54, %v3680_v50  ;;  %v1583_v16 = vmul.f32 %v943_v58, %v3686_v56  ;;  %v1455_v18 = vmul.f32 %v815_v1, %v3686_v56  ;;  %v882_v53 = vld [vmem:[%s6910_s3 + $0x218] sm:$0xff]  ;;  %v3796_v58 = vpop.permute.xlu1 %290  ;;  %v824_v1 = vld [vmem:[%s6910_s3 + $0x48] sm:$0xff] }
  0xdd   : > { %v435_v62 = vpop.f32.mrf.mxu0  ;;  %v548_v63 = vpop.f32.mrf.mxu1  ;;  %v1775_v19 = vmul.f32 %v1135_v2, %v3686_v56  ;;  %v1585_v22 = vmul.f32 %v945_v0, %v3701_v61  ;;  %v1457_v23 = vmul.f32 %v817_v4, %v3701_v61  ;;  %v1777_v25 = vmul.f32 %v1137_v5, %v3701_v61  ;;  %v823_v0 = vld [vmem:[%s6910_s3 + $0x40] sm:$0xff] }
  0xde   : > { %v1584_v3 = vmul.f32 %v944_v55, %v3689_v57  ;;  %v1456_v10 = vmul.f32 %v816_v59, %v3689_v57  ;;  %v1776_v11 = vmul.f32 %v1136_v60, %v3689_v57  ;;  %v1520_v27 = vmul.f32 %v880_v6, %v3689_v57 }
  0xdf   : > { %v437_v8 = vpop.f32.mrf.mxu0  ;;  %v550_v9 = vpop.f32.mrf.mxu1  ;;  %v1519_v32 = vmul.f32 %v879_v12, %v3686_v56  ;;  %v3761_v34 = vadd.f32 %v435_v62, %v3730_v13  ;;  %v3764_v35 = vadd.f32 %v548_v63, %v3730_v13  ;;  %v1586_v38 = vmul.f32 %v946_v15, %v3723_v7  ;;  %v1009_v63 = vld [vmem:[%s6910_s3 + $0x610] sm:$0xff] }
  0xe0   : > { %v2239_v29 = vadd.f32 %v1584_v3, %v1583_v16  ;;  %v2095_v30 = vadd.f32 %v1456_v10, %v1455_v18  ;;  %v2455_v31 = vadd.f32 %v1776_v11, %v1775_v19  ;;  %v1458_v39 = vmul.f32 %v818_v17, %v3723_v7  ;;  %v825_v15 = vld [vmem:[%s6910_s3 + $0x50] sm:$0xff]  ;;  %v1072_v16 = vld [vmem:[%s6910_s3 + $0x808] sm:$0xff]  ;;  %v1202_v19 = vld [vmem:[%s6910_s3 + $0xc18] sm:$0xff] }
  0xe1   : > { %v441_v20 = vpop.f32.mrf.mxu0  ;;  %v554_v21 = vpop.f32.mrf.mxu1  ;;  %v1778_v40 = vmul.f32 %v1138_v24, %v3723_v7  ;;  %v1521_v41 = vmul.f32 %v881_v26, %v3701_v61  ;;  %v2167_v42 = vadd.f32 %v1520_v27, %v1519_v32  ;;  %v1840_v44 = vmul.f32 %v1200_v28, %v3689_v57  ;;  %v1071_v24 = vld [vmem:[%s6910_s3 + $0x800] sm:$0xff] }
  0xe2   : > { %v3781_v47 = vadd.f32 %v437_v8, %v3730_v13  ;;  %v3784_v48 = vadd.f32 %v550_v9, %v3730_v13  ;;  %v3787_v49 = vadd.f32 %v441_v20, %v3732_v14  ;;  %v1839_v54 = vmul.f32 %v1199_v33, %v3686_v56 }
  0xe3   : > { %v443_v36 = vpop.f32.mrf.mxu0  ;;  %v556_v37 = vpop.f32.mrf.mxu1  ;;  %v3794_v55 = vadd.f32 %v554_v21, %v3732_v14  ;;  %v2240_v59 = vadd.f32 %v2239_v29, %v1585_v22  ;;  %v2096_v60 = vadd.f32 %v2095_v30, %v1457_v23  ;;  %v2456_v62 = vadd.f32 %v2455_v31, %v1777_v25  ;;  %v1010_v29 = vld [vmem:[%s6910_s3 + $0x618] sm:$0xff] }
  0xe4   : > { %v1841_v4 = vmul.f32 %v1201_v43, %v3701_v61  ;;  %v2527_v5 = vadd.f32 %v1840_v44, %v1839_v54  ;;  %v1647_v6 = vmul.f32 %v1007_v45, %v3686_v56  ;;  %v1648_v8 = vmul.f32 %v1008_v46, %v3689_v57 }
  0xe5   : > { %v447_v51 = vpop.f32.mrf.mxu0  ;;  %v560_v52 = vpop.f32.mrf.mxu1  ;;  %v3811_v9 = vadd.f32 %v443_v36, %v3732_v14  ;;  %v3814_v10 = vadd.f32 %v556_v37, %v3732_v14  ;;  %v1522_v11 = vmul.f32 %v882_v53, %v3723_v7  ;;  %v2168_v12 = vadd.f32 %v2167_v42, %v1521_v41  ;;  %v1073_v37 = vld [vmem:[%s6910_s3 + $0x810] sm:$0xff] }
  0xe6   : > { %v1649_v20 = vmul.f32 %v1009_v63, %v3701_v61  ;;  %v2311_v21 = vadd.f32 %v1648_v8, %v1647_v6  ;;  %v1463_v22 = vmul.f32 %v823_v0, %v3761_v34  ;;  %v1464_v23 = vmul.f32 %v824_v1, %v3781_v47  ;;  %v3858_v42 = vpop.permute.xlu0 %295  ;;  %v1264_v63 = vld [vmem:[%s6910_s3 + $0xe08] sm:$0xff]  ;;  %v826_v0 = vld [vmem:[%s6910_s3 + $0x58] sm:$0xff] }
  0xe7   : > { %v449_v2 = vpop.f32.mrf.mxu0  ;;  %v562_v3 = vpop.f32.mrf.mxu1  ;;  %v3833_v25 = vadd.f32 %v447_v51, %v3796_v58  ;;  %v3835_v26 = vadd.f32 %v2240_v59, %v1586_v38  ;;  %v3837_v27 = vadd.f32 %v2096_v60, %v1458_v39  ;;  %v3839_v28 = vadd.f32 %v2456_v62, %v1778_v40  ;;  %v887_v39 = vld [vmem:[%s6910_s3 + $0x240] sm:$0xff]  ;;  %v888_v40 = vld [vmem:[%s6910_s3 + $0x248] sm:$0xff]  ;;  %v889_v60 = vld [vmem:[%s6910_s3 + $0x250] sm:$0xff] }
  0xe8   : > { %v2528_v32 = vadd.f32 %v2527_v5, %v1841_v4  ;;  %v1465_v33 = vmul.f32 %v825_v15, %v3764_v35  ;;  %v2104_v36 = vadd.f32 %v1464_v23, %v1463_v22  ;;  %v1712_v38 = vmul.f32 %v1072_v16, %v3689_v57  ;;  %v1263_v62 = vld [vmem:[%s6910_s3 + $0xe00] sm:$0xff]  ;;  %v1074_v1 = vld [vmem:[%s6910_s3 + $0x818] sm:$0xff] }
  0xe9   : > { %v453_v17 = vpop.f32.mrf.mxu0  ;;  %v566_v18 = vpop.f32.mrf.mxu1  ;;  %6934 = vst [vmem:[#allocation2_spill] sm:$0xff] %v3833_v25  ;;  %v3856_v41 = vadd.f32 %v560_v52, %v3796_v58  ;;  %v3860_v43 = vadd.f32 %v2168_v12, %v1522_v11  ;;  %v1842_v44 = vmul.f32 %v1202_v19, %v3723_v7  ;;  %v1711_v45 = vmul.f32 %v1071_v24, %v3686_v56  ;;  %v1265_v19 = vld [vmem:[%s6910_s3 + $0xe10] sm:$0xff]  ;;  %v1016_v24 = vld [vmem:[%s6910_s3 + $0x648] sm:$0xff] }
  0xea   : > { %v3865_v46 = vadd.f32 %v449_v2, %v3796_v58  ;;  %v3868_v51 = vadd.f32 %v562_v3, %v3796_v58  ;;  %v1650_v59 = vmul.f32 %v1010_v29, %v3723_v7  ;;  %v2312_v52 = vadd.f32 %v2311_v21, %v1649_v20  ;;  %v3900_v20 = vpop.permute.xlu1 %300 }
  0xeb   : > { %v455_v30 = vpop.f32.mrf.mxu0  ;;  %v568_v31 = vpop.f32.mrf.mxu1  ;;  %6935 = vst [vmem:[#allocation3_spill] sm:$0xff] %v3856_v41  ;;  %v1713_v2 = vmul.f32 %v1073_v37, %v3701_v61  ;;  %v2383_v3 = vadd.f32 %v1712_v38, %v1711_v45  ;;  %v1527_v4 = vmul.f32 %v887_v39, %v3761_v34  ;;  %v1528_v5 = vmul.f32 %v888_v40, %v3781_v47  ;;  %v890_v39 = vld [vmem:[%s6910_s3 + $0x258] sm:$0xff] }
  0xec   : > { %6936 = vst [vmem:[#allocation4_spill] sm:$0xff] %v3865_v46  ;;  %6937 = vst [vmem:[#allocation5_spill] sm:$0xff] %v3868_v51  ;;  %v3890_v6 = vadd.f32 %v453_v17, %v3858_v42  ;;  %v3893_v8 = vadd.f32 %v566_v18, %v3858_v42  ;;  %v3895_v15 = vadd.f32 %v2528_v32, %v1842_v44  ;;  %v1015_v18 = vld [vmem:[%s6910_s3 + $0x640] sm:$0xff] }
  0xed   : > { %v459_v53 = vpop.f32.mrf.mxu0  ;;  %v572_v54 = vpop.f32.mrf.mxu1  ;;  %v2105_v16 = vadd.f32 %v2104_v36, %v1465_v33  ;;  %v1529_v21 = vmul.f32 %v889_v60, %v3764_v35  ;;  %v2176_v22 = vadd.f32 %v1528_v5, %v1527_v4  ;;  %v1903_v17 = vmul.f32 %v1263_v62, %v3686_v56  ;;  %v1327_v60 = vld [vmem:[%s6910_s3 + $0x1000] sm:$0xff]  ;;  %v1328_v62 = vld [vmem:[%s6910_s3 + $0x1008] sm:$0xff] }
  0xee   : > { %6938 = vst [vmem:[#allocation6_spill] sm:$0xff] %v3890_v6  ;;  %6939 = vst [vmem:[#allocation7_spill] sm:$0xff] %v3893_v8  ;;  %v1904_v23 = vmul.f32 %v1264_v63, %v3689_v57  ;;  %v3912_v29 = vadd.f32 %v455_v30, %v3858_v42  ;;  %v3915_v32 = vadd.f32 %v568_v31, %v3858_v42  ;;  %v1017_v31 = vld [vmem:[%s6910_s3 + $0x650] sm:$0xff]  ;;  %v3948_v5 = vpop.permute.xlu0 %305  ;;  %v883_v6 = vld [vmem:[%s6910_s3 + $0x220] sm:$0xff] }
  0xef   : > { %v461_v11 = vpop.f32.mrf.mxu0  ;;  %v574_v12 = vpop.f32.mrf.mxu1  ;;  %v1466_v37 = vmul.f32 %v826_v0, %v3784_v48  ;;  %v1714_v38 = vmul.f32 %v1074_v1, %v3723_v7  ;;  %v3922_v40 = vadd.f32 %v2312_v52, %v1650_v59  ;;  %v2384_v44 = vadd.f32 %v2383_v3, %v1713_v2  ;;  %v1266_v1 = vld [vmem:[%s6910_s3 + $0xe18] sm:$0xff]  ;;  %v949_v8 = vld [vmem:[%s6910_s3 + $0x430] sm:$0xff] }
  0xf0   : > { %6940 = vst [vmem:[#allocation8_spill] sm:$0xff] %v3912_v29  ;;  %6941 = vst [vmem:[#allocation9_spill] sm:$0xff] %v3915_v32  ;;  %v1905_v45 = vmul.f32 %v1265_v19, %v3701_v61  ;;  %v2599_v30 = vadd.f32 %v1904_v23, %v1903_v17  ;;  %v3935_v63 = vadd.f32 %v459_v53, %v3900_v20  ;;  %v1329_v17 = vld [vmem:[%s6910_s3 + $0x1010] sm:$0xff] }
  0xf1   : > { %v465_v33 = vpop.f32.mrf.mxu0  ;;  %v578_v36 = vpop.f32.mrf.mxu1  ;;  %v3938_v59 = vadd.f32 %v572_v54, %v3900_v20  ;;  %v1655_v2 = vmul.f32 %v1015_v18, %v3761_v34  ;;  %v1656_v3 = vmul.f32 %v1016_v24, %v3781_v47  ;;  %v3946_v4 = vadd.f32 %v461_v11, %v3900_v20  ;;  %v1018_v18 = vld [vmem:[%s6910_s3 + $0x658] sm:$0xff] }
  0xf2   : > { %6942 = vst [vmem:[#allocation10_spill] sm:$0xff] %v3935_v63  ;;  %v3950_v53 = vadd.f32 %v2105_v16, %v1466_v37  ;;  %v1530_v54 = vmul.f32 %v890_v39, %v3784_v48  ;;  %v2177_v19 = vadd.f32 %v2176_v22, %v1529_v21  ;;  %v1657_v11 = vmul.f32 %v1017_v31, %v3764_v35  ;;  %v1080_v21 = vld [vmem:[%s6910_s3 + $0x848] sm:$0xff]  ;;  %v3968_v37 = vpop.permute.xlu1 %310  ;;  %v1330_v31 = vld [vmem:[%s6910_s3 + $0x1018] sm:$0xff] }
  0xf3   : > { %6943 = vst [vmem:[#allocation11_spill] sm:$0xff] %v3938_v59  ;;  %v467_v52 = vpop.f32.mrf.mxu0  ;;  %v580_v0 = vpop.f32.mrf.mxu1  ;;  %6944 = vst [vmem:[#allocation12_spill] sm:$0xff] %v3946_v4  ;;  %v2320_v24 = vadd.f32 %v1656_v3, %v1655_v2  ;;  %v1967_v4 = vmul.f32 %v1327_v60, %v3686_v56  ;;  %v1968_v16 = vmul.f32 %v1328_v62, %v3689_v57  ;;  %v1082_v3 = vld [vmem:[%s6910_s3 + $0x858] sm:$0xff] }
  0xf4   : > { %v3966_v22 = vadd.f32 %v574_v12, %v3900_v20  ;;  %6946 = vst [vmem:[#allocation14_spill] sm:$0xff] %v3968_v37  ;;  %v3970_v39 = vadd.f32 %v2384_v44, %v1714_v38  ;;  %v1906_v63 = vmul.f32 %v1266_v1, %v3723_v7  ;;  %v2600_v32 = vadd.f32 %v2599_v30, %v1905_v45  ;;  %v1079_v45 = vld [vmem:[%s6910_s3 + $0x840] sm:$0xff]  ;;  %v1081_v1 = vld [vmem:[%s6910_s3 + $0x850] sm:$0xff] }
  0xf5   : > { %v471_v23 = vpop.f32.mrf.mxu0  ;;  %v584_v59 = vpop.f32.mrf.mxu1  ;;  %v3977_v60 = vadd.f32 %v465_v33, %v3948_v5  ;;  %v3980_v62 = vadd.f32 %v578_v36, %v3948_v5  ;;  %v1969_v38 = vmul.f32 %v1329_v17, %v3701_v61  ;;  %v2671_v44 = vadd.f32 %v1968_v16, %v1967_v4 }
  0xf6   : > { %6945 = vst [vmem:[#allocation13_spill] sm:$0xff] %v3966_v22  ;;  %v3991_v30 = vadd.f32 %v467_v52, %v3948_v5  ;;  %v3994_v33 = vadd.f32 %v580_v0, %v3948_v5  ;;  %v1658_v36 = vmul.f32 %v1018_v18, %v3784_v48  ;;  %v1720_v4 = vmul.f32 %v1080_v21, %v3781_v47  ;;  %v1391_v52 = vld [vmem:[%s6910_s3 + $0x1200] sm:$0xff] }
  0xf7   : > { %6947 = vst [vmem:[#allocation15_spill] sm:$0xff] %v3977_v60  ;;  %6948 = vst [vmem:[#allocation16_spill] sm:$0xff] %v3980_v62  ;;  %v3982_v2 = vpop.f32.mrf.mxu0  ;;  %v3984_v12 = vpop.f32.mrf.mxu1  ;;  %v4008_v17 = vadd.f32 %v471_v23, %v3968_v37  ;;  %v947_v18 = vld [vmem:[%s6910_s3 + $0x420] sm:$0xff]  ;;  %v4017_v21 = vadd.f32 %v584_v59, %v3968_v37  ;;  %v4028_v60 = vadd.f32 %v2600_v32, %v1906_v63  ;;  %v1392_v59 = vld [vmem:[%s6910_s3 + $0x1208] sm:$0xff] }
  0xf8   : > { %6949 = vst [vmem:[#allocation17_spill] sm:$0xff] %v3982_v2  ;;  %6950 = vst [vmem:[#allocation18_spill] sm:$0xff] %v3984_v12  ;;  %v4013_v12 = vadd.f32 %v2177_v19, %v1530_v54  ;;  %v2321_v2 = vadd.f32 %v2320_v24, %v1657_v11  ;;  %v819_v23 = vld [vmem:[%s6910_s3 + $0x20] sm:$0xff]  ;;  %v1719_v54 = vmul.f32 %v1079_v45, %v3761_v34  ;;  %v948_v24 = vld [vmem:[%s6910_s3 + $0x428] sm:$0xff] }
  0xf9   : > { %6951 = vst [vmem:[#allocation19_spill] sm:$0xff] %v3991_v30  ;;  %6952 = vst [vmem:[#allocation20_spill] sm:$0xff] %v3994_v33  ;;  %v655_v0 = vpop.f32.mrf.mxu0  ;;  %v768_v16 = vpop.f32.mrf.mxu1  ;;  %v1970_v33 = vmul.f32 %v1330_v31, %v3723_v7  ;;  %v2672_v31 = vadd.f32 %v2671_v44, %v1969_v38  ;;  %v1393_v32 = vld [vmem:[%s6910_s3 + $0x1210] sm:$0xff]  ;;  %v1394_v63 = vld [vmem:[%s6910_s3 + $0x1218] sm:$0xff]  ;;  %v2031_v45 = vmul.f32 %v1391_v52, %v3686_v56 }
  0xfa   : > { %6953 = vst [vmem:[#allocation21_spill] sm:$0xff] %v4008_v17  ;;  %6954 = vst [vmem:[#allocation22_spill] sm:$0xff] %v4017_v21  ;;  %v4020_v62 = vadd.f32 %v655_v0, %v3680_v50  ;;  %v1139_v17 = vld [vmem:[%s6910_s3 + $0xa20] sm:$0xff]  ;;  %v1721_v0 = vmul.f32 %v1081_v1, %v3764_v35  ;;  %v4039_v21 = vmul.f32 %v1082_v3, %v3784_v48  ;;  %v820_v1 = vld [vmem:[%s6910_s3 + $0x28] sm:$0xff] }
  0xfb   : > { %v657_v19 = vpop.f32.mrf.mxu0  ;;  %v770_v11 = vpop.f32.mrf.mxu1  ;;  %v4049_v37 = vadd.f32 %v768_v16, %v3680_v50  ;;  %v2392_v3 = vadd.f32 %v1720_v4, %v1719_v54  ;;  %v821_v56 = vld [vmem:[%s6910_s3 + $0x30] sm:$0xff]  ;;  %v1140_v16 = vld [vmem:[%s6910_s3 + $0xa28] sm:$0xff]  ;;  %v2032_v4 = vmul.f32 %v1392_v59, %v3689_v57  ;;  %v4083_v51 = vmul.f32 %v1394_v63, %v3723_v7  ;;  %v950_v57 = vld [vmem:[%s6910_s3 + $0x438] sm:$0xff] }
  0xfc   : > { %v4052_v38 = vadd.f32 %v657_v19, %v3680_v50  ;;  %v1587_v44 = vmul.f32 %v947_v18, %v4020_v62  ;;  %v1459_v52 = vmul.f32 %v819_v23, %v4020_v62  ;;  %v1779_v18 = vmul.f32 %v1139_v17, %v4020_v62  ;;  %v884_v7 = vld [vmem:[%s6910_s3 + $0x228] sm:$0xff] }
  0xfd   : > { %v661_v30 = vpop.f32.mrf.mxu0  ;;  %v774_v22 = vpop.f32.mrf.mxu1  ;;  %v4069_v19 = vadd.f32 %v2321_v2, %v1658_v36  ;;  %v4073_v54 = vadd.f32 %v770_v11, %v3680_v50  ;;  %v4080_v23 = vmul.f32 %v1393_v32, %v3701_v61  ;;  %v1141_v61 = vld [vmem:[%s6910_s3 + $0xa30] sm:$0xff]  ;;  %v4097_v11 = vadd.f32 %v2672_v31, %v1970_v33  ;;  %v1271_v31 = vld [vmem:[%s6910_s3 + $0xe40] sm:$0xff] }
  0xfe   : > { %v1588_v29 = vmul.f32 %v948_v24, %v4052_v38  ;;  %v2242_v50 = vadd.f32 %v3835_v26, %v1587_v44  ;;  %v1460_v36 = vmul.f32 %v820_v1, %v4052_v38  ;;  %v2098_v59 = vadd.f32 %v3837_v27, %v1459_v52  ;;  %v822_v26 = vld [vmem:[%s6910_s3 + $0x38] sm:$0xff] }
  0xff   : > { %v663_v17 = vpop.f32.mrf.mxu0  ;;  %v776_v2 = vpop.f32.mrf.mxu1  ;;  %v1589_v24 = vmul.f32 %v949_v8, %v4049_v37  ;;  %v1461_v32 = vmul.f32 %v821_v56, %v4049_v37  ;;  %v1780_v27 = vmul.f32 %v1140_v16, %v4052_v38  ;;  %v4105_v63 = vadd.f32 %v2392_v3, %v1721_v0  ;;  %v1203_v8 = vld [vmem:[%s6910_s3 + $0xc20] sm:$0xff] }
 0x100   : > { %v2243_v52 = vadd.f32 %v2242_v50, %v1588_v29  ;;  %v2099_v41 = vadd.f32 %v2098_v59, %v1460_v36  ;;  %v2458_v46 = vadd.f32 %v3839_v28, %v1779_v18  ;;  %v1523_v33 = vmul.f32 %v883_v6, %v4020_v62  ;;  %v1204_v28 = vld [vmem:[%s6910_s3 + $0xc28] sm:$0xff] }
 0x101   : > { %v667_v44 = vpop.f32.mrf.mxu0  ;;  %v780_v1 = vpop.f32.mrf.mxu1  ;;  %v1590_v56 = vmul.f32 %v950_v57, %v4073_v54  ;;  %v1781_v0 = vmul.f32 %v1141_v61, %v4049_v37  ;;  %v1524_v3 = vmul.f32 %v884_v7, %v4052_v38  ;;  %v4121_v29 = vadd.f32 %v2032_v4, %v2031_v45  ;;  %v885_v57 = vld [vmem:[%s6910_s3 + $0x230] sm:$0xff]  ;;  %v1142_v7 = vld [vmem:[%s6910_s3 + $0xa38] sm:$0xff] }
 0x102   : > { %v2244_v18 = vadd.f32 %v2243_v52, %v1589_v24  ;;  %v1462_v50 = vmul.f32 %v822_v26, %v4073_v54  ;;  %v2100_v36 = vadd.f32 %v2099_v41, %v1461_v32  ;;  %v2459_v59 = vadd.f32 %v2458_v46, %v1780_v27 }
 0x103   : > { %v669_v6 = vpop.f32.mrf.mxu0  ;;  %v782_v16 = vpop.f32.mrf.mxu1  ;;  %v4128_v61 = vadd.f32 %v661_v30, %v3730_v13  ;;  %v2170_v45 = vadd.f32 %v3860_v43, %v1523_v33  ;;  %v1843_v4 = vmul.f32 %v1203_v8, %v4020_v62  ;;  %v4136_v24 = vmul.f32 %v1271_v31, %v3761_v34  ;;  %v886_v30 = vld [vmem:[%s6910_s3 + $0x238] sm:$0xff]  ;;  %v1011_v43 = vld [vmem:[%s6910_s3 + $0x620] sm:$0xff] }
 0x104   : > { %v2245_v26 = vadd.f32 %v2244_v18, %v1590_v56  ;;  %v2101_v32 = vadd.f32 %v2100_v36, %v1462_v50  ;;  %v2460_v27 = vadd.f32 %v2459_v59, %v1781_v0  ;;  %v1844_v52 = vmul.f32 %v1204_v28, %v4052_v38  ;;  %v1205_v0 = vld [vmem:[%s6910_s3 + $0xc30] sm:$0xff]  ;;  %v1012_v28 = vld [vmem:[%s6910_s3 + $0x628] sm:$0xff] }
 0x105   : > { %v673_v41 = vpop.f32.mrf.mxu0  ;;  %v786_v46 = vpop.f32.mrf.mxu1  ;;  %v4146_v33 = vadd.f32 %v774_v22, %v3730_v13  ;;  %v4149_v8 = vadd.f32 %v663_v17, %v3730_v13  ;;  %v1525_v31 = vmul.f32 %v885_v57, %v4049_v37  ;;  %v2171_v56 = vadd.f32 %v2170_v45, %v1524_v3  ;;  %v1206_v45 = vld [vmem:[%s6910_s3 + $0xc38] sm:$0xff] }
 0x106   : > { %v4159_v18 = vadd.f32 %v776_v2, %v3730_v13  ;;  %2246 = vadd.xlane.f32.xlu1 %v2245_v26  ;;  %2102 = vadd.xlane.f32.xlu0 %v2101_v32  ;;  %v1782_v17 = vmul.f32 %v1142_v7, %v4073_v54  ;;  %v2530_v36 = vadd.f32 %v3895_v15, %v1843_v4  ;;  %v827_v2 = vld [vmem:[%s6910_s3 + $0x60] sm:$0xff]  ;;  %v828_v15 = vld [vmem:[%s6910_s3 + $0x68] sm:$0xff] }
 0x107   : > { %v675_v22 = vpop.f32.mrf.mxu0  ;;  %v788_v50 = vpop.f32.mrf.mxu1  ;;  %v4164_v3 = vadd.f32 %v667_v44, %v3732_v14  ;;  %v1526_v59 = vmul.f32 %v886_v30, %v4073_v54  ;;  %v2172_v57 = vadd.f32 %v2171_v56, %v1525_v31  ;;  %v1651_v13 = vmul.f32 %v1011_v43, %v4020_v62  ;;  %v1013_v30 = vld [vmem:[%s6910_s3 + $0x630] sm:$0xff] }
 0x108   : > { %v2461_v4 = vadd.f32 %v2460_v27, %v1782_v17  ;;  %v1845_v26 = vmul.f32 %v1205_v0, %v4049_v37  ;;  %v2531_v32 = vadd.f32 %v2530_v36, %v1844_v52  ;;  %v1652_v43 = vmul.f32 %v1012_v28, %v4052_v38  ;;  %v1075_v27 = vld [vmem:[%s6910_s3 + $0x820] sm:$0xff]  ;;  %v1076_v52 = vld [vmem:[%s6910_s3 + $0x828] sm:$0xff] }
 0x109   : > { %6955 = vst [vmem:[#allocation23_spill] sm:$0xff] %v4164_v3  ;;  %v679_v7 = vpop.f32.mrf.mxu0  ;;  %v792_v44 = vpop.f32.mrf.mxu1  ;;  %v4183_v31 = vadd.f32 %v780_v1, %v3732_v14  ;;  %v4186_v56 = vadd.f32 %v669_v6, %v3732_v14  ;;  %v2173_v25 = vadd.f32 %v2172_v57, %v1526_v59  ;;  %v2314_v3 = vadd.f32 %v3922_v40, %v1651_v13  ;;  %v1014_v6 = vld [vmem:[%s6910_s3 + $0x638] sm:$0xff] }
 0x10a   : > { %2462 = vadd.xlane.f32.xlu1 %v2461_v4  ;;  %v1846_v1 = vmul.f32 %v1206_v45, %v4073_v54  ;;  %v2532_v17 = vadd.f32 %v2531_v32, %v1845_v26  ;;  %v1467_v40 = vmul.f32 %v827_v2, %v4128_v61  ;;  %v1468_v36 = vmul.f32 %v828_v15, %v4149_v8  ;;  %v829_v45 = vld [vmem:[%s6910_s3 + $0x70] sm:$0xff]  ;;  %v891_v2 = vld [vmem:[%s6910_s3 + $0x260] sm:$0xff] }
 0x10b   : > { %v681_v0 = vpop.f32.mrf.mxu0  ;;  %v794_v28 = vpop.f32.mrf.mxu1  ;;  %v4202_v59 = vadd.f32 %v782_v16, %v3732_v14  ;;  %v4205_v57 = vadd.f32 %v673_v41, %v3796_v58  ;;  %2174 = vadd.xlane.f32.xlu0 %v2173_v25  ;;  %v1653_v13 = vmul.f32 %v1013_v30, %v4049_v37  ;;  %v2315_v4 = vadd.f32 %v2314_v3, %v1652_v43  ;;  %v892_v25 = vld [vmem:[%s6910_s3 + $0x268] sm:$0xff] }
 0x10c   : > { %v2533_v15 = vadd.f32 %v2532_v17, %v1846_v1  ;;  %v2107_v14 = vadd.f32 %v3950_v53, %v1467_v40  ;;  %v1715_v16 = vmul.f32 %v1075_v27, %v4020_v62  ;;  %v1716_v41 = vmul.f32 %v1076_v52, %v4052_v38  ;;  %v830_v53 = vld [vmem:[%s6910_s3 + $0x78] sm:$0xff]  ;;  %v1077_v27 = vld [vmem:[%s6910_s3 + $0x830] sm:$0xff] }
 0x10d   : > { %v685_v26 = vpop.f32.mrf.mxu0  ;;  %v4221_v3 = vadd.f32 %v786_v46, %v3796_v58  ;;  %v4224_v32 = vadd.f32 %v675_v22, %v3796_v58  ;;  %v1654_v30 = vmul.f32 %v1014_v6, %v4073_v54  ;;  %v2316_v43 = vadd.f32 %v2315_v4, %v1653_v13  ;;  %v798_v52 = vpop.f32.mrf.mxu1  ;;  %v1267_v6 = vld [vmem:[%s6910_s3 + $0xe20] sm:$0xff] }
 0x10e   : > { %2534 = vadd.xlane.f32.xlu1 %v2533_v15  ;;  %v1469_v1 = vmul.f32 %v829_v45, %v4146_v33  ;;  %v2108_v46 = vadd.f32 %v2107_v14, %v1468_v36  ;;  %v2386_v17 = vadd.f32 %v3970_v39, %v1715_v16  ;;  %v1531_v22 = vmul.f32 %v891_v2, %v4128_v61  ;;  %v1078_v45 = vld [vmem:[%s6910_s3 + $0x838] sm:$0xff]  ;;  %v1268_v39 = vld [vmem:[%s6910_s3 + $0xe28] sm:$0xff] }
 0x10f   : > { %v4240_v40 = vadd.f32 %v788_v50, %v3796_v58  ;;  %v4243_v13 = vadd.f32 %v679_v7, %v3858_v42  ;;  %v2317_v4 = vadd.f32 %v2316_v43, %v1654_v30  ;;  %v1532_v36 = vmul.f32 %v892_v25, %v4149_v8  ;;  %v687_v2 = vpop.f32.mrf.mxu0  ;;  %v893_v7 = vld [vmem:[%s6910_s3 + $0x270] sm:$0xff] }
 0x110   : > { %v1470_v15 = vmul.f32 %v830_v53, %v4159_v18  ;;  %v2109_v14 = vadd.f32 %v2108_v46, %v1469_v1  ;;  %v1717_v58 = vmul.f32 %v1077_v27, %v4049_v37  ;;  %v2387_v50 = vadd.f32 %v2386_v17, %v1716_v41  ;;  %v1019_v53 = vld [vmem:[%s6910_s3 + $0x660] sm:$0xff]  ;;  %v1020_v41 = vld [vmem:[%s6910_s3 + $0x668] sm:$0xff]  ;;  %v800_v27 = vpop.f32.mrf.mxu1 }
 0x111   : > { %v4258_v16 = vadd.f32 %v792_v44, %v3858_v42  ;;  %v4261_v25 = vadd.f32 %v681_v0, %v3858_v42  ;;  %2318 = vadd.xlane.f32.xlu0 %v2317_v4  ;;  %v2179_v30 = vadd.f32 %v4013_v12, %v1531_v22  ;;  %v1907_v43 = vmul.f32 %v1267_v6, %v4020_v62  ;;  %v894_v0 = vld [vmem:[%s6910_s3 + $0x278] sm:$0xff] }
 0x112   : > { %v2110_v1 = vadd.f32 %v2109_v14, %v1470_v15  ;;  %v1718_v44 = vmul.f32 %v1078_v45, %v4073_v54  ;;  %v2388_v46 = vadd.f32 %v2387_v50, %v1717_v58  ;;  %v1908_v12 = vmul.f32 %v1268_v39, %v4052_v38  ;;  %v1269_v45 = vld [vmem:[%s6910_s3 + $0xe30] sm:$0xff]  ;;  %v1331_v15 = vld [vmem:[%s6910_s3 + $0x1020] sm:$0xff]  ;;  %v691_v14 = vpop.f32.mrf.mxu0  ;;  %v1332_v58 = vld [vmem:[%s6910_s3 + $0x1028] sm:$0xff] }
 0x113   : > { %v4277_v17 = vadd.f32 %v794_v28, %v3858_v42  ;;  %v4280_v22 = vadd.f32 %v685_v26, %v3900_v20  ;;  %v1533_v6 = vmul.f32 %v893_v7, %v4146_v33  ;;  %v2180_v4 = vadd.f32 %v2179_v30, %v1532_v36  ;;  %v1270_v42 = vld [vmem:[%s6910_s3 + $0xe38] sm:$0xff] }
 0x114   : > { %2111 = vadd.xlane.f32.xlu1 %v2110_v1  ;;  %v2389_v39 = vadd.f32 %v2388_v46, %v1718_v44  ;;  %v2602_v28 = vadd.f32 %v4028_v60, %v1907_v43  ;;  %v1659_v26 = vmul.f32 %v1019_v53, %v4128_v61  ;;  %v1660_v36 = vmul.f32 %v1020_v41, %v4149_v8  ;;  %v1021_v60 = vld [vmem:[%s6910_s3 + $0x670] sm:$0xff]  ;;  %v804_v43 = vpop.f32.mrf.mxu1  ;;  %v1083_v46 = vld [vmem:[%s6910_s3 + $0x860] sm:$0xff] }
 0x115   : > { %v4299_v50 = vadd.f32 %v798_v52, %v3900_v20  ;;  %v4302_v7 = vadd.f32 %v687_v2, %v3900_v20  ;;  %v1534_v30 = vmul.f32 %v894_v0, %v4159_v18  ;;  %v2181_v1 = vadd.f32 %v2180_v4, %v1533_v6  ;;  %v1022_v52 = vld [vmem:[%s6910_s3 + $0x678] sm:$0xff] }
 0x116   : > { %2390 = vadd.xlane.f32.xlu0 %v2389_v39  ;;  %v1909_v53 = vmul.f32 %v1269_v45, %v4049_v37  ;;  %v2603_v41 = vadd.f32 %v2602_v28, %v1908_v12  ;;  %v2323_v44 = vadd.f32 %v4069_v19, %v1659_v26  ;;  %v1971_v2 = vmul.f32 %v1331_v15, %v4020_v62  ;;  %v1333_v12 = vld [vmem:[%s6910_s3 + $0x1030] sm:$0xff]  ;;  %v693_v39 = vpop.f32.mrf.mxu0  ;;  %v1334_v26 = vld [vmem:[%s6910_s3 + $0x1038] sm:$0xff] }
 0x117   : > { %v4318_v0 = vadd.f32 %v800_v27, %v3900_v20  ;;  %v2182_v6 = vadd.f32 %v2181_v1, %v1534_v30  ;;  %v1910_v4 = vmul.f32 %v1270_v42, %v4073_v54  ;;  %v1972_v45 = vmul.f32 %v1332_v58, %v4052_v38  ;;  %v1084_v27 = vld [vmem:[%s6910_s3 + $0x868] sm:$0xff]  ;;  %v1395_v1 = vld [vmem:[%s6910_s3 + $0x1220] sm:$0xff] }
 0x118   : > { %v2604_v19 = vadd.f32 %v2603_v41, %v1909_v53  ;;  %v1661_v15 = vmul.f32 %v1021_v60, %v4146_v33  ;;  %v2324_v28 = vadd.f32 %v2323_v44, %v1660_v36  ;;  %v2674_v20 = vadd.f32 %v4097_v11, %v1971_v2 }
 0x119   : > { %v4334_v42 = vadd.f32 %v691_v14, %v3948_v5  ;;  %v4337_v58 = vadd.f32 %v804_v43, %v3948_v5  ;;  %2183 = vadd.xlane.f32.xlu1 %v2182_v6  ;;  %v1662_v30 = vmul.f32 %v1022_v52, %v4159_v18  ;;  %v1723_v36 = vmul.f32 %v1083_v46, %v4128_v61  ;;  %v1085_v14 = vld [vmem:[%s6910_s3 + $0x870] sm:$0xff]  ;;  %v1272_v43 = vld [vmem:[%s6910_s3 + $0xe48] sm:$0xff]  ;;  %v1086_v46 = vld [vmem:[%s6910_s3 + $0x878] sm:$0xff] }
 0x11a   : > { %v2605_v11 = vadd.f32 %v2604_v19, %v1910_v4  ;;  %v2325_v60 = vadd.f32 %v2324_v28, %v1661_v15  ;;  %v1973_v53 = vmul.f32 %v1333_v12, %v4049_v37  ;;  %v2675_v41 = vadd.f32 %v2674_v20, %v1972_v45  ;;  %v1273_v52 = vld [vmem:[%s6910_s3 + $0xe50] sm:$0xff]  ;;  %v1396_v12 = vld [vmem:[%s6910_s3 + $0x1228] sm:$0xff]  ;;  %v1398_v15 = vld [vmem:[%s6910_s3 + $0x1238] sm:$0xff] }
 0x11b   : > { %v4355_v44 = vadd.f32 %v693_v39, %v3948_v5  ;;  %v1974_v2 = vmul.f32 %v1334_v26, %v4073_v54  ;;  %v1724_v6 = vmul.f32 %v1084_v27, %v4149_v8  ;;  %v2394_v4 = vadd.f32 %v4105_v63, %v4039_v21  ;;  %v1397_v39 = vld [vmem:[%s6910_s3 + $0x1230] sm:$0xff]  ;;  %v1274_v20 = vld [vmem:[%s6910_s3 + $0xe58] sm:$0xff]  ;;  %v1275_v27 = vld [vmem:[%s6910_s3 + $0xe60] sm:$0xff] }
 0x11c   : > { %2606 = vadd.xlane.f32.xlu0 %v2605_v11  ;;  %v2326_v45 = vadd.f32 %v2325_v60, %v1662_v30  ;;  %v2676_v19 = vadd.f32 %v2675_v41, %v1973_v53  ;;  %v2035_v28 = vmul.f32 %v1395_v1, %v4020_v62  ;;  %v2744_v21 = vadd.f32 %v4121_v29, %v4080_v23  ;;  %v952_v62 = vld [vmem:[%s6910_s3 + $0x448] sm:$0xff]  ;;  %v951_v60 = vld [vmem:[%s6910_s3 + $0x440] sm:$0xff]  ;;  %v953_v53 = vld [vmem:[%s6910_s3 + $0x450] sm:$0xff] }
 0x11d   : > { %v1725_v63 = vmul.f32 %v1085_v14, %v4146_v33  ;;  %v2395_v26 = vadd.f32 %v2394_v4, %v1723_v36  ;;  %v1912_v30 = vmul.f32 %v1272_v43, %v3781_v47  ;;  %v1913_v11 = vmul.f32 %v1273_v52, %v3764_v35  ;;  %v1276_v52 = vld [vmem:[%s6910_s3 + $0xe68] sm:$0xff] }
 0x11e   : > { %2327 = vadd.xlane.f32.xlu1 %v2326_v45  ;;  %v2677_v23 = vadd.f32 %v2676_v19, %v1974_v2  ;;  %v1726_v29 = vmul.f32 %v1086_v46, %v4159_v18  ;;  %v2036_v36 = vmul.f32 %v1396_v12, %v4052_v38  ;;  %v2745_v1 = vadd.f32 %v2744_v21, %v4083_v51  ;;  %v1277_v51 = vld [vmem:[%s6910_s3 + $0xe70] sm:$0xff]  ;;  %v1278_v38 = vld [vmem:[%s6910_s3 + $0xe78] sm:$0xff] }
 0x11f   : > { %v2396_v41 = vadd.f32 %v2395_v26, %v1724_v6  ;;  %v2037_v14 = vmul.f32 %v1397_v39, %v4049_v37  ;;  %v2038_v43 = vmul.f32 %v1398_v15, %v4073_v54  ;;  %v2608_v2 = vadd.f32 %v1912_v30, %v4136_v24  ;;  %v954_v6 = vld [vmem:[%s6910_s3 + $0x458] sm:$0xff]  ;;  %v1335_v24 = vld [vmem:[%s6910_s3 + $0x1040] sm:$0xff]  ;;  %v1336_v15 = vld [vmem:[%s6910_s3 + $0x1048] sm:$0xff] }
 0x120   : > { %2678 = vadd.xlane.f32.xlu0 %v2677_v23  ;;  %v2746_v46 = vadd.f32 %v2745_v1, %v2035_v28  ;;  %v1914_v37 = vmul.f32 %v1274_v20, %v3784_v48  ;;  %v1915_v54 = vmul.f32 %v1275_v27, %v4128_v61  ;;  %v1592_v4 = vmul.f32 %v952_v62, %v3781_v47  ;;  %v1337_v28 = vld [vmem:[%s6910_s3 + $0x1050] sm:$0xff]  ;;  %v955_v27 = vld [vmem:[%s6910_s3 + $0x460] sm:$0xff]  ;;  %v956_v30 = vld [vmem:[%s6910_s3 + $0x468] sm:$0xff] }
 0x121   : > { %v2397_v12 = vadd.f32 %v2396_v41, %v1725_v63  ;;  %v2609_v45 = vadd.f32 %v2608_v2, %v1913_v11  ;;  %v1591_v19 = vmul.f32 %v951_v60, %v3761_v34  ;;  %v1593_v39 = vmul.f32 %v953_v53, %v3764_v35  ;;  %v957_v23 = vld [vmem:[%s6910_s3 + $0x470] sm:$0xff]  ;;  %v1338_v41 = vld [vmem:[%s6910_s3 + $0x1058] sm:$0xff] }
 0x122   : > { %v2747_v21 = vadd.f32 %v2746_v46, %v2036_v36  ;;  %v1916_v63 = vmul.f32 %v1276_v52, %v4149_v8  ;;  %v1917_v26 = vmul.f32 %v1277_v51, %v4146_v33  ;;  %v1918_v20 = vmul.f32 %v1278_v38, %v4159_v18  ;;  %v958_v36 = vld [vmem:[%s6910_s3 + $0x478] sm:$0xff]  ;;  %v1144_v38 = vld [vmem:[%s6910_s3 + $0xa48] sm:$0xff] }
 0x123   : > { %v2398_v11 = vadd.f32 %v2397_v12, %v1726_v29  ;;  %v2610_v62 = vadd.f32 %v2609_v45, %v1914_v37  ;;  %v1594_v1 = vmul.f32 %v954_v6, %v3784_v48  ;;  %v2248_v60 = vadd.f32 %v1592_v4, %v1591_v19  ;;  %v1339_v6 = vld [vmem:[%s6910_s3 + $0x1060] sm:$0xff]  ;;  %v1145_v12 = vld [vmem:[%s6910_s3 + $0xa50] sm:$0xff] }
 0x124   : > { %v2748_v53 = vadd.f32 %v2747_v21, %v2037_v14  ;;  %v1975_v52 = vmul.f32 %v1335_v24, %v3761_v34  ;;  %v1976_v29 = vmul.f32 %v1336_v15, %v3781_v47  ;;  %v1977_v51 = vmul.f32 %v1337_v28, %v3764_v35  ;;  %v1143_v4 = vld [vmem:[%s6910_s3 + $0xa40] sm:$0xff]  ;;  %v1341_v24 = vld [vmem:[%s6910_s3 + $0x1070] sm:$0xff] }
 0x125   : > { %2399 = vadd.xlane.f32.xlu1 %v2398_v11  ;;  %v2611_v2 = vadd.f32 %v2610_v62, %v1915_v54  ;;  %v1595_v46 = vmul.f32 %v955_v27, %v4128_v61  ;;  %v1596_v14 = vmul.f32 %v956_v30, %v4149_v8  ;;  %v2249_v37 = vadd.f32 %v2248_v60, %v1593_v39  ;;  %v1340_v39 = vld [vmem:[%s6910_s3 + $0x1068] sm:$0xff]  ;;  %v1342_v27 = vld [vmem:[%s6910_s3 + $0x1078] sm:$0xff] }
 0x126   : > { %v2749_v45 = vadd.f32 %v2748_v53, %v2038_v43  ;;  %v1597_v54 = vmul.f32 %v957_v23, %v4146_v33  ;;  %v1598_v19 = vmul.f32 %v958_v36, %v4159_v18  ;;  %v2680_v15 = vadd.f32 %v1976_v29, %v1975_v52  ;;  %v1146_v30 = vld [vmem:[%s6910_s3 + $0xa58] sm:$0xff]  ;;  %v1400_v60 = vld [vmem:[%s6910_s3 + $0x1248] sm:$0xff] }
 0x127   : > { %v2612_v28 = vadd.f32 %v2611_v2, %v1916_v63  ;;  %v2250_v21 = vadd.f32 %v2249_v37, %v1594_v1  ;;  %v1978_v43 = vmul.f32 %v1338_v41, %v3784_v48  ;;  %v1784_v11 = vmul.f32 %v1144_v38, %v3781_v47  ;;  %v1147_v63 = vld [vmem:[%s6910_s3 + $0xa60] sm:$0xff]  ;;  %v1401_v38 = vld [vmem:[%s6910_s3 + $0x1250] sm:$0xff] }
 0x128   : > { %2750 = vadd.xlane.f32.xlu0 %v2749_v45  ;;  %v1979_v62 = vmul.f32 %v1339_v6, %v4128_v61  ;;  %v2681_v23 = vadd.f32 %v2680_v15, %v1977_v51  ;;  %v1783_v36 = vmul.f32 %v1143_v4, %v3761_v34  ;;  %v1785_v1 = vmul.f32 %v1145_v12, %v3764_v35  ;;  %v1399_v51 = vld [vmem:[%s6910_s3 + $0x1240] sm:$0xff]  ;;  %v1150_v6 = vld [vmem:[%s6910_s3 + $0xa78] sm:$0xff] }
 0x129   : > { %v2613_v53 = vadd.f32 %v2612_v28, %v1917_v26  ;;  %v2251_v41 = vadd.f32 %v2250_v21, %v1595_v46  ;;  %v1980_v52 = vmul.f32 %v1340_v39, %v4149_v8  ;;  %v1981_v29 = vmul.f32 %v1341_v24, %v4146_v33  ;;  %v1148_v26 = vld [vmem:[%s6910_s3 + $0xa68] sm:$0xff]  ;;  %v1149_v46 = vld [vmem:[%s6910_s3 + $0xa70] sm:$0xff]  ;;  %v1402_v15 = vld [vmem:[%s6910_s3 + $0x1258] sm:$0xff] }
 0x12a   : > { %v1982_v2 = vmul.f32 %v1342_v27, %v4159_v18  ;;  %v2682_v37 = vadd.f32 %v2681_v23, %v1978_v43  ;;  %v1786_v4 = vmul.f32 %v1146_v30, %v3784_v48  ;;  %v2464_v12 = vadd.f32 %v1784_v11, %v1783_v36  ;;  %v1207_v30 = vld [vmem:[%s6910_s3 + $0xc40] sm:$0xff] }
 0x12b   : > { %v2614_v45 = vadd.f32 %v2613_v53, %v1918_v20  ;;  %v2252_v39 = vadd.f32 %v2251_v41, %v1596_v14  ;;  %v1787_v24 = vmul.f32 %v1147_v63, %v4128_v61  ;;  %v2040_v28 = vmul.f32 %v1400_v60, %v3781_v47  ;;  %v1208_v20 = vld [vmem:[%s6910_s3 + $0xc48] sm:$0xff]  ;;  %v1209_v14 = vld [vmem:[%s6910_s3 + $0xc50] sm:$0xff] }
 0x12c   : > { %v2683_v21 = vadd.f32 %v2682_v37, %v1979_v62  ;;  %v2465_v27 = vadd.f32 %v2464_v12, %v1785_v1  ;;  %v2039_v43 = vmul.f32 %v1399_v51, %v3761_v34  ;;  %v2041_v23 = vmul.f32 %v1401_v38, %v3764_v35  ;;  %v1403_v1 = vld [vmem:[%s6910_s3 + $0x1260] sm:$0xff]  ;;  %v1404_v41 = vld [vmem:[%s6910_s3 + $0x1268] sm:$0xff]  ;;  %v1210_v37 = vld [vmem:[%s6910_s3 + $0xc58] sm:$0xff] }
 0x12d   : > { %2615 = vadd.xlane.f32.xlu1 %v2614_v45  ;;  %v2253_v11 = vadd.f32 %v2252_v39, %v1597_v54  ;;  %v1788_v62 = vmul.f32 %v1148_v26, %v4149_v8  ;;  %v1789_v63 = vmul.f32 %v1149_v46, %v4146_v33  ;;  %v1790_v36 = vmul.f32 %v1150_v6, %v4159_v18  ;;  %v1405_v54 = vld [vmem:[%s6910_s3 + $0x1270] sm:$0xff] }
 0x12e   : > { %v2684_v60 = vadd.f32 %v2683_v21, %v1980_v52  ;;  %v2466_v53 = vadd.f32 %v2465_v27, %v1786_v4  ;;  %v2042_v51 = vmul.f32 %v1402_v15, %v3784_v48  ;;  %v2752_v38 = vadd.f32 %v2040_v28, %v2039_v43  ;;  %v1211_v52 = vld [vmem:[%s6910_s3 + $0xc60] sm:$0xff] }
 0x12f   : > { %v2254_v26 = vadd.f32 %v2253_v11, %v1598_v19  ;;  %v1847_v46 = vmul.f32 %v1207_v30, %v3761_v34  ;;  %v1848_v6 = vmul.f32 %v1208_v20, %v3781_v47  ;;  %v1849_v4 = vmul.f32 %v1209_v14, %v3764_v35  ;;  %v959_v28 = vld [vmem:[%s6910_s3 + $0x480] sm:$0xff]  ;;  %v960_v19 = vld [vmem:[%s6910_s3 + $0x488] sm:$0xff]  ;;  %v961_v34 = vld [vmem:[%s6910_s3 + $0x490] sm:$0xff] }
 0x130   : > { %v2685_v12 = vadd.f32 %v2684_v60, %v1981_v29  ;;  %v2467_v45 = vadd.f32 %v2466_v53, %v1787_v24  ;;  %v2043_v39 = vmul.f32 %v1403_v1, %v4128_v61  ;;  %v2753_v15 = vadd.f32 %v2752_v38, %v2041_v23  ;;  %v1406_v35 = vld [vmem:[%s6910_s3 + $0x1278] sm:$0xff]  ;;  %v1212_v24 = vld [vmem:[%s6910_s3 + $0xc68] sm:$0xff]  ;;  %v1213_v20 = vld [vmem:[%s6910_s3 + $0xc70] sm:$0xff] }
 0x131   : > { %2255 = vadd.xlane.f32.xlu0 %v2254_v26  ;;  %v2044_v47 = vmul.f32 %v1404_v41, %v4149_v8  ;;  %v2045_v29 = vmul.f32 %v1405_v54, %v4146_v33  ;;  %v1850_v21 = vmul.f32 %v1210_v37, %v3784_v48  ;;  %v2536_v27 = vadd.f32 %v1848_v6, %v1847_v46  ;;  %v962_v11 = vld [vmem:[%s6910_s3 + $0x498] sm:$0xff]  ;;  %v963_v60 = vld [vmem:[%s6910_s3 + $0x4a0] sm:$0xff]  ;;  %v832_v53 = vld [vmem:[%s6910_s3 + $0x88] sm:$0xff] }
 0x132   : > { %v2686_v43 = vadd.f32 %v2685_v12, %v1982_v2  ;;  %v2468_v23 = vadd.f32 %v2467_v45, %v1788_v62  ;;  %v2754_v30 = vadd.f32 %v2753_v15, %v2042_v51  ;;  %v1851_v14 = vmul.f32 %v1211_v52, %v4128_v61  ;;  %v831_v38 = vld [vmem:[%s6910_s3 + $0x80] sm:$0xff]  ;;  %v833_v37 = vld [vmem:[%s6910_s3 + $0x90] sm:$0xff]  ;;  %v1214_v26 = vld [vmem:[%s6910_s3 + $0xc78] sm:$0xff] }
 0x133   : > { %v2537_v1 = vadd.f32 %v2536_v27, %v1849_v4  ;;  %v1599_v48 = vmul.f32 %v959_v28, %v3787_v49  ;;  %v1600_v2 = vmul.f32 %v960_v19, %v3811_v9  ;;  %v1601_v62 = vmul.f32 %v961_v34, %v3794_v55  ;;  %v964_v46 = vld [vmem:[%s6910_s3 + $0x4a8] sm:$0xff] }
 0x134   : > { %2687 = vadd.xlane.f32.xlu1 %v2686_v43  ;;  %v2469_v61 = vadd.f32 %v2468_v23, %v1789_v63  ;;  %v2046_v41 = vmul.f32 %v1406_v35, %v4159_v18  ;;  %v2755_v54 = vadd.f32 %v2754_v30, %v2043_v39  ;;  %v1852_v51 = vmul.f32 %v1212_v24, %v4149_v8  ;;  %v965_v8 = vld [vmem:[%s6910_s3 + $0x4b0] sm:$0xff]  ;;  %v6956_v39 = vld [vmem:[#allocation23_spill] sm:$0xff]  ;;  %v835_v35 = vld [vmem:[%s6910_s3 + $0xa0] sm:$0xff] }
 0x135   : > { %v1853_v52 = vmul.f32 %v1213_v20, %v4146_v33  ;;  %v2538_v63 = vadd.f32 %v2537_v1, %v1850_v21  ;;  %v1602_v6 = vmul.f32 %v962_v11, %v3814_v10  ;;  %v2257_v4 = vadd.f32 %v1600_v2, %v1599_v48  ;;  %v834_v33 = vld [vmem:[%s6910_s3 + $0x98] sm:$0xff] }
 0x136   : > { %v2470_v12 = vadd.f32 %v2469_v61, %v1790_v36  ;;  %v2756_v45 = vadd.f32 %v2755_v54, %v2044_v47  ;;  %v1603_v15 = vmul.f32 %v963_v60, %v6956_v39  ;;  %v1472_v28 = vmul.f32 %v832_v53, %v3811_v9  ;;  %v1023_v36 = vld [vmem:[%s6910_s3 + $0x680] sm:$0xff]  ;;  %v1024_v47 = vld [vmem:[%s6910_s3 + $0x688] sm:$0xff]  ;;  %v966_v23 = vld [vmem:[%s6910_s3 + $0x4b8] sm:$0xff] }
 0x137   : > { %v2539_v19 = vadd.f32 %v2538_v63, %v1851_v14  ;;  %v2258_v34 = vadd.f32 %v2257_v4, %v1601_v62  ;;  %v1471_v24 = vmul.f32 %v831_v38, %v3787_v49  ;;  %v1473_v21 = vmul.f32 %v833_v37, %v3794_v55  ;;  %v1025_v14 = vld [vmem:[%s6910_s3 + $0x690] sm:$0xff]  ;;  %v838_v60 = vld [vmem:[%s6910_s3 + $0xb8] sm:$0xff] }
 0x138   : > { %2471 = vadd.xlane.f32.xlu0 %v2470_v12  ;;  %v2757_v27 = vadd.f32 %v2756_v45, %v2045_v29  ;;  %v1854_v43 = vmul.f32 %v1214_v26, %v4159_v18  ;;  %v1604_v30 = vmul.f32 %v964_v46, %v4186_v56  ;;  %v1605_v20 = vmul.f32 %v965_v8, %v4183_v31  ;;  %v836_v29 = vld [vmem:[%s6910_s3 + $0xa8] sm:$0xff]  ;;  %v837_v18 = vld [vmem:[%s6910_s3 + $0xb0] sm:$0xff]  ;;  %v1026_v61 = vld [vmem:[%s6910_s3 + $0x698] sm:$0xff] }
 0x139   : > { %v2540_v11 = vadd.f32 %v2539_v19, %v1852_v51  ;;  %v2259_v1 = vadd.f32 %v2258_v34, %v1602_v6  ;;  %v1474_v48 = vmul.f32 %v834_v33, %v3814_v10  ;;  %v2113_v2 = vadd.f32 %v1472_v28, %v1471_v24  ;;  %v895_v46 = vld [vmem:[%s6910_s3 + $0x280] sm:$0xff]  ;;  %v897_v8 = vld [vmem:[%s6910_s3 + $0x290] sm:$0xff]  ;;  %v1028_v19 = vld [vmem:[%s6910_s3 + $0x6a8] sm:$0xff] }
 0x13a   : > { %v2758_v62 = vadd.f32 %v2757_v27, %v2046_v41  ;;  %v1475_v53 = vmul.f32 %v835_v35, %v6956_v39  ;;  %v1663_v54 = vmul.f32 %v1023_v36, %v3787_v49  ;;  %v1664_v51 = vmul.f32 %v1024_v47, %v3811_v9  ;;  %v896_v41 = vld [vmem:[%s6910_s3 + $0x288] sm:$0xff]  ;;  %v1027_v45 = vld [vmem:[%s6910_s3 + $0x6a0] sm:$0xff]  ;;  %v1029_v34 = vld [vmem:[%s6910_s3 + $0x6b0] sm:$0xff] }
 0x13b   : > { %v2541_v38 = vadd.f32 %v2540_v11, %v1853_v52  ;;  %v2260_v37 = vadd.f32 %v2259_v1, %v1603_v15  ;;  %v2114_v26 = vadd.f32 %v2113_v2, %v1473_v21  ;;  %v1665_v63 = vmul.f32 %v1025_v14, %v3794_v55  ;;  %v898_v24 = vld [vmem:[%s6910_s3 + $0x298] sm:$0xff]  ;;  %v899_v36 = vld [vmem:[%s6910_s3 + $0x2a0] sm:$0xff]  ;;  %v900_v2 = vld [vmem:[%s6910_s3 + $0x2a8] sm:$0xff] }
 0x13c   : > { %2759 = vadd.xlane.f32.xlu1 %v2758_v62  ;;  %v1606_v6 = vmul.f32 %v966_v23, %v4202_v59  ;;  %v1476_v52 = vmul.f32 %v836_v29, %v4186_v56  ;;  %v1477_v4 = vmul.f32 %v837_v18, %v4183_v31  ;;  %v1478_v12 = vmul.f32 %v838_v60, %v4202_v59  ;;  %v1215_v1 = vld [vmem:[%s6910_s3 + $0xc80] sm:$0xff]  ;;  %v1216_v29 = vld [vmem:[%s6910_s3 + $0xc88] sm:$0xff]  ;;  %v1217_v18 = vld [vmem:[%s6910_s3 + $0xc90] sm:$0xff] }
 0x13d   : > { %v2542_v15 = vadd.f32 %v2541_v38, %v1854_v43  ;;  %v2261_v33 = vadd.f32 %v2260_v37, %v1604_v30  ;;  %v2115_v28 = vadd.f32 %v2114_v26, %v1474_v48  ;;  %v2329_v35 = vadd.f32 %v1664_v51, %v1663_v54  ;;  %v901_v38 = vld [vmem:[%s6910_s3 + $0x2b0] sm:$0xff]  ;;  %v1218_v26 = vld [vmem:[%s6910_s3 + $0xc98] sm:$0xff] }
 0x13e   : > { %v1666_v21 = vmul.f32 %v1026_v61, %v3814_v10  ;;  %v1535_v47 = vmul.f32 %v895_v46, %v3787_v49  ;;  %v1536_v27 = vmul.f32 %v896_v41, %v3811_v9  ;;  %v1537_v43 = vmul.f32 %v897_v8, %v3794_v55  ;;  %v1219_v46 = vld [vmem:[%s6910_s3 + $0xca0] sm:$0xff] }
 0x13f   : > { %2543 = vadd.xlane.f32.xlu0 %v2542_v15  ;;  %v2262_v23 = vadd.f32 %v2261_v33, %v1605_v20  ;;  %v2116_v30 = vadd.f32 %v2115_v28, %v1475_v53  ;;  %v1667_v14 = vmul.f32 %v1027_v45, %v6956_v39  ;;  %v2330_v11 = vadd.f32 %v2329_v35, %v1665_v63  ;;  %v1030_v20 = vld [vmem:[%s6910_s3 + $0x6b8] sm:$0xff] }
 0x140   : > { %v1668_v60 = vmul.f32 %v1028_v19, %v4186_v56  ;;  %v1669_v48 = vmul.f32 %v1029_v34, %v4183_v31  ;;  %v1538_v62 = vmul.f32 %v898_v24, %v3814_v10  ;;  %v2185_v53 = vadd.f32 %v1536_v27, %v1535_v47  ;;  %v1087_v19 = vld [vmem:[%s6910_s3 + $0x880] sm:$0xff]  ;;  %v1089_v34 = vld [vmem:[%s6910_s3 + $0x890] sm:$0xff]  ;;  %v902_v35 = vld [vmem:[%s6910_s3 + $0x2b8] sm:$0xff] }
 0x141   : > { %v2263_v61 = vadd.f32 %v2262_v23, %v1606_v6  ;;  %v2117_v54 = vadd.f32 %v2116_v30, %v1476_v52  ;;  %v2331_v51 = vadd.f32 %v2330_v11, %v1666_v21  ;;  %v1539_v37 = vmul.f32 %v899_v36, %v6956_v39  ;;  %v1088_v52 = vld [vmem:[%s6910_s3 + $0x888] sm:$0xff]  ;;  %v1221_v36 = vld [vmem:[%s6910_s3 + $0xcb0] sm:$0xff] }
 0x142   : > { %v2186_v63 = vadd.f32 %v2185_v53, %v1537_v43  ;;  %v1855_v41 = vmul.f32 %v1215_v1, %v3787_v49  ;;  %v1856_v8 = vmul.f32 %v1216_v29, %v3811_v9  ;;  %v1857_v6 = vmul.f32 %v1217_v18, %v3794_v55  ;;  %v1220_v21 = vld [vmem:[%s6910_s3 + $0xca8] sm:$0xff]  ;;  %v1091_v18 = vld [vmem:[%s6910_s3 + $0x8a0] sm:$0xff] }
 0x143   : > { %2264 = vadd.xlane.f32.xlu1 %v2263_v61  ;;  %v2118_v45 = vadd.f32 %v2117_v54, %v1477_v4  ;;  %v1670_v15 = vmul.f32 %v1030_v20, %v4202_v59  ;;  %v2332_v33 = vadd.f32 %v2331_v51, %v1667_v14  ;;  %v1540_v28 = vmul.f32 %v900_v2, %v4186_v56  ;;  %v1090_v14 = vld [vmem:[%s6910_s3 + $0x898] sm:$0xff] }
 0x144   : > { %v1541_v24 = vmul.f32 %v901_v38, %v4183_v31  ;;  %v2187_v4 = vadd.f32 %v2186_v63, %v1538_v62  ;;  %v1858_v47 = vmul.f32 %v1218_v26, %v3814_v10  ;;  %v2545_v27 = vadd.f32 %v1856_v8, %v1855_v41  ;;  %v1222_v61 = vld [vmem:[%s6910_s3 + $0xcb8] sm:$0xff]  ;;  %v1281_v38 = vld [vmem:[%s6910_s3 + $0xe90] sm:$0xff] }
 0x145   : > { %v2119_v43 = vadd.f32 %v2118_v45, %v1478_v12  ;;  %v2333_v23 = vadd.f32 %v2332_v33, %v1668_v60  ;;  %v1859_v30 = vmul.f32 %v1219_v46, %v6956_v39  ;;  %v1728_v11 = vmul.f32 %v1088_v52, %v3811_v9  ;;  %v1279_v12 = vld [vmem:[%s6910_s3 + $0xe80] sm:$0xff]  ;;  %v1280_v60 = vld [vmem:[%s6910_s3 + $0xe88] sm:$0xff]  ;;  %v1093_v63 = vld [vmem:[%s6910_s3 + $0x8b0] sm:$0xff] }
 0x146   : > { %v2188_v1 = vadd.f32 %v2187_v4, %v1539_v37  ;;  %v2546_v29 = vadd.f32 %v2545_v27, %v1857_v6  ;;  %v1727_v20 = vmul.f32 %v1087_v19, %v3787_v49  ;;  %v1729_v2 = vmul.f32 %v1089_v34, %v3794_v55  ;;  %v1094_v46 = vld [vmem:[%s6910_s3 + $0x8b8] sm:$0xff] }
 0x147   : > { %2120 = vadd.xlane.f32.xlu0 %v2119_v43  ;;  %v2334_v62 = vadd.f32 %v2333_v23, %v1669_v48  ;;  %v1542_v53 = vmul.f32 %v902_v35, %v4202_v59  ;;  %v1860_v54 = vmul.f32 %v1220_v21, %v4186_v56  ;;  %v1861_v51 = vmul.f32 %v1221_v36, %v4183_v31  ;;  %v1092_v48 = vld [vmem:[%s6910_s3 + $0x8a8] sm:$0xff]  ;;  %v1282_v45 = vld [vmem:[%s6910_s3 + $0xe98] sm:$0xff]  ;;  %v1151_v21 = vld [vmem:[%s6910_s3 + $0xa80] sm:$0xff] }
 0x148   : > { %v2189_v37 = vadd.f32 %v2188_v1, %v1540_v28  ;;  %v2547_v26 = vadd.f32 %v2546_v29, %v1858_v47  ;;  %v1730_v41 = vmul.f32 %v1090_v14, %v3814_v10  ;;  %v2401_v8 = vadd.f32 %v1728_v11, %v1727_v20  ;;  %v1153_v36 = vld [vmem:[%s6910_s3 + $0xa90] sm:$0xff]  ;;  %v1283_v23 = vld [vmem:[%s6910_s3 + $0xea0] sm:$0xff]  ;;  %v1284_v1 = vld [vmem:[%s6910_s3 + $0xea8] sm:$0xff] }
 0x149   : > { %v2335_v6 = vadd.f32 %v2334_v62, %v1670_v15  ;;  %v1731_v52 = vmul.f32 %v1091_v18, %v6956_v39  ;;  %v1919_v33 = vmul.f32 %v1279_v12, %v3787_v49  ;;  %v1920_v28 = vmul.f32 %v1280_v60, %v3811_v9  ;;  %v1152_v15 = vld [vmem:[%s6910_s3 + $0xa88] sm:$0xff]  ;;  %v1285_v29 = vld [vmem:[%s6910_s3 + $0xeb0] sm:$0xff]  ;;  %v1154_v20 = vld [vmem:[%s6910_s3 + $0xa98] sm:$0xff] }
 0x14a   : > { %v2190_v19 = vadd.f32 %v2189_v37, %v1541_v24  ;;  %v2548_v34 = vadd.f32 %v2547_v26, %v1859_v30  ;;  %v2402_v35 = vadd.f32 %v2401_v8, %v1729_v2  ;;  %v1921_v4 = vmul.f32 %v1281_v38, %v3794_v55  ;;  %v1155_v12 = vld [vmem:[%s6910_s3 + $0xaa0] sm:$0xff]  ;;  %v1156_v8 = vld [vmem:[%s6910_s3 + $0xaa8] sm:$0xff] }
 0x14b   : > { %2336 = vadd.xlane.f32.xlu1 %v2335_v6  ;;  %v1862_v47 = vmul.f32 %v1222_v61, %v4202_v59  ;;  %v1732_v24 = vmul.f32 %v1092_v48, %v4186_v56  ;;  %v1733_v27 = vmul.f32 %v1093_v63, %v4183_v31  ;;  %v1734_v43 = vmul.f32 %v1094_v46, %v4202_v59  ;;  %v1407_v26 = vld [vmem:[%s6910_s3 + $0x1280] sm:$0xff]  ;;  %v1408_v48 = vld [vmem:[%s6910_s3 + $0x1288] sm:$0xff]  ;;  %v1409_v63 = vld [vmem:[%s6910_s3 + $0x1290] sm:$0xff] }
 0x14c   : > { %v2191_v30 = vadd.f32 %v2190_v19, %v1542_v53  ;;  %v2549_v14 = vadd.f32 %v2548_v34, %v1860_v54  ;;  %v2403_v11 = vadd.f32 %v2402_v35, %v1730_v41  ;;  %v2617_v18 = vadd.f32 %v1920_v28, %v1919_v33  ;;  %v1157_v19 = vld [vmem:[%s6910_s3 + $0xab0] sm:$0xff]  ;;  %v1410_v35 = vld [vmem:[%s6910_s3 + $0x1298] sm:$0xff] }
 0x14d   : > { %v1922_v2 = vmul.f32 %v1282_v45, %v3814_v10  ;;  %v1791_v60 = vmul.f32 %v1151_v21, %v3787_v49  ;;  %v1792_v62 = vmul.f32 %v1152_v15, %v3811_v9  ;;  %v1793_v53 = vmul.f32 %v1153_v36, %v3794_v55  ;;  %v1411_v21 = vld [vmem:[%s6910_s3 + $0x12a0] sm:$0xff] }
 0x14e   : > { %2192 = vadd.xlane.f32.xlu0 %v2191_v30  ;;  %v2550_v61 = vadd.f32 %v2549_v14, %v1861_v51  ;;  %v2404_v54 = vadd.f32 %v2403_v11, %v1731_v52  ;;  %v1923_v38 = vmul.f32 %v1283_v23, %v6956_v39  ;;  %v2618_v37 = vadd.f32 %v2617_v18, %v1921_v4  ;;  %v1286_v51 = vld [vmem:[%s6910_s3 + $0xeb8] sm:$0xff] }
 0x14f   : > { %v1924_v46 = vmul.f32 %v1284_v1, %v4186_v56  ;;  %v1925_v41 = vmul.f32 %v1285_v29, %v4183_v31  ;;  %v1794_v6 = vmul.f32 %v1154_v20, %v3814_v10  ;;  %v2473_v52 = vadd.f32 %v1792_v62, %v1791_v60  ;;  %v1343_v1 = vld [vmem:[%s6910_s3 + $0x1080] sm:$0xff]  ;;  %v1345_v29 = vld [vmem:[%s6910_s3 + $0x1090] sm:$0xff]  ;;  %v1158_v18 = vld [vmem:[%s6910_s3 + $0xab8] sm:$0xff] }
 0x150   : > { %v2551_v45 = vadd.f32 %v2550_v61, %v1862_v47  ;;  %v2405_v33 = vadd.f32 %v2404_v54, %v1732_v24  ;;  %v2619_v28 = vadd.f32 %v2618_v37, %v1922_v2  ;;  %v1795_v34 = vmul.f32 %v1155_v12, %v6956_v39  ;;  %v1344_v24 = vld [vmem:[%s6910_s3 + $0x1088] sm:$0xff]  ;;  %v1413_v12 = vld [vmem:[%s6910_s3 + $0x12b0] sm:$0xff] }
 0x151   : > { %v2474_v4 = vadd.f32 %v2473_v52, %v1793_v53  ;;  %v2047_v15 = vmul.f32 %v1407_v26, %v3787_v49  ;;  %v2048_v36 = vmul.f32 %v1408_v48, %v3811_v9  ;;  %v2049_v47 = vmul.f32 %v1409_v63, %v3794_v55  ;;  %v1412_v2 = vld [vmem:[%s6910_s3 + $0x12a8] sm:$0xff]  ;;  %v1347_v63 = vld [vmem:[%s6910_s3 + $0x10a0] sm:$0xff]  ;;  %v1414_v52 = vld [vmem:[%s6910_s3 + $0x12b8] sm:$0xff] }
 0x152   : > { %2552 = vadd.xlane.f32.xlu1 %v2551_v45  ;;  %v2406_v23 = vadd.f32 %v2405_v33, %v1733_v27  ;;  %v1926_v30 = vmul.f32 %v1286_v51, %v4202_v59  ;;  %v2620_v14 = vadd.f32 %v2619_v28, %v1923_v38  ;;  %v1796_v11 = vmul.f32 %v1156_v8, %v4186_v56  ;;  %v1346_v38 = vld [vmem:[%s6910_s3 + $0x1098] sm:$0xff]  ;;  %v841_v45 = vld [vmem:[%s6910_s3 + $0xd0] sm:$0xff] }
 0x153   : > { %v1797_v20 = vmul.f32 %v1157_v19, %v4183_v31  ;;  %v2475_v27 = vadd.f32 %v2474_v4, %v1794_v6  ;;  %v2050_v60 = vmul.f32 %v1410_v35, %v3814_v10  ;;  %v2761_v62 = vadd.f32 %v2048_v36, %v2047_v15  ;;  %v1349_v19 = vld [vmem:[%s6910_s3 + $0x10b0] sm:$0xff]  ;;  %v6957_v36 = vld [vmem:[#allocation2_spill] sm:$0xff] }
 0x154   : > { %v2407_v53 = vadd.f32 %v2406_v23, %v1734_v43  ;;  %v2621_v61 = vadd.f32 %v2620_v14, %v1924_v46  ;;  %v2051_v54 = vmul.f32 %v1411_v21, %v6956_v39  ;;  %v1984_v37 = vmul.f32 %v1344_v24, %v3811_v9  ;;  %v839_v43 = vld [vmem:[%s6910_s3 + $0xc0] sm:$0xff]  ;;  %v840_v46 = vld [vmem:[%s6910_s3 + $0xc8] sm:$0xff]  ;;  %v6958_v24 = vld [vmem:[#allocation4_spill] sm:$0xff] }
 0x155   : > { %v2476_v26 = vadd.f32 %v2475_v27, %v1795_v34  ;;  %v2762_v48 = vadd.f32 %v2761_v62, %v2049_v47  ;;  %v1983_v51 = vmul.f32 %v1343_v1, %v3787_v49  ;;  %v1985_v8 = vmul.f32 %v1345_v29, %v3794_v55  ;;  %v1350_v34 = vld [vmem:[%s6910_s3 + $0x10b8] sm:$0xff]  ;;  %v903_v14 = vld [vmem:[%s6910_s3 + $0x2c0] sm:$0xff] }
 0x156   : > { %2408 = vadd.xlane.f32.xlu0 %v2407_v53  ;;  %v2622_v9 = vadd.f32 %v2621_v61, %v1925_v41  ;;  %v1798_v6 = vmul.f32 %v1158_v18, %v4202_v59  ;;  %v2052_v49 = vmul.f32 %v1412_v2, %v4186_v56  ;;  %v2053_v55 = vmul.f32 %v1413_v12, %v4183_v31  ;;  %v1348_v41 = vld [vmem:[%s6910_s3 + $0x10a8] sm:$0xff]  ;;  %v842_v18 = vld [vmem:[%s6910_s3 + $0xd8] sm:$0xff]  ;;  %v843_v62 = vld [vmem:[%s6910_s3 + $0xe0] sm:$0xff] }
 0x157   : > { %v2477_v33 = vadd.f32 %v2476_v26, %v1796_v11  ;;  %v2763_v28 = vadd.f32 %v2762_v48, %v2050_v60  ;;  %v1986_v35 = vmul.f32 %v1346_v38, %v3814_v10  ;;  %v2689_v4 = vadd.f32 %v1984_v37, %v1983_v51  ;;  %v6959_v10 = vld [vmem:[#allocation3_spill] sm:$0xff]  ;;  %v845_v37 = vld [vmem:[%s6910_s3 + $0xf0] sm:$0xff]  ;;  %v907_v48 = vld [vmem:[%s6910_s3 + $0x2e0] sm:$0xff] }
 0x158   : > { %v2623_v21 = vadd.f32 %v2622_v9, %v1926_v30  ;;  %v1987_v15 = vmul.f32 %v1347_v63, %v6956_v39  ;;  %v1479_v47 = vmul.f32 %v839_v43, %v6957_v36  ;;  %v1480_v23 = vmul.f32 %v840_v46, %v6958_v24  ;;  %v904_v39 = vld [vmem:[%s6910_s3 + $0x2c8] sm:$0xff]  ;;  %v905_v30 = vld [vmem:[%s6910_s3 + $0x2d0] sm:$0xff] }
 0x159   : > { %v2478_v11 = vadd.f32 %v2477_v33, %v1797_v20  ;;  %v2764_v1 = vadd.f32 %v2763_v28, %v2051_v54  ;;  %v2690_v29 = vadd.f32 %v2689_v4, %v1985_v8  ;;  %v1481_v27 = vmul.f32 %v841_v45, %v6959_v10  ;;  %v844_v38 = vld [vmem:[%s6910_s3 + $0xe8] sm:$0xff]  ;;  %v1033_v45 = vld [vmem:[%s6910_s3 + $0x6d0] sm:$0xff] }
 0x15a   : > { %2624 = vadd.xlane.f32.xlu1 %v2623_v21  ;;  %v2054_v2 = vmul.f32 %v1414_v52, %v4202_v59  ;;  %v1988_v20 = vmul.f32 %v1348_v41, %v4186_v56  ;;  %v1989_v12 = vmul.f32 %v1349_v19, %v4183_v31  ;;  %v1990_v60 = vmul.f32 %v1350_v34, %v4202_v59  ;;  %v906_v31 = vld [vmem:[%s6910_s3 + $0x2d8] sm:$0xff]  ;;  %v1031_v52 = vld [vmem:[%s6910_s3 + $0x6c0] sm:$0xff]  ;;  %v908_v41 = vld [vmem:[%s6910_s3 + $0x2e8] sm:$0xff] }
 0x15b   : > { %v2479_v53 = vadd.f32 %v2478_v11, %v1798_v6  ;;  %v2765_v61 = vadd.f32 %v2764_v1, %v2052_v49  ;;  %v2691_v54 = vadd.f32 %v2690_v29, %v1986_v35  ;;  %v2122_v56 = vadd.f32 %v1480_v23, %v1479_v47  ;;  %v6960_v59 = vld [vmem:[#allocation5_spill] sm:$0xff]  ;;  %v1032_v49 = vld [vmem:[%s6910_s3 + $0x6c8] sm:$0xff]  ;;  %v1035_v11 = vld [vmem:[%s6910_s3 + $0x6e0] sm:$0xff] }
 0x15c   : > { %v1482_v26 = vmul.f32 %v842_v18, %v6960_v59  ;;  %v1543_v63 = vmul.f32 %v903_v14, %v6957_v36  ;;  %v1544_v51 = vmul.f32 %v904_v39, %v6958_v24  ;;  %v1545_v8 = vmul.f32 %v905_v30, %v6959_v10  ;;  %v1034_v23 = vld [vmem:[%s6910_s3 + $0x6d8] sm:$0xff] }
 0x15d   : > { %2480 = vadd.xlane.f32.xlu0 %v2479_v53  ;;  %v2766_v43 = vadd.f32 %v2765_v61, %v2053_v55  ;;  %v2692_v46 = vadd.f32 %v2691_v54, %v1987_v15  ;;  %v1483_v9 = vmul.f32 %v843_v62, %v4205_v57  ;;  %v2123_v6 = vadd.f32 %v2122_v56, %v1481_v27  ;;  %v846_v55 = vld [vmem:[%s6910_s3 + $0xf8] sm:$0xff]  ;;  %v909_v15 = vld [vmem:[%s6910_s3 + $0x2f0] sm:$0xff]  ;;  %v968_v27 = vld [vmem:[%s6910_s3 + $0x4c8] sm:$0xff] }
 0x15e   : > { %v1484_v33 = vmul.f32 %v844_v38, %v4224_v32  ;;  %v1485_v28 = vmul.f32 %v845_v37, %v4221_v3  ;;  %v1546_v19 = vmul.f32 %v906_v31, %v6960_v59  ;;  %v2194_v34 = vadd.f32 %v1544_v51, %v1543_v63  ;;  %v967_v62 = vld [vmem:[%s6910_s3 + $0x4c0] sm:$0xff]  ;;  %v969_v53 = vld [vmem:[%s6910_s3 + $0x4d0] sm:$0xff]  ;;  %v910_v61 = vld [vmem:[%s6910_s3 + $0x2f8] sm:$0xff] }
 0x15f   : > { %v2767_v35 = vadd.f32 %v2766_v43, %v2054_v2  ;;  %v2693_v4 = vadd.f32 %v2692_v46, %v1988_v20  ;;  %v2124_v21 = vadd.f32 %v2123_v6, %v1482_v26  ;;  %v1547_v47 = vmul.f32 %v907_v48, %v4205_v57  ;;  %v1036_v38 = vld [vmem:[%s6910_s3 + $0x6e8] sm:$0xff]  ;;  %v1037_v37 = vld [vmem:[%s6910_s3 + $0x6f0] sm:$0xff]  ;;  %v970_v51 = vld [vmem:[%s6910_s3 + $0x4d8] sm:$0xff] }
 0x160   : > { %v2195_v14 = vadd.f32 %v2194_v34, %v1545_v8  ;;  %v1671_v1 = vmul.f32 %v1031_v52, %v6957_v36  ;;  %v1672_v29 = vmul.f32 %v1032_v49, %v6958_v24  ;;  %v1673_v18 = vmul.f32 %v1033_v45, %v6959_v10  ;;  %v1096_v49 = vld [vmem:[%s6910_s3 + $0x8c8] sm:$0xff]  ;;  %v1097_v34 = vld [vmem:[%s6910_s3 + $0x8d0] sm:$0xff] }
 0x161   : > { %2768 = vadd.xlane.f32.xlu1 %v2767_v35  ;;  %v2694_v39 = vadd.f32 %v2693_v4, %v1989_v12  ;;  %v1486_v30 = vmul.f32 %v846_v55, %v4240_v40  ;;  %v2125_v2 = vadd.f32 %v2124_v21, %v1483_v9  ;;  %v1548_v20 = vmul.f32 %v908_v41, %v4224_v32  ;;  %v971_v9 = vld [vmem:[%s6910_s3 + $0x4e0] sm:$0xff]  ;;  %v973_v21 = vld [vmem:[%s6910_s3 + $0x4f0] sm:$0xff] }
 0x162   : > { %v1549_v54 = vmul.f32 %v909_v15, %v4221_v3  ;;  %v2196_v12 = vadd.f32 %v2195_v14, %v1546_v19  ;;  %v1674_v56 = vmul.f32 %v1034_v23, %v6960_v59  ;;  %v2338_v31 = vadd.f32 %v1672_v29, %v1671_v1  ;;  %v974_v15 = vld [vmem:[%s6910_s3 + $0x4f8] sm:$0xff] }
 0x163   : > { %v2695_v26 = vadd.f32 %v2694_v39, %v1990_v60  ;;  %v2126_v48 = vadd.f32 %v2125_v2, %v1484_v33  ;;  %v1675_v63 = vmul.f32 %v1035_v11, %v4205_v57  ;;  %v1608_v8 = vmul.f32 %v968_v27, %v6958_v24  ;;  %v1095_v60 = vld [vmem:[%s6910_s3 + $0x8c0] sm:$0xff]  ;;  %v1038_v33 = vld [vmem:[%s6910_s3 + $0x6f8] sm:$0xff] }
 0x164   : > { %v2197_v43 = vadd.f32 %v2196_v12, %v1547_v47  ;;  %v2339_v46 = vadd.f32 %v2338_v31, %v1673_v18  ;;  %v1607_v6 = vmul.f32 %v967_v62, %v6957_v36  ;;  %v1609_v52 = vmul.f32 %v969_v53, %v6959_v10  ;;  %v1098_v1 = vld [vmem:[%s6910_s3 + $0x8d8] sm:$0xff]  ;;  %v1159_v62 = vld [vmem:[%s6910_s3 + $0xac0] sm:$0xff]  ;;  %v1161_v53 = vld [vmem:[%s6910_s3 + $0xad0] sm:$0xff] }
 0x165   : > { %2696 = vadd.xlane.f32.xlu0 %v2695_v26  ;;  %v2127_v45 = vadd.f32 %v2126_v48, %v1485_v28  ;;  %v1550_v55 = vmul.f32 %v910_v61, %v4240_v40  ;;  %v1676_v41 = vmul.f32 %v1036_v38, %v4224_v32  ;;  %v1677_v19 = vmul.f32 %v1037_v37, %v4221_v3  ;;  %v972_v28 = vld [vmem:[%s6910_s3 + $0x4e8] sm:$0xff]  ;;  %v1099_v37 = vld [vmem:[%s6910_s3 + $0x8e0] sm:$0xff] }
 0x166   : > { %v2198_v35 = vadd.f32 %v2197_v43, %v1548_v20  ;;  %v2340_v4 = vadd.f32 %v2339_v46, %v1674_v56  ;;  %v1610_v47 = vmul.f32 %v970_v51, %v6960_v59  ;;  %v2266_v23 = vadd.f32 %v1608_v8, %v1607_v6  ;;  %v1100_v48 = vld [vmem:[%s6910_s3 + $0x8e8] sm:$0xff]  ;;  %v1162_v8 = vld [vmem:[%s6910_s3 + $0xad8] sm:$0xff]  ;;  %v1163_v46 = vld [vmem:[%s6910_s3 + $0xae0] sm:$0xff] }
 0x167   : > { %v2128_v14 = vadd.f32 %v2127_v45, %v1486_v30  ;;  %v1611_v11 = vmul.f32 %v971_v9, %v4205_v57  ;;  %v1735_v29 = vmul.f32 %v1095_v60, %v6957_v36  ;;  %v1736_v18 = vmul.f32 %v1096_v49, %v6958_v24  ;;  %v1160_v30 = vld [vmem:[%s6910_s3 + $0xac8] sm:$0xff] }
 0x168   : > { %v2199_v27 = vadd.f32 %v2198_v35, %v1549_v54  ;;  %v2341_v39 = vadd.f32 %v2340_v4, %v1675_v63  ;;  %v2267_v2 = vadd.f32 %v2266_v23, %v1609_v52  ;;  %v1737_v20 = vmul.f32 %v1097_v34, %v6959_v10  ;;  %v1101_v63 = vld [vmem:[%s6910_s3 + $0x8f0] sm:$0xff] }
 0x169   : > { %2129 = vadd.xlane.f32.xlu1 %v2128_v14  ;;  %v1678_v61 = vmul.f32 %v1038_v33, %v4240_v40  ;;  %v1612_v54 = vmul.f32 %v972_v28, %v4224_v32  ;;  %v1613_v12 = vmul.f32 %v973_v21, %v4221_v3  ;;  %v1614_v38 = vmul.f32 %v974_v15, %v4240_v40  ;;  %v1351_v33 = vld [vmem:[%s6910_s3 + $0x10c0] sm:$0xff]  ;;  %v1353_v34 = vld [vmem:[%s6910_s3 + $0x10d0] sm:$0xff]  ;;  %v1164_v28 = vld [vmem:[%s6910_s3 + $0xae8] sm:$0xff] }
 0x16a   : > { %v2200_v56 = vadd.f32 %v2199_v27, %v1550_v55  ;;  %v2342_v31 = vadd.f32 %v2341_v39, %v1676_v41  ;;  %v2268_v26 = vadd.f32 %v2267_v2, %v1610_v47  ;;  %v2410_v51 = vadd.f32 %v1736_v18, %v1735_v29  ;;  %v1352_v41 = vld [vmem:[%s6910_s3 + $0x10c8] sm:$0xff]  ;;  %v1354_v29 = vld [vmem:[%s6910_s3 + $0x10d8] sm:$0xff]  ;;  %v1355_v27 = vld [vmem:[%s6910_s3 + $0x10e0] sm:$0xff] }
 0x16b   : > { %v1738_v43 = vmul.f32 %v1098_v1, %v6960_v59  ;;  %v1799_v9 = vmul.f32 %v1159_v62, %v6957_v36  ;;  %v1800_v6 = vmul.f32 %v1160_v30, %v6958_v24  ;;  %v1801_v52 = vmul.f32 %v1161_v53, %v6959_v10  ;;  %v1224_v62 = vld [vmem:[%s6910_s3 + $0xcc8] sm:$0xff] }
 0x16c   : > { %2201 = vadd.xlane.f32.xlu0 %v2200_v56  ;;  %v2343_v60 = vadd.f32 %v2342_v31, %v1677_v19  ;;  %v2269_v49 = vadd.f32 %v2268_v26, %v1611_v11  ;;  %v1739_v45 = vmul.f32 %v1099_v37, %v4205_v57  ;;  %v2411_v55 = vadd.f32 %v2410_v51, %v1737_v20  ;;  %v1102_v19 = vld [vmem:[%s6910_s3 + $0x8f8] sm:$0xff]  ;;  %v1165_v11 = vld [vmem:[%s6910_s3 + $0xaf0] sm:$0xff]  ;;  %v1223_v37 = vld [vmem:[%s6910_s3 + $0xcc0] sm:$0xff] }
 0x16d   : > { %v1740_v35 = vmul.f32 %v1100_v48, %v4224_v32  ;;  %v1741_v4 = vmul.f32 %v1101_v63, %v4221_v3  ;;  %v1802_v21 = vmul.f32 %v1162_v8, %v6960_v59  ;;  %v2482_v15 = vadd.f32 %v1800_v6, %v1799_v9  ;;  %v1225_v56 = vld [vmem:[%s6910_s3 + $0xcd0] sm:$0xff]  ;;  %v1166_v31 = vld [vmem:[%s6910_s3 + $0xaf8] sm:$0xff]  ;;  %v1356_v48 = vld [vmem:[%s6910_s3 + $0x10e8] sm:$0xff] }
 0x16e   : > { %v2344_v47 = vadd.f32 %v2343_v60, %v1678_v61  ;;  %v2270_v23 = vadd.f32 %v2269_v49, %v1612_v54  ;;  %v2412_v14 = vadd.f32 %v2411_v55, %v1738_v43  ;;  %v1803_v1 = vmul.f32 %v1163_v46, %v4205_v57  ;;  %v1357_v63 = vld [vmem:[%s6910_s3 + $0x10f0] sm:$0xff]  ;;  %v1226_v6 = vld [vmem:[%s6910_s3 + $0xcd8] sm:$0xff] }
 0x16f   : > { %v2483_v18 = vadd.f32 %v2482_v15, %v1801_v52  ;;  %v1991_v39 = vmul.f32 %v1351_v33, %v6957_v36  ;;  %v1992_v2 = vmul.f32 %v1352_v41, %v6958_v24  ;;  %v1993_v20 = vmul.f32 %v1353_v34, %v6959_v10  ;;  %v912_v41 = vld [vmem:[%s6910_s3 + $0x308] sm:$0xff]  ;;  %v913_v15 = vld [vmem:[%s6910_s3 + $0x310] sm:$0xff] }
 0x170   : > { %2345 = vadd.xlane.f32.xlu1 %v2344_v47  ;;  %v2271_v30 = vadd.f32 %v2270_v23, %v1613_v12  ;;  %v1742_v53 = vmul.f32 %v1102_v19, %v4240_v40  ;;  %v2413_v61 = vadd.f32 %v2412_v14, %v1739_v45  ;;  %v1804_v54 = vmul.f32 %v1164_v28, %v4224_v32  ;;  %v1227_v45 = vld [vmem:[%s6910_s3 + $0xce0] sm:$0xff]  ;;  %v1229_v14 = vld [vmem:[%s6910_s3 + $0xcf0] sm:$0xff] }
 0x171   : > { %v1805_v26 = vmul.f32 %v1165_v11, %v4221_v3  ;;  %v2484_v12 = vadd.f32 %v2483_v18, %v1802_v21  ;;  %v1994_v51 = vmul.f32 %v1354_v29, %v6960_v59  ;;  %v2698_v8 = vadd.f32 %v1992_v2, %v1991_v39  ;;  %v1230_v11 = vld [vmem:[%s6910_s3 + $0xcf8] sm:$0xff]  ;;  %v6961_v39 = vld [vmem:[#allocation6_spill] sm:$0xff] }
 0x172   : > { %v2272_v43 = vadd.f32 %v2271_v30, %v1614_v38  ;;  %v2414_v46 = vadd.f32 %v2413_v61, %v1740_v35  ;;  %v1995_v9 = vmul.f32 %v1355_v27, %v4205_v57  ;;  %v1864_v52 = vmul.f32 %v1224_v62, %v6958_v24  ;;  %v911_v38 = vld [vmem:[%s6910_s3 + $0x300] sm:$0xff]  ;;  %v1358_v35 = vld [vmem:[%s6910_s3 + $0x10f8] sm:$0xff] }
 0x173   : > { %v2485_v60 = vadd.f32 %v2484_v12, %v1803_v1  ;;  %v2699_v49 = vadd.f32 %v2698_v8, %v1993_v20  ;;  %v1863_v55 = vmul.f32 %v1223_v37, %v6957_v36  ;;  %v1865_v33 = vmul.f32 %v1225_v56, %v6959_v10  ;;  %v6962_v20 = vld [vmem:[#allocation8_spill] sm:$0xff]  ;;  %v1287_v30 = vld [vmem:[%s6910_s3 + $0xec0] sm:$0xff]  ;;  %v914_v56 = vld [vmem:[%s6910_s3 + $0x318] sm:$0xff] }
 0x174   : > { %2273 = vadd.xlane.f32.xlu0 %v2272_v43  ;;  %v2415_v34 = vadd.f32 %v2414_v46, %v1741_v4  ;;  %v1806_v19 = vmul.f32 %v1166_v31, %v4240_v40  ;;  %v1996_v28 = vmul.f32 %v1356_v48, %v4224_v32  ;;  %v1997_v21 = vmul.f32 %v1357_v63, %v4221_v3  ;;  %v1228_v4 = vld [vmem:[%s6910_s3 + $0xce8] sm:$0xff]  ;;  %v1289_v48 = vld [vmem:[%s6910_s3 + $0xed0] sm:$0xff]  ;;  %v915_v43 = vld [vmem:[%s6910_s3 + $0x320] sm:$0xff] }
 0x175   : > { %v2486_v47 = vadd.f32 %v2485_v60, %v1804_v54  ;;  %v2700_v23 = vadd.f32 %v2699_v49, %v1994_v51  ;;  %v1866_v1 = vmul.f32 %v1226_v6, %v6960_v59  ;;  %v2554_v29 = vadd.f32 %v1864_v52, %v1863_v55  ;;  %v6963_v31 = vld [vmem:[#allocation7_spill] sm:$0xff]  ;;  %v917_v60 = vld [vmem:[%s6910_s3 + $0x330] sm:$0xff]  ;;  %v6964_v55 = vld [vmem:[#allocation9_spill] sm:$0xff] }
 0x176   : > { %v2416_v18 = vadd.f32 %v2415_v34, %v1742_v53  ;;  %v1867_v27 = vmul.f32 %v1227_v45, %v4205_v57  ;;  %v1551_v2 = vmul.f32 %v911_v38, %v6961_v39  ;;  %v1552_v62 = vmul.f32 %v912_v41, %v6962_v20  ;;  %v1288_v53 = vld [vmem:[%s6910_s3 + $0xec8] sm:$0xff]  ;;  %v1290_v45 = vld [vmem:[%s6910_s3 + $0xed8] sm:$0xff]  ;;  %v1291_v38 = vld [vmem:[%s6910_s3 + $0xee0] sm:$0xff] }
 0x177   : > { %v2487_v61 = vadd.f32 %v2486_v47, %v1805_v26  ;;  %v2701_v54 = vadd.f32 %v2700_v23, %v1995_v9  ;;  %v2555_v37 = vadd.f32 %v2554_v29, %v1865_v33  ;;  %v1553_v12 = vmul.f32 %v913_v15, %v6963_v31  ;;  %v916_v52 = vld [vmem:[%s6910_s3 + $0x328] sm:$0xff]  ;;  %v1103_v23 = vld [vmem:[%s6910_s3 + $0x900] sm:$0xff] }
 0x178   : > { %2417 = vadd.xlane.f32.xlu1 %v2416_v18  ;;  %v1998_v63 = vmul.f32 %v1358_v35, %v4240_v40  ;;  %v1868_v26 = vmul.f32 %v1228_v4, %v4224_v32  ;;  %v1869_v51 = vmul.f32 %v1229_v14, %v4221_v3  ;;  %v1870_v8 = vmul.f32 %v1230_v11, %v4240_v40  ;;  %v1104_v4 = vld [vmem:[%s6910_s3 + $0x908] sm:$0xff]  ;;  %v1105_v14 = vld [vmem:[%s6910_s3 + $0x910] sm:$0xff] }
 0x179   : > { %v2488_v46 = vadd.f32 %v2487_v61, %v1806_v19  ;;  %v2702_v9 = vadd.f32 %v2701_v54, %v1996_v28  ;;  %v2556_v6 = vadd.f32 %v2555_v37, %v1866_v1  ;;  %v2203_v49 = vadd.f32 %v1552_v62, %v1551_v2  ;;  %v1292_v29 = vld [vmem:[%s6910_s3 + $0xee8] sm:$0xff]  ;;  %v1293_v61 = vld [vmem:[%s6910_s3 + $0xef0] sm:$0xff]  ;;  %v1106_v37 = vld [vmem:[%s6910_s3 + $0x918] sm:$0xff] }
 0x17a   : > { %v1554_v33 = vmul.f32 %v914_v56, %v6964_v55  ;;  %v1927_v41 = vmul.f32 %v1287_v30, %v6957_v36  ;;  %v1928_v34 = vmul.f32 %v1288_v53, %v6958_v24  ;;  %v1929_v19 = vmul.f32 %v1289_v48, %v6959_v10 }
 0x17b   : > { %2489 = vadd.xlane.f32.xlu0 %v2488_v46  ;;  %v2703_v35 = vadd.f32 %v2702_v9, %v1997_v21  ;;  %v2557_v28 = vadd.f32 %v2556_v6, %v1867_v27  ;;  %v1555_v15 = vmul.f32 %v915_v43, %v4243_v13  ;;  %v2204_v47 = vadd.f32 %v2203_v49, %v1553_v12  ;;  %v918_v21 = vld [vmem:[%s6910_s3 + $0x338] sm:$0xff]  ;;  %v1107_v12 = vld [vmem:[%s6910_s3 + $0x920] sm:$0xff] }
 0x17c   : > { %v1556_v11 = vmul.f32 %v916_v52, %v4261_v25  ;;  %v1557_v1 = vmul.f32 %v917_v60, %v4258_v16  ;;  %v1930_v18 = vmul.f32 %v1290_v45, %v6960_v59  ;;  %v2626_v27 = vadd.f32 %v1928_v34, %v1927_v41  ;;  %v1415_v52 = vld [vmem:[%s6910_s3 + $0x12c0] sm:$0xff]  ;;  %v1417_v60 = vld [vmem:[%s6910_s3 + $0x12d0] sm:$0xff]  ;;  %v1294_v49 = vld [vmem:[%s6910_s3 + $0xef8] sm:$0xff] }
 0x17d   : > { %v2704_v2 = vadd.f32 %v2703_v35, %v1998_v63  ;;  %v2558_v62 = vadd.f32 %v2557_v28, %v1868_v26  ;;  %v2205_v30 = vadd.f32 %v2204_v47, %v1554_v33  ;;  %v1931_v54 = vmul.f32 %v1291_v38, %v4205_v57  ;;  %v1416_v26 = vld [vmem:[%s6910_s3 + $0x12c8] sm:$0xff]  ;;  %v1109_v38 = vld [vmem:[%s6910_s3 + $0x930] sm:$0xff] }
 0x17e   : > { %v2627_v56 = vadd.f32 %v2626_v27, %v1929_v19  ;;  %v1743_v53 = vmul.f32 %v1103_v23, %v6961_v39  ;;  %v1744_v48 = vmul.f32 %v1104_v4, %v6962_v20  ;;  %v1745_v63 = vmul.f32 %v1105_v14, %v6963_v31  ;;  %v1108_v33 = vld [vmem:[%s6910_s3 + $0x928] sm:$0xff]  ;;  %v1419_v14 = vld [vmem:[%s6910_s3 + $0x12e0] sm:$0xff]  ;;  %v1110_v27 = vld [vmem:[%s6910_s3 + $0x938] sm:$0xff] }
 0x17f   : > { %2705 = vadd.xlane.f32.xlu1 %v2704_v2  ;;  %v2559_v43 = vadd.f32 %v2558_v62, %v1869_v51  ;;  %v1558_v46 = vmul.f32 %v918_v21, %v4277_v17  ;;  %v2206_v9 = vadd.f32 %v2205_v30, %v1555_v15  ;;  %v1932_v6 = vmul.f32 %v1292_v29, %v4224_v32  ;;  %v1418_v15 = vld [vmem:[%s6910_s3 + $0x12d8] sm:$0xff]  ;;  %v1169_v2 = vld [vmem:[%s6910_s3 + $0xb10] sm:$0xff] }
 0x180   : > { %v1933_v45 = vmul.f32 %v1293_v61, %v4221_v3  ;;  %v2628_v51 = vadd.f32 %v2627_v56, %v1930_v18  ;;  %v1746_v41 = vmul.f32 %v1106_v37, %v6964_v55  ;;  %v2419_v34 = vadd.f32 %v1744_v48, %v1743_v53  ;;  %v1421_v61 = vld [vmem:[%s6910_s3 + $0x12f0] sm:$0xff] }
 0x181   : > { %v2560_v19 = vadd.f32 %v2559_v43, %v1870_v8  ;;  %v2207_v35 = vadd.f32 %v2206_v9, %v1556_v11  ;;  %v1747_v28 = vmul.f32 %v1107_v12, %v4243_v13  ;;  %v2056_v47 = vmul.f32 %v1416_v26, %v6958_v24  ;;  %v1167_v8 = vld [vmem:[%s6910_s3 + $0xb00] sm:$0xff]  ;;  %v1168_v11 = vld [vmem:[%s6910_s3 + $0xb08] sm:$0xff] }
 0x182   : > { %v2629_v23 = vadd.f32 %v2628_v51, %v1931_v54  ;;  %v2420_v4 = vadd.f32 %v2419_v34, %v1745_v63  ;;  %v2055_v21 = vmul.f32 %v1415_v52, %v6957_v36  ;;  %v2057_v29 = vmul.f32 %v1417_v60, %v6959_v10  ;;  %v1422_v54 = vld [vmem:[%s6910_s3 + $0x12f8] sm:$0xff]  ;;  %v847_v26 = vld [vmem:[%s6910_s3 + $0x100] sm:$0xff] }
 0x183   : > { %2561 = vadd.xlane.f32.xlu0 %v2560_v19  ;;  %v2208_v24 = vadd.f32 %v2207_v35, %v1557_v1  ;;  %v1934_v18 = vmul.f32 %v1294_v49, %v4240_v40  ;;  %v1748_v36 = vmul.f32 %v1108_v33, %v4261_v25  ;;  %v1749_v10 = vmul.f32 %v1109_v38, %v4258_v16  ;;  %v1420_v1 = vld [vmem:[%s6910_s3 + $0x12e8] sm:$0xff]  ;;  %v1170_v52 = vld [vmem:[%s6910_s3 + $0xb18] sm:$0xff]  ;;  %v1171_v33 = vld [vmem:[%s6910_s3 + $0xb20] sm:$0xff] }
 0x184   : > { %v2630_v62 = vadd.f32 %v2629_v23, %v1932_v6  ;;  %v2421_v30 = vadd.f32 %v2420_v4, %v1746_v41  ;;  %v2058_v37 = vmul.f32 %v1418_v15, %v6960_v59  ;;  %v2770_v56 = vadd.f32 %v2056_v47, %v2055_v21  ;;  %v1172_v19 = vld [vmem:[%s6910_s3 + $0xb28] sm:$0xff]  ;;  %v1173_v35 = vld [vmem:[%s6910_s3 + $0xb30] sm:$0xff] }
 0x185   : > { %v2209_v12 = vadd.f32 %v2208_v24, %v1558_v46  ;;  %v2059_v53 = vmul.f32 %v1419_v14, %v4205_v57  ;;  %v1807_v48 = vmul.f32 %v1167_v8, %v6961_v39  ;;  %v1808_v63 = vmul.f32 %v1168_v11, %v6962_v20  ;;  %v848_v57 = vld [vmem:[%s6910_s3 + $0x108] sm:$0xff]  ;;  %v849_v46 = vld [vmem:[%s6910_s3 + $0x110] sm:$0xff]  ;;  %v1231_v8 = vld [vmem:[%s6910_s3 + $0xd00] sm:$0xff] }
 0x186   : > { %v2631_v43 = vadd.f32 %v2630_v62, %v1933_v45  ;;  %v2422_v9 = vadd.f32 %v2421_v30, %v1747_v28  ;;  %v2771_v6 = vadd.f32 %v2770_v56, %v2057_v29  ;;  %v1809_v59 = vmul.f32 %v1169_v2, %v6963_v31  ;;  %v851_v28 = vld [vmem:[%s6910_s3 + $0x120] sm:$0xff]  ;;  %v1232_v11 = vld [vmem:[%s6910_s3 + $0xd08] sm:$0xff]  ;;  %v1233_v24 = vld [vmem:[%s6910_s3 + $0xd10] sm:$0xff] }
 0x187   : > { %2210 = vadd.xlane.f32.xlu1 %v2209_v12  ;;  %v1750_v60 = vmul.f32 %v1110_v27, %v4277_v17  ;;  %v2060_v49 = vmul.f32 %v1420_v1, %v4224_v32  ;;  %v2061_v45 = vmul.f32 %v1421_v61, %v4221_v3  ;;  %v2062_v51 = vmul.f32 %v1422_v54, %v4240_v40  ;;  %v850_v3 = vld [vmem:[%s6910_s3 + $0x118] sm:$0xff]  ;;  %v853_v54 = vld [vmem:[%s6910_s3 + $0x130] sm:$0xff] }
 0x188   : > { %v2632_v38 = vadd.f32 %v2631_v43, %v1934_v18  ;;  %v2423_v41 = vadd.f32 %v2422_v9, %v1748_v36  ;;  %v2772_v34 = vadd.f32 %v2771_v6, %v2058_v37  ;;  %v2491_v32 = vadd.f32 %v1808_v63, %v1807_v48  ;;  %v1174_v18 = vld [vmem:[%s6910_s3 + $0xb38] sm:$0xff]  ;;  %v976_v43 = vld [vmem:[%s6910_s3 + $0x508] sm:$0xff] }
 0x189   : > { %v1810_v40 = vmul.f32 %v1170_v52, %v6964_v55  ;;  %v1487_v15 = vmul.f32 %v847_v26, %v6961_v39  ;;  %v1488_v47 = vmul.f32 %v848_v57, %v6962_v20  ;;  %v1489_v23 = vmul.f32 %v849_v46, %v6963_v31  ;;  %v1234_v56 = vld [vmem:[%s6910_s3 + $0xd18] sm:$0xff]  ;;  %v975_v57 = vld [vmem:[%s6910_s3 + $0x500] sm:$0xff]  ;;  %v977_v46 = vld [vmem:[%s6910_s3 + $0x510] sm:$0xff] }
 0x18a   : > { %2633 = vadd.xlane.f32.xlu0 %v2632_v38  ;;  %v2424_v4 = vadd.f32 %v2423_v41, %v1749_v10  ;;  %v2773_v14 = vadd.f32 %v2772_v34, %v2059_v53  ;;  %v1811_v21 = vmul.f32 %v1171_v33, %v4243_v13  ;;  %v2492_v29 = vadd.f32 %v2491_v32, %v1809_v59  ;;  %v852_v10 = vld [vmem:[%s6910_s3 + $0x128] sm:$0xff]  ;;  %v1235_v53 = vld [vmem:[%s6910_s3 + $0xd20] sm:$0xff]  ;;  %v1237_v38 = vld [vmem:[%s6910_s3 + $0xd30] sm:$0xff] }
 0x18b   : > { %v1812_v27 = vmul.f32 %v1172_v19, %v4261_v25  ;;  %v1813_v36 = vmul.f32 %v1173_v35, %v4258_v16  ;;  %v1490_v2 = vmul.f32 %v850_v3, %v6964_v55  ;;  %v2131_v62 = vadd.f32 %v1488_v47, %v1487_v15  ;;  %v1236_v33 = vld [vmem:[%s6910_s3 + $0xd28] sm:$0xff]  ;;  %v978_v3 = vld [vmem:[%s6910_s3 + $0x518] sm:$0xff]  ;;  %v979_v47 = vld [vmem:[%s6910_s3 + $0x520] sm:$0xff] }
 0x18c   : > { %v2425_v30 = vadd.f32 %v2424_v4, %v1750_v60  ;;  %v2774_v1 = vadd.f32 %v2773_v14, %v2060_v49  ;;  %v2493_v61 = vadd.f32 %v2492_v29, %v1810_v40  ;;  %v1491_v37 = vmul.f32 %v851_v28, %v4243_v13  ;;  %v854_v60 = vld [vmem:[%s6910_s3 + $0x138] sm:$0xff]  ;;  %v1360_v14 = vld [vmem:[%s6910_s3 + $0x1108] sm:$0xff] }
 0x18d   : > { %v2132_v12 = vadd.f32 %v2131_v62, %v1489_v23  ;;  %v1871_v48 = vmul.f32 %v1231_v8, %v6961_v39  ;;  %v1872_v63 = vmul.f32 %v1232_v11, %v6962_v20  ;;  %v1873_v26 = vmul.f32 %v1233_v24, %v6963_v31  ;;  %v1238_v8 = vld [vmem:[%s6910_s3 + $0xd38] sm:$0xff] }
 0x18e   : > { %2426 = vadd.xlane.f32.xlu1 %v2425_v30  ;;  %v2775_v9 = vadd.f32 %v2774_v1, %v2061_v45  ;;  %v1814_v6 = vmul.f32 %v1174_v18, %v4277_v17  ;;  %v2494_v52 = vadd.f32 %v2493_v61, %v1811_v21  ;;  %v1492_v59 = vmul.f32 %v852_v10, %v4261_v25  ;;  %v1361_v18 = vld [vmem:[%s6910_s3 + $0x1110] sm:$0xff]  ;;  %v982_v62 = vld [vmem:[%s6910_s3 + $0x538] sm:$0xff] }
 0x18f   : > { %v1493_v49 = vmul.f32 %v853_v54, %v4258_v16  ;;  %v2133_v45 = vadd.f32 %v2132_v12, %v1490_v2  ;;  %v1874_v41 = vmul.f32 %v1234_v56, %v6964_v55  ;;  %v2563_v34 = vadd.f32 %v1872_v63, %v1871_v48  ;;  %v981_v2 = vld [vmem:[%s6910_s3 + $0x530] sm:$0xff] }
 0x190   : > { %v2776_v19 = vadd.f32 %v2775_v9, %v2062_v51  ;;  %v2495_v35 = vadd.f32 %v2494_v52, %v1812_v27  ;;  %v1875_v32 = vmul.f32 %v1235_v53, %v4243_v13  ;;  %v1616_v40 = vmul.f32 %v976_v43, %v6962_v20  ;;  %v1359_v51 = vld [vmem:[%s6910_s3 + $0x1100] sm:$0xff]  ;;  %v1040_v9 = vld [vmem:[%s6910_s3 + $0x708] sm:$0xff] }
 0x191   : > { %v2134_v28 = vadd.f32 %v2133_v45, %v1491_v37  ;;  %v2564_v15 = vadd.f32 %v2563_v34, %v1873_v26  ;;  %v1615_v23 = vmul.f32 %v975_v57, %v6961_v39  ;;  %v1617_v4 = vmul.f32 %v977_v46, %v6963_v31  ;;  %v1362_v37 = vld [vmem:[%s6910_s3 + $0x1118] sm:$0xff]  ;;  %v1039_v43 = vld [vmem:[%s6910_s3 + $0x700] sm:$0xff] }
 0x192   : > { %2777 = vadd.xlane.f32.xlu0 %v2776_v19  ;;  %v2496_v21 = vadd.f32 %v2495_v35, %v1813_v36  ;;  %v1494_v29 = vmul.f32 %v854_v60, %v4277_v17  ;;  %v1876_v11 = vmul.f32 %v1236_v33, %v4261_v25  ;;  %v1877_v24 = vmul.f32 %v1237_v38, %v4258_v16  ;;  %v980_v36 = vld [vmem:[%s6910_s3 + $0x528] sm:$0xff]  ;;  %v1363_v60 = vld [vmem:[%s6910_s3 + $0x1120] sm:$0xff]  ;;  %v1042_v19 = vld [vmem:[%s6910_s3 + $0x718] sm:$0xff] }
 0x193   : > { %v2135_v27 = vadd.f32 %v2134_v28, %v1492_v59  ;;  %v2565_v10 = vadd.f32 %v2564_v15, %v1874_v41  ;;  %v1618_v30 = vmul.f32 %v978_v3, %v6964_v55  ;;  %v2275_v1 = vadd.f32 %v1616_v40, %v1615_v23  ;;  %v1364_v38 = vld [vmem:[%s6910_s3 + $0x1128] sm:$0xff]  ;;  %v1365_v41 = vld [vmem:[%s6910_s3 + $0x1130] sm:$0xff] }
 0x194   : > { %v2497_v61 = vadd.f32 %v2496_v21, %v1814_v6  ;;  %v1619_v54 = vmul.f32 %v979_v47, %v4243_v13  ;;  %v1999_v56 = vmul.f32 %v1359_v51, %v6961_v39  ;;  %v2000_v12 = vmul.f32 %v1360_v14, %v6962_v20  ;;  %v1041_v6 = vld [vmem:[%s6910_s3 + $0x710] sm:$0xff]  ;;  %v919_v51 = vld [vmem:[%s6910_s3 + $0x340] sm:$0xff]  ;;  %v920_v14 = vld [vmem:[%s6910_s3 + $0x348] sm:$0xff] }
 0x195   : > { %v2136_v53 = vadd.f32 %v2135_v27, %v1493_v49  ;;  %v2566_v48 = vadd.f32 %v2565_v10, %v1875_v32  ;;  %v2276_v63 = vadd.f32 %v2275_v1, %v1617_v4  ;;  %v2001_v26 = vmul.f32 %v1361_v18, %v6963_v31  ;;  %v1043_v32 = vld [vmem:[%s6910_s3 + $0x720] sm:$0xff]  ;;  %v921_v21 = vld [vmem:[%s6910_s3 + $0x350] sm:$0xff]  ;;  %v922_v1 = vld [vmem:[%s6910_s3 + $0x358] sm:$0xff] }
 0x196   : > { %2498 = vadd.xlane.f32.xlu1 %v2497_v61  ;;  %v1878_v52 = vmul.f32 %v1238_v8, %v4277_v17  ;;  %v1620_v59 = vmul.f32 %v980_v36, %v4261_v25  ;;  %v1621_v57 = vmul.f32 %v981_v2, %v4258_v16  ;;  %v1622_v46 = vmul.f32 %v982_v62, %v4277_v17  ;;  %v1045_v62 = vld [vmem:[%s6910_s3 + $0x730] sm:$0xff] }
 0x197   : > { %v2137_v49 = vadd.f32 %v2136_v53, %v1494_v29  ;;  %v2567_v45 = vadd.f32 %v2566_v48, %v1876_v11  ;;  %v2277_v33 = vadd.f32 %v2276_v63, %v1618_v30  ;;  %v2707_v34 = vadd.f32 %v2000_v12, %v1999_v56  ;;  %v1366_v29 = vld [vmem:[%s6910_s3 + $0x1138] sm:$0xff]  ;;  %v6966_v12 = vld [vmem:[#allocation12_spill] sm:$0xff]  ;;  %v6967_v48 = vld [vmem:[#allocation11_spill] sm:$0xff] }
 0x198   : > { %v2002_v35 = vmul.f32 %v1362_v37, %v6964_v55  ;;  %v1679_v3 = vmul.f32 %v1039_v43, %v6961_v39  ;;  %v1680_v40 = vmul.f32 %v1040_v9, %v6962_v20  ;;  %v1681_v28 = vmul.f32 %v1041_v6, %v6963_v31  ;;  %v6965_v37 = vld [vmem:[#allocation10_spill] sm:$0xff] }
 0x199   : > { %2138 = vadd.xlane.f32.xlu0 %v2137_v49  ;;  %v2568_v15 = vadd.f32 %v2567_v45, %v1877_v24  ;;  %v2278_v47 = vadd.f32 %v2277_v33, %v1619_v54  ;;  %v2003_v23 = vmul.f32 %v1363_v60, %v4243_v13  ;;  %v2708_v4 = vadd.f32 %v2707_v34, %v2001_v26  ;;  %v1044_v24 = vld [vmem:[%s6910_s3 + $0x728] sm:$0xff]  ;;  %v923_v54 = vld [vmem:[%s6910_s3 + $0x360] sm:$0xff]  ;;  %v1297_v60 = vld [vmem:[%s6910_s3 + $0xf10] sm:$0xff] }
 0x19a   : > { %v2004_v8 = vmul.f32 %v1364_v38, %v4261_v25  ;;  %v2005_v11 = vmul.f32 %v1365_v41, %v4258_v16  ;;  %v1682_v18 = vmul.f32 %v1042_v19, %v6964_v55  ;;  %v2347_v27 = vadd.f32 %v1680_v40, %v1679_v3  ;;  %v1296_v26 = vld [vmem:[%s6910_s3 + $0xf08] sm:$0xff]  ;;  %v1046_v49 = vld [vmem:[%s6910_s3 + $0x738] sm:$0xff]  ;;  %v925_v38 = vld [vmem:[%s6910_s3 + $0x370] sm:$0xff] }
 0x19b   : > { %v2569_v10 = vadd.f32 %v2568_v15, %v1878_v52  ;;  %v2279_v36 = vadd.f32 %v2278_v47, %v1620_v59  ;;  %v2709_v2 = vadd.f32 %v2708_v4, %v2002_v35  ;;  %v1683_v30 = vmul.f32 %v1043_v32, %v4243_v13  ;;  %v1295_v59 = vld [vmem:[%s6910_s3 + $0xf00] sm:$0xff]  ;;  %v924_v33 = vld [vmem:[%s6910_s3 + $0x368] sm:$0xff]  ;;  %v6968_v41 = vld [vmem:[#allocation13_spill] sm:$0xff] }
 0x19c   : > { %v2348_v61 = vadd.f32 %v2347_v27, %v1681_v28  ;;  %v1559_v56 = vmul.f32 %v919_v51, %v6965_v37  ;;  %v1560_v53 = vmul.f32 %v920_v14, %v6966_v12  ;;  %v1561_v63 = vmul.f32 %v921_v21, %v6967_v48  ;;  %v1298_v40 = vld [vmem:[%s6910_s3 + $0xf18] sm:$0xff]  ;;  %v984_v14 = vld [vmem:[%s6910_s3 + $0x548] sm:$0xff]  ;;  %v985_v27 = vld [vmem:[%s6910_s3 + $0x550] sm:$0xff] }
 0x19d   : > { %2570 = vadd.xlane.f32.xlu1 %v2569_v10  ;;  %v2280_v43 = vadd.f32 %v2279_v36, %v1621_v57  ;;  %v2006_v9 = vmul.f32 %v1366_v29, %v4277_v17  ;;  %v2710_v6 = vadd.f32 %v2709_v2, %v2003_v23  ;;  %v1684_v52 = vmul.f32 %v1044_v24, %v4261_v25  ;;  %v1299_v23 = vld [vmem:[%s6910_s3 + $0xf20] sm:$0xff]  ;;  %v1301_v2 = vld [vmem:[%s6910_s3 + $0xf30] sm:$0xff] }
 0x19e   : > { %v1685_v45 = vmul.f32 %v1045_v62, %v4258_v16  ;;  %v2349_v57 = vadd.f32 %v2348_v61, %v1682_v18  ;;  %v1562_v34 = vmul.f32 %v922_v1, %v6968_v41  ;;  %v2212_v19 = vadd.f32 %v1560_v53, %v1559_v56  ;;  %v1302_v62 = vld [vmem:[%s6910_s3 + $0xf38] sm:$0xff] }
 0x19f   : > { %v2281_v35 = vadd.f32 %v2280_v43, %v1622_v46  ;;  %v2711_v32 = vadd.f32 %v2710_v6, %v2004_v8  ;;  %v1563_v3 = vmul.f32 %v923_v54, %v4280_v22  ;;  %v1936_v28 = vmul.f32 %v1296_v26, %v6962_v20  ;;  %v983_v46 = vld [vmem:[%s6910_s3 + $0x540] sm:$0xff]  ;;  %v926_v8 = vld [vmem:[%s6910_s3 + $0x378] sm:$0xff] }
 0x1a0   : > { %v2350_v15 = vadd.f32 %v2349_v57, %v1683_v30  ;;  %v2213_v47 = vadd.f32 %v2212_v19, %v1561_v63  ;;  %v1935_v4 = vmul.f32 %v1295_v59, %v6961_v39  ;;  %v1937_v51 = vmul.f32 %v1297_v60, %v6963_v31  ;;  %v1423_v63 = vld [vmem:[%s6910_s3 + $0x1300] sm:$0xff]  ;;  %v1425_v60 = vld [vmem:[%s6910_s3 + $0x1310] sm:$0xff] }
 0x1a1   : > { %2282 = vadd.xlane.f32.xlu0 %v2281_v35  ;;  %v2712_v21 = vadd.f32 %v2711_v32, %v2005_v11  ;;  %v1686_v29 = vmul.f32 %v1046_v49, %v4277_v17  ;;  %v1564_v24 = vmul.f32 %v924_v33, %v4302_v7  ;;  %v1565_v18 = vmul.f32 %v925_v38, %v4299_v50  ;;  %v1300_v11 = vld [vmem:[%s6910_s3 + $0xf28] sm:$0xff]  ;;  %v987_v38 = vld [vmem:[%s6910_s3 + $0x560] sm:$0xff] }
 0x1a2   : > { %v2351_v10 = vadd.f32 %v2350_v15, %v1684_v52  ;;  %v2214_v36 = vadd.f32 %v2213_v47, %v1562_v34  ;;  %v1938_v30 = vmul.f32 %v1298_v40, %v6964_v55  ;;  %v2635_v1 = vadd.f32 %v1936_v28, %v1935_v4  ;;  %v986_v52 = vld [vmem:[%s6910_s3 + $0x558] sm:$0xff]  ;;  %v988_v32 = vld [vmem:[%s6910_s3 + $0x568] sm:$0xff]  ;;  %v1427_v47 = vld [vmem:[%s6910_s3 + $0x1320] sm:$0xff] }
 0x1a3   : > { %v2713_v61 = vadd.f32 %v2712_v21, %v2006_v9  ;;  %v1939_v54 = vmul.f32 %v1299_v23, %v4243_v13  ;;  %v1623_v56 = vmul.f32 %v983_v46, %v6965_v37  ;;  %v1624_v53 = vmul.f32 %v984_v14, %v6966_v12  ;;  %v1424_v9 = vld [vmem:[%s6910_s3 + $0x1308] sm:$0xff]  ;;  %v1426_v28 = vld [vmem:[%s6910_s3 + $0x1318] sm:$0xff] }
 0x1a4   : > { %v2352_v26 = vadd.f32 %v2351_v10, %v1685_v45  ;;  %v2215_v43 = vadd.f32 %v2214_v36, %v1563_v3  ;;  %v2636_v6 = vadd.f32 %v2635_v1, %v1937_v51  ;;  %v1625_v59 = vmul.f32 %v985_v27, %v6967_v48  ;;  %v989_v3 = vld [vmem:[%s6910_s3 + $0x570] sm:$0xff]  ;;  %v1428_v27 = vld [vmem:[%s6910_s3 + $0x1328] sm:$0xff] }
 0x1a5   : > { %2714 = vadd.xlane.f32.xlu1 %v2713_v61  ;;  %v1566_v49 = vmul.f32 %v926_v8, %v4318_v0  ;;  %v1940_v45 = vmul.f32 %v1300_v11, %v4261_v25  ;;  %v1941_v57 = vmul.f32 %v1301_v2, %v4258_v16  ;;  %v1942_v33 = vmul.f32 %v1302_v62, %v4277_v17  ;;  %v1239_v8 = vld [vmem:[%s6910_s3 + $0xd40] sm:$0xff]  ;;  %v1242_v61 = vld [vmem:[%s6910_s3 + $0xd58] sm:$0xff] }
 0x1a6   : > { %v2353_v34 = vadd.f32 %v2352_v26, %v1686_v29  ;;  %v2216_v19 = vadd.f32 %v2215_v43, %v1564_v24  ;;  %v2637_v35 = vadd.f32 %v2636_v6, %v1938_v30  ;;  %v2284_v40 = vadd.f32 %v1624_v53, %v1623_v56  ;;  %v1240_v24 = vld [vmem:[%s6910_s3 + $0xd48] sm:$0xff]  ;;  %v1429_v30 = vld [vmem:[%s6910_s3 + $0x1330] sm:$0xff]  ;;  %v1243_v56 = vld [vmem:[%s6910_s3 + $0xd60] sm:$0xff] }
 0x1a7   : > { %v1626_v15 = vmul.f32 %v986_v52, %v6968_v41  ;;  %v2063_v23 = vmul.f32 %v1423_v63, %v6961_v39  ;;  %v2064_v4 = vmul.f32 %v1424_v9, %v6962_v20  ;;  %v2065_v51 = vmul.f32 %v1425_v60, %v6963_v31  ;;  %v1241_v39 = vld [vmem:[%s6910_s3 + $0xd50] sm:$0xff]  ;;  %v990_v20 = vld [vmem:[%s6910_s3 + $0x578] sm:$0xff]  ;;  %v856_v26 = vld [vmem:[%s6910_s3 + $0x148] sm:$0xff] }
 0x1a8   : > { %2354 = vadd.xlane.f32.xlu0 %v2353_v34  ;;  %v2217_v46 = vadd.f32 %v2216_v19, %v1565_v18  ;;  %v2638_v14 = vadd.f32 %v2637_v35, %v1939_v54  ;;  %v1627_v21 = vmul.f32 %v987_v38, %v4280_v22  ;;  %v2285_v29 = vadd.f32 %v2284_v40, %v1625_v59  ;;  %v855_v59 = vld [vmem:[%s6910_s3 + $0x140] sm:$0xff]  ;;  %v857_v9 = vld [vmem:[%s6910_s3 + $0x150] sm:$0xff]  ;;  %v1430_v60 = vld [vmem:[%s6910_s3 + $0x1338] sm:$0xff] }
 0x1a9   : > { %v1628_v31 = vmul.f32 %v988_v32, %v4302_v7  ;;  %v1629_v18 = vmul.f32 %v989_v3, %v4299_v50  ;;  %v2066_v10 = vmul.f32 %v1426_v28, %v6964_v55  ;;  %v2779_v36 = vadd.f32 %v2064_v4, %v2063_v23  ;;  %v1304_v4 = vld [vmem:[%s6910_s3 + $0xf48] sm:$0xff] }
 0x1aa   : > { %v2218_v11 = vadd.f32 %v2217_v46, %v1566_v49  ;;  %v2639_v2 = vadd.f32 %v2638_v14, %v1940_v45  ;;  %v2286_v62 = vadd.f32 %v2285_v29, %v1626_v15  ;;  %v2067_v1 = vmul.f32 %v1427_v47, %v4243_v13  ;;  %v859_v15 = vld [vmem:[%s6910_s3 + $0x160] sm:$0xff]  ;;  %v1246_v14 = vld [vmem:[%s6910_s3 + $0xd78] sm:$0xff] }
 0x1ab   : > { %v2780_v54 = vadd.f32 %v2779_v36, %v2065_v51  ;;  %v1879_v55 = vmul.f32 %v1239_v8, %v6965_v37  ;;  %v1880_v53 = vmul.f32 %v1240_v24, %v6966_v12  ;;  %v1881_v63 = vmul.f32 %v1241_v39, %v6967_v48  ;;  %v1305_v8 = vld [vmem:[%s6910_s3 + $0xf50] sm:$0xff]  ;;  %v5647_v24 = vpop.xlane.xlu0 %2102 }
 0x1ac   : > { %2219 = vadd.xlane.f32.xlu1 %v2218_v11  ;;  %v2640_v13 = vadd.f32 %v2639_v2, %v1941_v57  ;;  %v1630_v43 = vmul.f32 %v990_v20, %v4318_v0  ;;  %v2287_v6 = vadd.f32 %v2286_v62, %v1627_v21  ;;  %v2068_v52 = vmul.f32 %v1428_v27, %v4261_v25  ;;  %v1244_v57 = vld [vmem:[%s6910_s3 + $0xd68] sm:$0xff]  ;;  %v1245_v25 = vld [vmem:[%s6910_s3 + $0xd70] sm:$0xff]  ;;  %v1306_v2 = vld [vmem:[%s6910_s3 + $0xf58] sm:$0xff] }
 0x1ad   : > { %v2069_v49 = vmul.f32 %v1429_v30, %v4258_v16  ;;  %v2781_v45 = vadd.f32 %v2780_v54, %v2066_v10  ;;  %v1882_v38 = vmul.f32 %v1242_v61, %v6968_v41  ;;  %v2572_v34 = vadd.f32 %v1880_v53, %v1879_v55  ;;  %v858_v16 = vld [vmem:[%s6910_s3 + $0x158] sm:$0xff]  ;;  %v1047_v53 = vld [vmem:[%s6910_s3 + $0x740] sm:$0xff] }
 0x1ae   : > { %v2641_v19 = vadd.f32 %v2640_v13, %v1942_v33  ;;  %v2288_v35 = vadd.f32 %v2287_v6, %v1628_v31  ;;  %v1883_v32 = vmul.f32 %v1243_v56, %v4280_v22  ;;  %v1496_v3 = vmul.f32 %v856_v26, %v6966_v12  ;;  %v1303_v33 = vld [vmem:[%s6910_s3 + $0xf40] sm:$0xff]  ;;  %v861_v31 = vld [vmem:[%s6910_s3 + $0x170] sm:$0xff] }
 0x1af   : > { %v2782_v40 = vadd.f32 %v2781_v45, %v2067_v1  ;;  %v2573_v28 = vadd.f32 %v2572_v34, %v1881_v63  ;;  %v1495_v47 = vmul.f32 %v855_v59, %v6965_v37  ;;  %v1497_v23 = vmul.f32 %v857_v9, %v6967_v48  ;;  %v5665_v1 = vpop.xlane.xlu1 %2246  ;;  %v1048_v63 = vld [vmem:[%s6910_s3 + $0x748] sm:$0xff]  ;;  %v1049_v26 = vld [vmem:[%s6910_s3 + $0x750] sm:$0xff]  ;;  %v1307_v59 = vld [vmem:[%s6910_s3 + $0xf60] sm:$0xff] }
 0x1b0   : > { %2642 = vadd.xlane.f32.xlu0 %v2641_v19  ;;  %v2289_v51 = vadd.f32 %v2288_v35, %v1629_v18  ;;  %v2070_v46 = vmul.f32 %v1430_v60, %v4277_v17  ;;  %v1884_v21 = vmul.f32 %v1244_v57, %v4302_v7  ;;  %v1885_v29 = vmul.f32 %v1245_v25, %v4299_v50  ;;  %v860_v17 = vld [vmem:[%s6910_s3 + $0x168] sm:$0xff]  ;;  %v862_v18 = vld [vmem:[%s6910_s3 + $0x178] sm:$0xff]  ;;  %v1309_v57 = vld [vmem:[%s6910_s3 + $0xf70] sm:$0xff] }
 0x1b1   : > { %v2783_v39 = vadd.f32 %v2782_v40, %v2068_v52  ;;  %v2574_v20 = vadd.f32 %v2573_v28, %v1882_v38  ;;  %v1498_v27 = vmul.f32 %v858_v16, %v6968_v41  ;;  %v2140_v10 = vadd.f32 %v1496_v3, %v1495_v47  ;;  %6969 = vst [vmem:[#allocation23_spill] sm:$0xff] %v5665_v1  ;;  %v1308_v45 = vld [vmem:[%s6910_s3 + $0xf68] sm:$0xff]  ;;  %v1050_v38 = vld [vmem:[%s6910_s3 + $0x758] sm:$0xff]  ;;  %v1051_v19 = vld [vmem:[%s6910_s3 + $0x760] sm:$0xff]  ;;  %v5700_v3 = vpop.xlane.xlu0 %2174 }
 0x1b2   : > { %v2290_v36 = vadd.f32 %v2289_v51, %v1630_v43  ;;  %v1499_v11 = vmul.f32 %v859_v15, %v4280_v22  ;;  %v1943_v62 = vmul.f32 %v1303_v33, %v6965_v37  ;;  %v1944_v30 = vmul.f32 %v1304_v4, %v6966_v12  ;;  %v1432_v33 = vld [vmem:[%s6910_s3 + $0x1348] sm:$0xff]  ;;  %v1433_v4 = vld [vmem:[%s6910_s3 + $0x1350] sm:$0xff]  ;;  %v1310_v51 = vld [vmem:[%s6910_s3 + $0xf78] sm:$0xff] }
 0x1b3   : > { %v2784_v61 = vadd.f32 %v2783_v39, %v2069_v49  ;;  %v2575_v54 = vadd.f32 %v2574_v20, %v1883_v32  ;;  %v2141_v56 = vadd.f32 %v2140_v10, %v1497_v23  ;;  %v1945_v55 = vmul.f32 %v1305_v8, %v6967_v48  ;;  %v1431_v23 = vld [vmem:[%s6910_s3 + $0x1340] sm:$0xff]  ;;  %v5721_v39 = vpop.xlane.xlu1 %2462  ;;  %v1434_v10 = vld [vmem:[%s6910_s3 + $0x1358] sm:$0xff] }
 0x1b4   : > { %2291 = vadd.xlane.f32.xlu1 %v2290_v36  ;;  %v1886_v13 = vmul.f32 %v1246_v14, %v4318_v0  ;;  %v1500_v43 = vmul.f32 %v860_v17, %v4302_v7  ;;  %v1501_v6 = vmul.f32 %v861_v31, %v4299_v50  ;;  %v1502_v52 = vmul.f32 %v862_v18, %v4318_v0  ;;  %v1053_v18 = vld [vmem:[%s6910_s3 + $0x770] sm:$0xff] }
 0x1b5   : > { %v2785_v9 = vadd.f32 %v2784_v61, %v2070_v46  ;;  %v2576_v60 = vadd.f32 %v2575_v54, %v1884_v21  ;;  %v2142_v49 = vadd.f32 %v2141_v56, %v1498_v27  ;;  %v2644_v25 = vadd.f32 %v1944_v30, %v1943_v62  ;;  %v1052_v21 = vld [vmem:[%s6910_s3 + $0x768] sm:$0xff] }
 0x1b6   : > { %v1946_v34 = vmul.f32 %v1306_v2, %v6968_v41  ;;  %v1687_v35 = vmul.f32 %v1047_v53, %v6965_v37  ;;  %v1688_v32 = vmul.f32 %v1048_v63, %v6966_v12  ;;  %v1689_v16 = vmul.f32 %v1049_v26, %v6967_v48  ;;  %v1112_v61 = vld [vmem:[%s6910_s3 + $0x948] sm:$0xff]  ;;  %v1111_v63 = vld [vmem:[%s6910_s3 + $0x940] sm:$0xff]  ;;  %v1113_v26 = vld [vmem:[%s6910_s3 + $0x950] sm:$0xff] }
 0x1b7   : > { %2786 = vadd.xlane.f32.xlu0 %v2785_v9  ;;  %v2577_v40 = vadd.f32 %v2576_v60, %v1885_v29  ;;  %v2143_v28 = vadd.f32 %v2142_v49, %v1499_v11  ;;  %v1947_v15 = vmul.f32 %v1307_v59, %v4280_v22  ;;  %v2645_v47 = vadd.f32 %v2644_v25, %v1945_v55  ;;  %v1435_v11 = vld [vmem:[%s6910_s3 + $0x1360] sm:$0xff]  ;;  %v1436_v9 = vld [vmem:[%s6910_s3 + $0x1368] sm:$0xff] }
 0x1b8   : > { %v1948_v46 = vmul.f32 %v1308_v45, %v4302_v7  ;;  %v1949_v14 = vmul.f32 %v1309_v57, %v4299_v50  ;;  %v1690_v29 = vmul.f32 %v1050_v38, %v6968_v41  ;;  %v2356_v8 = vadd.f32 %v1688_v32, %v1687_v35  ;;  %v5755_v45 = vpop.xlane.xlu0 %2318  ;;  %v1437_v38 = vld [vmem:[%s6910_s3 + $0x1370] sm:$0xff] }
 0x1b9   : > { %v2578_v20 = vadd.f32 %v2577_v40, %v1886_v13  ;;  %v2144_v17 = vadd.f32 %v2143_v28, %v1500_v43  ;;  %v2646_v31 = vadd.f32 %v2645_v47, %v1946_v34  ;;  %v1691_v27 = vmul.f32 %v1051_v19, %v4280_v22  ;;  %v806_v13 = vpop.f32.mrf.mxu1  ;;  %v1054_v43 = vld [vmem:[%s6910_s3 + $0x778] sm:$0xff]  ;;  %6970 = vst [vmem:[#allocation2_spill] sm:$0xff] %v5755_v45  ;;  %v1115_v40 = vld [vmem:[%s6910_s3 + $0x960] sm:$0xff]  ;;  %v5773_v47 = vpop.xlane.xlu1 %2534 }
 0x1ba   : > { %v2357_v36 = vadd.f32 %v2356_v8, %v1689_v16  ;;  %v2071_v2 = vmul.f32 %v1431_v23, %v6965_v37  ;;  %v2072_v62 = vmul.f32 %v1432_v33, %v6966_v12  ;;  %v2073_v30 = vmul.f32 %v1433_v4, %v6967_v48  ;;  %v1114_v16 = vld [vmem:[%s6910_s3 + $0x958] sm:$0xff] }
 0x1bb   : > { %2579 = vadd.xlane.f32.xlu1 %v2578_v20  ;;  %v2145_v54 = vadd.f32 %v2144_v17, %v1501_v6  ;;  %v1950_v56 = vmul.f32 %v1310_v51, %v4318_v0  ;;  %v2647_v55 = vadd.f32 %v2646_v31, %v1947_v15  ;;  %v1692_v53 = vmul.f32 %v1052_v21, %v4302_v7  ;;  %v864_v15 = vld [vmem:[%s6910_s3 + $0x188] sm:$0xff]  ;;  %v865_v21 = vld [vmem:[%s6910_s3 + $0x190] sm:$0xff] }
 0x1bc   : > { %v1693_v6 = vmul.f32 %v1053_v18, %v4299_v50  ;;  %v2358_v59 = vadd.f32 %v2357_v36, %v1690_v29  ;;  %v2074_v60 = vmul.f32 %v1434_v10, %v6968_v41  ;;  %v2788_v49 = vadd.f32 %v2072_v62, %v2071_v2  ;;  %v1116_v20 = vld [vmem:[%s6910_s3 + $0x968] sm:$0xff]  ;;  %v1117_v17 = vld [vmem:[%s6910_s3 + $0x970] sm:$0xff]  ;;  %v1175_v2 = vld [vmem:[%s6910_s3 + $0xb40] sm:$0xff] }
 0x1bd   : > { %v2146_v57 = vadd.f32 %v2145_v54, %v1502_v52  ;;  %v2648_v25 = vadd.f32 %v2647_v55, %v1948_v46  ;;  %v2075_v34 = vmul.f32 %v1435_v11, %v4280_v22  ;;  %v1752_v19 = vmul.f32 %v1112_v61, %v6966_v12  ;;  %v863_v46 = vld [vmem:[%s6910_s3 + $0x180] sm:$0xff]  ;;  %v6971_v36 = vld [vmem:[#allocation19_spill] sm:$0xff]  ;;  %v866_v54 = vld [vmem:[%s6910_s3 + $0x198] sm:$0xff] }
 0x1be   : > { %v2359_v35 = vadd.f32 %v2358_v59, %v1691_v27  ;;  %v2789_v32 = vadd.f32 %v2788_v49, %v2073_v30  ;;  %v1751_v52 = vmul.f32 %v1111_v63, %v6965_v37  ;;  %v1753_v28 = vmul.f32 %v1113_v26, %v6967_v48  ;;  %v6972_v55 = vld [vmem:[#allocation15_spill] sm:$0xff]  ;;  %v1177_v63 = vld [vmem:[%s6910_s3 + $0xb50] sm:$0xff]  ;;  %v5812_v26 = vpop.xlane.xlu0 %2390  ;;  %v867_v59 = vld [vmem:[%s6910_s3 + $0x1a0] sm:$0xff] }
 0x1bf   : > { %v5776_v23 = vadd.f32 %v806_v13, %v3948_v5  ;;  %2147 = vadd.xlane.f32.xlu0 %v2146_v57  ;;  %v2649_v33 = vadd.f32 %v2648_v25, %v1949_v14  ;;  %v1694_v4 = vmul.f32 %v1054_v43, %v4318_v0  ;;  %v2076_v51 = vmul.f32 %v1436_v9, %v4302_v7  ;;  %v1438_v5 = vld [vmem:[%s6910_s3 + $0x1378] sm:$0xff]  ;;  %v6973_v9 = vld [vmem:[#allocation16_spill] sm:$0xff] }
 0x1c0   : > { %v2360_v29 = vadd.f32 %v2359_v35, %v1692_v53  ;;  %v2077_v8 = vmul.f32 %v1437_v38, %v4299_v50  ;;  %v2790_v14 = vadd.f32 %v2789_v32, %v2074_v60  ;;  %v2428_v31 = vadd.f32 %v1752_v19, %v1751_v52  ;;  %v1118_v25 = vld [vmem:[%s6910_s3 + $0x978] sm:$0xff]  ;;  %v869_v19 = vld [vmem:[%s6910_s3 + $0x1b0] sm:$0xff]  ;;  %v5830_v32 = vpop.xlane.xlu1 %2111 }
 0x1c1   : > { %v2650_v18 = vadd.f32 %v2649_v33, %v1950_v56  ;;  %v1754_v27 = vmul.f32 %v1114_v16, %v6968_v41  ;;  %v1755_v10 = vmul.f32 %v1115_v40, %v4280_v22  ;;  %v1504_v11 = vmul.f32 %v864_v15, %v6971_v36  ;;  %v1176_v56 = vld [vmem:[%s6910_s3 + $0xb48] sm:$0xff]  ;;  %v6974_v16 = vld [vmem:[#allocation20_spill] sm:$0xff]  ;;  %v1178_v52 = vld [vmem:[%s6910_s3 + $0xb58] sm:$0xff] }
 0x1c2   : > { %v2361_v62 = vadd.f32 %v2360_v29, %v1693_v6  ;;  %v2791_v30 = vadd.f32 %v2790_v14, %v2075_v34  ;;  %v2429_v61 = vadd.f32 %v2428_v31, %v1753_v28  ;;  %v1503_v53 = vmul.f32 %v863_v46, %v6972_v55  ;;  %v868_v34 = vld [vmem:[%s6910_s3 + $0x1a8] sm:$0xff]  ;;  %v1179_v29 = vld [vmem:[%s6910_s3 + $0xb60] sm:$0xff] }
 0x1c3   : > { %2651 = vadd.xlane.f32.xlu1 %v2650_v18  ;;  %v2078_v13 = vmul.f32 %v1438_v5, %v4318_v0  ;;  %v1756_v43 = vmul.f32 %v1116_v20, %v4302_v7  ;;  %v1757_v6 = vmul.f32 %v1117_v17, %v4299_v50  ;;  %v1505_v60 = vmul.f32 %v865_v21, %v6973_v9  ;;  %v991_v5 = vld [vmem:[%s6910_s3 + $0x580] sm:$0xff]  ;;  %v992_v14 = vld [vmem:[%s6910_s3 + $0x588] sm:$0xff]  ;;  %v1181_v18 = vld [vmem:[%s6910_s3 + $0xb70] sm:$0xff] }
 0x1c4   : > { %v2362_v49 = vadd.f32 %v2361_v62, %v1694_v4  ;;  %v2792_v57 = vadd.f32 %v2791_v30, %v2076_v51  ;;  %v2430_v38 = vadd.f32 %v2429_v61, %v1754_v27  ;;  %v2149_v35 = vadd.f32 %v1504_v11, %v1503_v53  ;;  %v1180_v31 = vld [vmem:[%s6910_s3 + $0xb68] sm:$0xff]  ;;  %v993_v30 = vld [vmem:[%s6910_s3 + $0x590] sm:$0xff]  ;;  %v994_v61 = vld [vmem:[%s6910_s3 + $0x598] sm:$0xff] }
 0x1c5   : > { %v1506_v40 = vmul.f32 %v866_v54, %v6974_v16  ;;  %v1815_v28 = vmul.f32 %v1175_v2, %v6965_v37  ;;  %v1816_v15 = vmul.f32 %v1176_v56, %v6966_v12  ;;  %v1817_v33 = vmul.f32 %v1177_v63, %v6967_v48  ;;  %v5865_v54 = vpop.xlane.xlu0 %2606  ;;  %v995_v63 = vld [vmem:[%s6910_s3 + $0x5a0] sm:$0xff] }
 0x1c6   : > { %2363 = vadd.xlane.f32.xlu0 %v2362_v49  ;;  %v2793_v4 = vadd.f32 %v2792_v57, %v2077_v8  ;;  %v2431_v51 = vadd.f32 %v2430_v38, %v1755_v10  ;;  %v1507_v46 = vmul.f32 %v867_v59, %v4334_v42  ;;  %v2150_v21 = vadd.f32 %v2149_v35, %v1505_v60  ;;  %v1368_v59 = vld [vmem:[%s6910_s3 + $0x1148] sm:$0xff]  ;;  %v1367_v38 = vld [vmem:[%s6910_s3 + $0x1140] sm:$0xff]  ;;  %v870_v35 = vld [vmem:[%s6910_s3 + $0x1b8] sm:$0xff] }
 0x1c7   : > { %v1758_v20 = vmul.f32 %v1118_v25, %v4318_v0  ;;  %v1508_v8 = vmul.f32 %v868_v34, %v4355_v44  ;;  %v1509_v17 = vmul.f32 %v869_v19, %v4337_v58  ;;  %v2500_v27 = vadd.f32 %v1816_v15, %v1815_v28  ;;  %v1369_v34 = vld [vmem:[%s6910_s3 + $0x1150] sm:$0xff]  ;;  %v5884_v19 = vpop.xlane.xlu1 %2183 }
 0x1c8   : > { %v2794_v10 = vadd.f32 %v2793_v4, %v2078_v13  ;;  %v2432_v11 = vadd.f32 %v2431_v51, %v1756_v43  ;;  %v2151_v2 = vadd.f32 %v2150_v21, %v1506_v40  ;;  %v1818_v62 = vmul.f32 %v1178_v52, %v6968_v41  ;;  %v996_v51 = vld [vmem:[%s6910_s3 + $0x5a8] sm:$0xff] }
 0x1c9   : > { %v1819_v53 = vmul.f32 %v1179_v29, %v4280_v22  ;;  %v2501_v56 = vadd.f32 %v2500_v27, %v1817_v33  ;;  %v1631_v13 = vmul.f32 %v991_v5, %v6972_v55  ;;  %v1632_v43 = vmul.f32 %v992_v14, %v6971_v36  ;;  %v1370_v14 = vld [vmem:[%s6910_s3 + $0x1158] sm:$0xff]  ;;  %v6975_v27 = vld [vmem:[#allocation14_spill] sm:$0xff] }
 0x1ca   : > { %2795 = vadd.xlane.f32.xlu1 %v2794_v10  ;;  %v2433_v60 = vadd.f32 %v2432_v11, %v1757_v6  ;;  %v2152_v49 = vadd.f32 %v2151_v2, %v1507_v46  ;;  %v1820_v57 = vmul.f32 %v1180_v31, %v4302_v7  ;;  %v1821_v25 = vmul.f32 %v1181_v18, %v4299_v50  ;;  %v1182_v6 = vld [vmem:[%s6910_s3 + $0xb78] sm:$0xff]  ;;  %v1371_v31 = vld [vmem:[%s6910_s3 + $0x1160] sm:$0xff]  ;;  %v1056_v18 = vld [vmem:[%s6910_s3 + $0x788] sm:$0xff] }
 0x1cb   : > { %v2502_v40 = vadd.f32 %v2501_v56, %v1818_v62  ;;  %v1633_v52 = vmul.f32 %v993_v30, %v6973_v9  ;;  %v1634_v28 = vmul.f32 %v994_v61, %v6974_v16  ;;  %v2293_v15 = vadd.f32 %v1632_v43, %v1631_v13  ;;  %v5922_v30 = vpop.xlane.xlu0 %2678  ;;  %v1372_v13 = vld [vmem:[%s6910_s3 + $0x1168] sm:$0xff] }
 0x1cc   : > { %v2434_v33 = vadd.f32 %v2433_v60, %v1758_v20  ;;  %v2153_v4 = vadd.f32 %v2152_v49, %v1508_v8  ;;  %v1635_v46 = vmul.f32 %v995_v63, %v4334_v42  ;;  %v2008_v21 = vmul.f32 %v1368_v59, %v6966_v12  ;;  %v6976_v12 = vld [vmem:[#allocation17_spill] sm:$0xff] }
 0x1cd   : > { %v2503_v29 = vadd.f32 %v2502_v40, %v1819_v53  ;;  %v2294_v5 = vadd.f32 %v2293_v15, %v1633_v52  ;;  %v2007_v20 = vmul.f32 %v1367_v38, %v6965_v37  ;;  %v2009_v8 = vmul.f32 %v1369_v34, %v6967_v48  ;;  %v1055_v37 = vld [vmem:[%s6910_s3 + $0x780] sm:$0xff]  ;;  %v1057_v48 = vld [vmem:[%s6910_s3 + $0x790] sm:$0xff]  ;;  %v5940_v34 = vpop.xlane.xlu1 %2327 }
 0x1ce   : > { %v5912_v10 = vadd.f32 %v6976_v12, %v6975_v27  ;;  %2435 = vadd.xlane.f32.xlu0 %v2434_v33  ;;  %v1510_v11 = vmul.f32 %v870_v35, %v5776_v23  ;;  %v2154_v2 = vadd.f32 %v2153_v4, %v1509_v17  ;;  %v1822_v62 = vmul.f32 %v1182_v6, %v4318_v0  ;;  %v997_v53 = vld [vmem:[%s6910_s3 + $0x5b0] sm:$0xff]  ;;  %v998_v17 = vld [vmem:[%s6910_s3 + $0x5b8] sm:$0xff]  ;;  %v927_v38 = vld [vmem:[%s6910_s3 + $0x380] sm:$0xff] }
 0x1cf   : > { %v2504_v61 = vadd.f32 %v2503_v29, %v1820_v57  ;;  %v1636_v56 = vmul.f32 %v996_v51, %v4355_v44  ;;  %v2295_v63 = vadd.f32 %v2294_v5, %v1634_v28  ;;  %v2716_v43 = vadd.f32 %v2008_v21, %v2007_v20  ;;  %6977 = vst [vmem:[#allocation4_spill] sm:$0xff] %v5940_v34  ;;  %v1373_v40 = vld [vmem:[%s6910_s3 + $0x1170] sm:$0xff]  ;;  %v928_v28 = vld [vmem:[%s6910_s3 + $0x388] sm:$0xff]  ;;  %v1059_v4 = vld [vmem:[%s6910_s3 + $0x7a0] sm:$0xff] }
 0x1d0   : > { %v2155_v59 = vadd.f32 %v2154_v2, %v1510_v11  ;;  %v2010_v60 = vmul.f32 %v1370_v14, %v6968_v41  ;;  %v2011_v49 = vmul.f32 %v1371_v31, %v4280_v22  ;;  %v1696_v57 = vmul.f32 %v1056_v18, %v6971_v36  ;;  %v1058_v41 = vld [vmem:[%s6910_s3 + $0x798] sm:$0xff]  ;;  %v1060_v14 = vld [vmem:[%s6910_s3 + $0x7a8] sm:$0xff]  ;;  %v5975_v2 = vpop.xlane.xlu0 %2750  ;;  %v1197_v34 = vld [vmem:[%s6910_s3 + $0xbf0] sm:$0xff] }
 0x1d1   : > { %v2505_v35 = vadd.f32 %v2504_v61, %v1821_v25  ;;  %v2296_v6 = vadd.f32 %v2295_v63, %v1635_v46  ;;  %v2717_v52 = vadd.f32 %v2716_v43, %v2009_v8  ;;  %v1695_v22 = vmul.f32 %v1055_v37, %v6972_v55  ;;  %v1374_v29 = vld [vmem:[%s6910_s3 + $0x1178] sm:$0xff]  ;;  %v1061_v63 = vld [vmem:[%s6910_s3 + $0x7b0] sm:$0xff] }
 0x1d2   : > { %2156 = vadd.xlane.f32.xlu1 %v2155_v59  ;;  %v1637_v15 = vmul.f32 %v997_v53, %v4337_v58  ;;  %v1638_v25 = vmul.f32 %v998_v17, %v5776_v23  ;;  %v2012_v33 = vmul.f32 %v1372_v13, %v4302_v7  ;;  %v1697_v51 = vmul.f32 %v1057_v48, %v6973_v9  ;;  %v929_v7 = vld [vmem:[%s6910_s3 + $0x390] sm:$0xff]  ;;  %v930_v18 = vld [vmem:[%s6910_s3 + $0x398] sm:$0xff]  ;;  %v1119_v53 = vld [vmem:[%s6910_s3 + $0x980] sm:$0xff] }
 0x1d3   : > { %v2506_v46 = vadd.f32 %v2505_v35, %v1822_v62  ;;  %v2297_v21 = vadd.f32 %v2296_v6, %v1636_v56  ;;  %v2718_v5 = vadd.f32 %v2717_v52, %v2010_v60  ;;  %v2365_v31 = vadd.f32 %v1696_v57, %v1695_v22  ;;  %v1120_v17 = vld [vmem:[%s6910_s3 + $0x988] sm:$0xff]  ;;  %v1062_v13 = vld [vmem:[%s6910_s3 + $0x7b8] sm:$0xff] }
 0x1d4   : > { %v2013_v20 = vmul.f32 %v1373_v40, %v4299_v50  ;;  %v1698_v8 = vmul.f32 %v1058_v41, %v6974_v16  ;;  %v1567_v12 = vmul.f32 %v927_v38, %v6972_v55  ;;  %v1568_v11 = vmul.f32 %v928_v28, %v6971_v36  ;;  %v931_v50 = vld [vmem:[%s6910_s3 + $0x3a0] sm:$0xff]  ;;  %v1121_v40 = vld [vmem:[%s6910_s3 + $0x990] sm:$0xff]  ;;  %v1122_v22 = vld [vmem:[%s6910_s3 + $0x998] sm:$0xff] }
 0x1d5   : > { %2507 = vadd.xlane.f32.xlu0 %v2506_v46  ;;  %v2298_v62 = vadd.f32 %v2297_v21, %v1637_v15  ;;  %v2719_v37 = vadd.f32 %v2718_v5, %v2011_v49  ;;  %v1699_v48 = vmul.f32 %v1059_v4, %v4334_v42  ;;  %v2366_v61 = vadd.f32 %v2365_v31, %v1697_v51  ;;  %v5996_v49 = vpop.xlane.xlu1 %2399  ;;  %v1123_v21 = vld [vmem:[%s6910_s3 + $0x9a0] sm:$0xff]  ;;  %v933_v5 = vld [vmem:[%s6910_s3 + $0x3b0] sm:$0xff] }
 0x1d6   : > { %v2014_v56 = vmul.f32 %v1374_v29, %v4318_v0  ;;  %v1700_v43 = vmul.f32 %v1060_v14, %v4355_v44  ;;  %v1569_v59 = vmul.f32 %v929_v7, %v6973_v9  ;;  %v2221_v60 = vadd.f32 %v1568_v11, %v1567_v12  ;;  %v932_v0 = vld [vmem:[%s6910_s3 + $0x3a8] sm:$0xff]  ;;  %v1183_v29 = vld [vmem:[%s6910_s3 + $0xb80] sm:$0xff]  ;;  %v934_v14 = vld [vmem:[%s6910_s3 + $0x3b8] sm:$0xff]  ;;  %v6033_v12 = vpop.xlane.xlu0 %2255 }
 0x1d7   : > { %v2299_v57 = vadd.f32 %v2298_v62, %v1638_v25  ;;  %v2720_v38 = vadd.f32 %v2719_v37, %v2012_v33  ;;  %v2367_v35 = vadd.f32 %v2366_v61, %v1698_v8  ;;  %v1570_v6 = vmul.f32 %v930_v18, %v6974_v16  ;;  %v1184_v25 = vld [vmem:[%s6910_s3 + $0xb88] sm:$0xff] }
 0x1d8   : > { %v1571_v52 = vmul.f32 %v931_v50, %v4334_v42  ;;  %v2222_v41 = vadd.f32 %v2221_v60, %v1569_v59  ;;  %v1759_v28 = vmul.f32 %v1119_v53, %v6972_v55  ;;  %v1760_v15 = vmul.f32 %v1120_v17, %v6971_v36 }
 0x1d9   : > { %2300 = vadd.xlane.f32.xlu1 %v2299_v57  ;;  %v2721_v33 = vadd.f32 %v2720_v38, %v2013_v20  ;;  %v1701_v4 = vmul.f32 %v1061_v63, %v4337_v58  ;;  %v1702_v51 = vmul.f32 %v1062_v13, %v5776_v23  ;;  %v2368_v46 = vadd.f32 %v2367_v35, %v1699_v48  ;;  %v1124_v20 = vld [vmem:[%s6910_s3 + $0x9a8] sm:$0xff]  ;;  %v1185_v48 = vld [vmem:[%s6910_s3 + $0xb90] sm:$0xff]  ;;  %v1186_v63 = vld [vmem:[%s6910_s3 + $0xb98] sm:$0xff]  ;;  %v6051_v59 = vpop.xlane.xlu1 %2615 }
 0x1da   : > { %v1572_v31 = vmul.f32 %v932_v0, %v4355_v44  ;;  %v2223_v7 = vadd.f32 %v2222_v41, %v1570_v6  ;;  %v1761_v8 = vmul.f32 %v1121_v40, %v6973_v9  ;;  %v2437_v18 = vadd.f32 %v1760_v15, %v1759_v28  ;;  %v1311_v0 = vld [vmem:[%s6910_s3 + $0xf80] sm:$0xff]  ;;  %v1125_v40 = vld [vmem:[%s6910_s3 + $0x9b0] sm:$0xff]  ;;  %v1188_v41 = vld [vmem:[%s6910_s3 + $0xba8] sm:$0xff] }
 0x1db   : > { %v2722_v11 = vadd.f32 %v2721_v33, %v2014_v56  ;;  %v2369_v62 = vadd.f32 %v2368_v46, %v1700_v43  ;;  %v1762_v37 = vmul.f32 %v1122_v22, %v6974_v16  ;;  %v1824_v61 = vmul.f32 %v1184_v25, %v6971_v36  ;;  %v1187_v56 = vld [vmem:[%s6910_s3 + $0xba0] sm:$0xff]  ;;  %v1312_v43 = vld [vmem:[%s6910_s3 + $0xf88] sm:$0xff]  ;;  %v1313_v15 = vld [vmem:[%s6910_s3 + $0xf90] sm:$0xff] }
 0x1dc   : > { %v2224_v50 = vadd.f32 %v2223_v7, %v1571_v52  ;;  %v1763_v53 = vmul.f32 %v1123_v21, %v4334_v42  ;;  %v2438_v17 = vadd.f32 %v2437_v18, %v1761_v8  ;;  %v1823_v13 = vmul.f32 %v1183_v29, %v6972_v55  ;;  %v1314_v46 = vld [vmem:[%s6910_s3 + $0xf98] sm:$0xff]  ;;  %v6085_v8 = vpop.xlane.xlu0 %2471  ;;  %v6978_v18 = vld [vmem:[#allocation18_spill] sm:$0xff] }
 0x1dd   : > { %2723 = vadd.xlane.f32.xlu0 %v2722_v11  ;;  %v2370_v60 = vadd.f32 %v2369_v62, %v1701_v4  ;;  %v1573_v57 = vmul.f32 %v933_v5, %v4337_v58  ;;  %v1574_v38 = vmul.f32 %v934_v14, %v5776_v23  ;;  %v1764_v35 = vmul.f32 %v1124_v20, %v4355_v44  ;;  %v1126_v5 = vld [vmem:[%s6910_s3 + $0x9b8] sm:$0xff]  ;;  %v1248_v20 = vld [vmem:[%s6910_s3 + $0xd88] sm:$0xff] }
 0x1de   : > { %v2225_v6 = vadd.f32 %v2224_v50, %v1572_v31  ;;  %v2439_v52 = vadd.f32 %v2438_v17, %v1762_v37  ;;  %v1825_v22 = vmul.f32 %v1185_v48, %v6973_v9  ;;  %v2509_v28 = vadd.f32 %v1824_v61, %v1823_v13  ;;  %v1315_v48 = vld [vmem:[%s6910_s3 + $0xfa0] sm:$0xff]  ;;  %v1189_v17 = vld [vmem:[%s6910_s3 + $0xbb0] sm:$0xff] }
 0x1df   : > { %v2371_v25 = vadd.f32 %v2370_v60, %v1702_v51  ;;  %v1826_v33 = vmul.f32 %v1186_v63, %v6974_v16  ;;  %v1827_v4 = vmul.f32 %v1187_v56, %v4334_v42  ;;  %v1952_v21 = vmul.f32 %v1312_v43, %v6971_v36  ;;  %v1247_v51 = vld [vmem:[%s6910_s3 + $0xd80] sm:$0xff]  ;;  %v1316_v56 = vld [vmem:[%s6910_s3 + $0xfa8] sm:$0xff]  ;;  %v1249_v43 = vld [vmem:[%s6910_s3 + $0xd90] sm:$0xff]  ;;  %v6106_v60 = vpop.xlane.xlu1 %2687 }
 0x1e0   : > { %v2226_v29 = vadd.f32 %v2225_v6, %v1573_v57  ;;  %v2440_v14 = vadd.f32 %v2439_v52, %v1763_v53  ;;  %v2510_v31 = vadd.f32 %v2509_v28, %v1825_v22  ;;  %v1951_v7 = vmul.f32 %v1311_v0, %v6972_v55  ;;  %v1251_v28 = vld [vmem:[%s6910_s3 + $0xda0] sm:$0xff] }
 0x1e1   : > { %v6089_v11 = vadd.f32 %v6978_v18, %v6975_v27  ;;  %2372 = vadd.xlane.f32.xlu1 %v2371_v25  ;;  %v1765_v62 = vmul.f32 %v1125_v40, %v4337_v58  ;;  %v1828_v37 = vmul.f32 %v1188_v41, %v4355_v44  ;;  %v1953_v61 = vmul.f32 %v1313_v15, %v6973_v9  ;;  %v1439_v15 = vld [vmem:[%s6910_s3 + $0x1380] sm:$0xff]  ;;  %v1440_v25 = vld [vmem:[%s6910_s3 + $0x1388] sm:$0xff]  ;;  %v1441_v18 = vld [vmem:[%s6910_s3 + $0x1390] sm:$0xff] }
 0x1e2   : > { %v2227_v50 = vadd.f32 %v2226_v29, %v1574_v38  ;;  %v2441_v53 = vadd.f32 %v2440_v14, %v1764_v35  ;;  %v2511_v63 = vadd.f32 %v2510_v31, %v1826_v33  ;;  %v2653_v13 = vadd.f32 %v1952_v21, %v1951_v7  ;;  %v1250_v35 = vld [vmem:[%s6910_s3 + $0xd98] sm:$0xff] }
 0x1e3   : > { %v1766_v57 = vmul.f32 %v1126_v5, %v5776_v23  ;;  %v1954_v38 = vmul.f32 %v1314_v46, %v6974_v16  ;;  %v1887_v0 = vmul.f32 %v1247_v51, %v6972_v55  ;;  %v1888_v6 = vmul.f32 %v1248_v20, %v6971_v36  ;;  %v1190_v33 = vld [vmem:[%s6910_s3 + $0xbb8] sm:$0xff]  ;;  %v1317_v46 = vld [vmem:[%s6910_s3 + $0xfb0] sm:$0xff]  ;;  %v1252_v51 = vld [vmem:[%s6910_s3 + $0xda8] sm:$0xff] }
 0x1e4   : > { %2228 = vadd.xlane.f32.xlu0 %v2227_v50  ;;  %v2442_v40 = vadd.f32 %v2441_v53, %v1765_v62  ;;  %v2512_v52 = vadd.f32 %v2511_v63, %v1827_v4  ;;  %v1955_v41 = vmul.f32 %v1315_v48, %v4334_v42  ;;  %v2654_v22 = vadd.f32 %v2653_v13, %v1953_v61  ;;  %v6141_v62 = vpop.xlane.xlu0 %2543 }
 0x1e5   : > { %v1829_v4 = vmul.f32 %v1189_v17, %v4337_v58  ;;  %v1956_v21 = vmul.f32 %v1316_v56, %v4355_v44  ;;  %v1889_v29 = vmul.f32 %v1249_v43, %v6973_v9  ;;  %v2581_v5 = vadd.f32 %v1888_v6, %v1887_v0  ;;  %v1376_v17 = vld [vmem:[%s6910_s3 + $0x1188] sm:$0xff]  ;;  %v1318_v0 = vld [vmem:[%s6910_s3 + $0xfb8] sm:$0xff]  ;;  %v1253_v6 = vld [vmem:[%s6910_s3 + $0xdb0] sm:$0xff] }
 0x1e6   : > { %v2443_v14 = vadd.f32 %v2442_v40, %v1766_v57  ;;  %v2513_v31 = vadd.f32 %v2512_v52, %v1828_v37  ;;  %v2655_v7 = vadd.f32 %v2654_v22, %v1954_v38  ;;  %v1890_v20 = vmul.f32 %v1250_v35, %v6974_v16  ;;  %v1442_v37 = vld [vmem:[%s6910_s3 + $0x1398] sm:$0xff]  ;;  %v1443_v57 = vld [vmem:[%s6910_s3 + $0x13a0] sm:$0xff]  ;;  %v6160_v35 = vpop.xlane.xlu1 %2759 }
 0x1e7   : > { %v1891_v48 = vmul.f32 %v1251_v28, %v4334_v42  ;;  %v2582_v61 = vadd.f32 %v2581_v5, %v1889_v29  ;;  %v2079_v50 = vmul.f32 %v1439_v15, %v6972_v55  ;;  %v2080_v53 = vmul.f32 %v1440_v25, %v6971_v36  ;;  %v1375_v38 = vld [vmem:[%s6910_s3 + $0x1180] sm:$0xff]  ;;  %v697_v29 = vpop.f32.mrf.mxu0  ;;  %v1254_v5 = vld [vmem:[%s6910_s3 + $0xdb8] sm:$0xff] }
 0x1e8   : > { %2444 = vadd.xlane.f32.xlu1 %v2443_v14  ;;  %v1830_v63 = vmul.f32 %v1190_v33, %v5776_v23  ;;  %v2514_v56 = vadd.f32 %v2513_v31, %v1829_v4  ;;  %v1957_v13 = vmul.f32 %v1317_v46, %v4337_v58  ;;  %v2656_v43 = vadd.f32 %v2655_v7, %v1955_v41  ;;  %v1444_v41 = vld [vmem:[%s6910_s3 + $0x13a8] sm:$0xff]  ;;  %v1377_v4 = vld [vmem:[%s6910_s3 + $0x1190] sm:$0xff] }
 0x1e9   : > { %v1892_v40 = vmul.f32 %v1252_v51, %v4355_v44  ;;  %v2583_v52 = vadd.f32 %v2582_v61, %v1890_v20  ;;  %v2081_v22 = vmul.f32 %v1441_v18, %v6973_v9  ;;  %v2797_v28 = vadd.f32 %v2080_v53, %v2079_v50  ;;  %v872_v20 = vld [vmem:[%s6910_s3 + $0x1c8] sm:$0xff]  ;;  %v6195_v50 = vpop.xlane.xlu0 %2120 }
 0x1ea   : > { %v2515_v15 = vadd.f32 %v2514_v56, %v1830_v63  ;;  %v2657_v25 = vadd.f32 %v2656_v43, %v1956_v21  ;;  %v2082_v33 = vmul.f32 %v1442_v37, %v6974_v16  ;;  %v2016_v46 = vmul.f32 %v1376_v17, %v6971_v36  ;;  %v1378_v21 = vld [vmem:[%s6910_s3 + $0x1198] sm:$0xff]  ;;  %v1379_v37 = vld [vmem:[%s6910_s3 + $0x11a0] sm:$0xff]  ;;  %v873_v43 = vld [vmem:[%s6910_s3 + $0x1d0] sm:$0xff] }
 0x1eb   : > { %v2584_v14 = vadd.f32 %v2583_v52, %v1891_v48  ;;  %v2083_v31 = vmul.f32 %v1443_v57, %v4334_v42  ;;  %v2798_v7 = vadd.f32 %v2797_v28, %v2081_v22  ;;  %v2015_v51 = vmul.f32 %v1375_v38, %v6972_v55  ;;  %v1445_v55 = vld [vmem:[%s6910_s3 + $0x13b0] sm:$0xff]  ;;  %v699_v52 = vpop.f32.mrf.mxu0 }
 0x1ec   : > { %2516 = vadd.xlane.f32.xlu0 %v2515_v15  ;;  %v1958_v36 = vmul.f32 %v1318_v0, %v5776_v23  ;;  %v2658_v18 = vadd.f32 %v2657_v25, %v1957_v13  ;;  %v1893_v61 = vmul.f32 %v1253_v6, %v4337_v58  ;;  %v2084_v48 = vmul.f32 %v1444_v41, %v4355_v44  ;;  %v871_v13 = vld [vmem:[%s6910_s3 + $0x1c0] sm:$0xff]  ;;  %v1380_v0 = vld [vmem:[%s6910_s3 + $0x11a8] sm:$0xff]  ;;  %v810_v41 = vpop.f32.mrf.mxu1 }
 0x1ed   : > { %v2585_v53 = vadd.f32 %v2584_v14, %v1892_v40  ;;  %v2799_v17 = vadd.f32 %v2798_v7, %v2082_v33  ;;  %v2017_v63 = vmul.f32 %v1377_v4, %v6973_v9  ;;  %v2725_v56 = vadd.f32 %v2016_v46, %v2015_v51  ;;  %v6213_v40 = vpop.xlane.xlu1 %2264  ;;  %v1446_v4 = vld [vmem:[%s6910_s3 + $0x13b8] sm:$0xff]  ;;  %v6981_v14 = vld [vmem:[#allocation22_spill] sm:$0xff] }
 0x1ee   : > { %v2659_v57 = vadd.f32 %v2658_v18, %v1958_v36  ;;  %v1894_v38 = vmul.f32 %v1254_v5, %v5776_v23  ;;  %v2018_v6 = vmul.f32 %v1378_v21, %v6974_v16  ;;  %v1512_v9 = vmul.f32 %v872_v20, %v5912_v10  ;;  %6979 = vst [vmem:[#allocation3_spill] sm:$0xff] %v6213_v40  ;;  %v6980_v46 = vld [vmem:[#allocation21_spill] sm:$0xff]  ;;  %v875_v18 = vld [vmem:[%s6910_s3 + $0x1e0] sm:$0xff] }
 0x1ef   : > { %v2586_v22 = vadd.f32 %v2585_v53, %v1893_v61  ;;  %v2800_v28 = vadd.f32 %v2799_v17, %v2083_v31  ;;  %v2019_v15 = vmul.f32 %v1379_v37, %v4334_v42  ;;  %v2726_v25 = vadd.f32 %v2725_v56, %v2017_v63  ;;  %v936_v31 = vld [vmem:[%s6910_s3 + $0x3c8] sm:$0xff]  ;;  %v874_v36 = vld [vmem:[%s6910_s3 + $0x1d8] sm:$0xff]  ;;  %v937_v53 = vld [vmem:[%s6910_s3 + $0x3d0] sm:$0xff]  ;;  %v812_v17 = vpop.f32.mrf.mxu1 }
 0x1f0   : > { %v6217_v33 = vadd.f32 %v697_v29, %v6975_v27  ;;  %2660 = vadd.xlane.f32.xlu1 %v2659_v57  ;;  %v2085_v16 = vmul.f32 %v1445_v55, %v4337_v58  ;;  %v1511_v5 = vmul.f32 %v871_v13, %v6980_v46  ;;  %v1513_v7 = vmul.f32 %v873_v43, %v6981_v14  ;;  %v1381_v29 = vld [vmem:[%s6910_s3 + $0x11b0] sm:$0xff]  ;;  %v6250_v55 = vpop.xlane.xlu0 %2192  ;;  %v876_v43 = vld [vmem:[%s6910_s3 + $0x1e8] sm:$0xff] }
 0x1f1   : > { %v2587_v42 = vadd.f32 %v2586_v22, %v1894_v38  ;;  %v2801_v21 = vadd.f32 %v2800_v28, %v2084_v48  ;;  %v2020_v51 = vmul.f32 %v1380_v0, %v4355_v44  ;;  %v2727_v20 = vadd.f32 %v2726_v25, %v2018_v6  ;;  %v935_v44 = vld [vmem:[%s6910_s3 + $0x3c0] sm:$0xff]  ;;  %v1382_v38 = vld [vmem:[%s6910_s3 + $0x11b8] sm:$0xff]  ;;  %v877_v6 = vld [vmem:[%s6910_s3 + $0x1f0] sm:$0xff]  ;;  %v6266_v22 = vpop.xlane.xlu1 %2336 }
 0x1f2   : > { %v6239_v61 = vadd.f32 %v699_v52, %v6975_v27  ;;  %v6242_v48 = vadd.f32 %v810_v41, %v6975_v27  ;;  %v2158_v37 = vadd.f32 %v1512_v9, %v1511_v5  ;;  %v2086_v63 = vmul.f32 %v1446_v4, %v5776_v23  ;;  %6982 = vst [vmem:[#allocation5_spill] sm:$0xff] %v6266_v22  ;;  %v938_v25 = vld [vmem:[%s6910_s3 + $0x3d8] sm:$0xff]  ;;  %v1128_v5 = vld [vmem:[%s6910_s3 + $0x9c8] sm:$0xff] }
 0x1f3   : > { %2588 = vadd.xlane.f32.xlu0 %v2587_v42  ;;  %v2802_v56 = vadd.f32 %v2801_v21, %v2085_v16  ;;  %v2728_v13 = vadd.f32 %v2727_v20, %v2019_v15  ;;  %v1576_v57 = vmul.f32 %v936_v31, %v5912_v10  ;;  %v2021_v0 = vmul.f32 %v1381_v29, %v4337_v58  ;;  %v939_v58 = vld [vmem:[%s6910_s3 + $0x3e0] sm:$0xff]  ;;  %v1129_v29 = vld [vmem:[%s6910_s3 + $0x9d0] sm:$0xff] }
 0x1f4   : > { %v1514_v9 = vmul.f32 %v874_v36, %v6089_v11  ;;  %v1515_v52 = vmul.f32 %v875_v18, %v6217_v33  ;;  %v2159_v41 = vadd.f32 %v2158_v37, %v1513_v7  ;;  %v1575_v4 = vmul.f32 %v935_v44, %v6980_v46  ;;  %v1127_v21 = vld [vmem:[%s6910_s3 + $0x9c0] sm:$0xff]  ;;  %v940_v18 = vld [vmem:[%s6910_s3 + $0x3e8] sm:$0xff] }
 0x1f5   : > { %v2803_v28 = vadd.f32 %v2802_v56, %v2086_v63  ;;  %v2729_v15 = vadd.f32 %v2728_v13, %v2020_v51  ;;  %v1577_v16 = vmul.f32 %v937_v53, %v6981_v14  ;;  %v6280_v7 = vadd.f32 %v812_v17, %v6975_v27  ;;  %v878_v27 = vld [vmem:[%s6910_s3 + $0x1f8] sm:$0xff]  ;;  %v941_v53 = vld [vmem:[%s6910_s3 + $0x3f0] sm:$0xff]  ;;  %v1000_v56 = vld [vmem:[%s6910_s3 + $0x5c8] sm:$0xff]  ;;  %v6306_v13 = vpop.xlane.xlu0 %2408 }
 0x1f6   : > { %v1516_v31 = vmul.f32 %v876_v43, %v6239_v61  ;;  %v2160_v42 = vadd.f32 %v2159_v41, %v1514_v9  ;;  %v2022_v51 = vmul.f32 %v1382_v38, %v5776_v23  ;;  %v1517_v36 = vmul.f32 %v877_v6, %v6242_v48  ;;  %v999_v9 = vld [vmem:[%s6910_s3 + $0x5c0] sm:$0xff] }
 0x1f7   : > { %2804 = vadd.xlane.f32.xlu1 %v2803_v28  ;;  %v2730_v20 = vadd.f32 %v2729_v15, %v2021_v0  ;;  %v2230_v37 = vadd.f32 %v1576_v57, %v1575_v4  ;;  %v1578_v17 = vmul.f32 %v938_v25, %v6089_v11  ;;  %v1579_v23 = vmul.f32 %v939_v58, %v6217_v33  ;;  %v942_v57 = vld [vmem:[%s6910_s3 + $0x3f8] sm:$0xff]  ;;  %v1131_v58 = vld [vmem:[%s6910_s3 + $0x9e0] sm:$0xff]  ;;  %v6327_v4 = vpop.xlane.xlu1 %2552 }
 0x1f8   : > { %v2161_v44 = vadd.f32 %v2160_v42, %v1515_v52  ;;  %v1768_v63 = vmul.f32 %v1128_v5, %v5912_v10  ;;  %v1767_v0 = vmul.f32 %v1127_v21, %v6980_v46  ;;  %v1769_v6 = vmul.f32 %v1129_v29, %v6981_v14  ;;  %v1001_v52 = vld [vmem:[%s6910_s3 + $0x5d0] sm:$0xff]  ;;  %v1130_v25 = vld [vmem:[%s6910_s3 + $0x9d8] sm:$0xff] }
 0x1f9   : > { %v2731_v43 = vadd.f32 %v2730_v20, %v2022_v51  ;;  %v2231_v38 = vadd.f32 %v2230_v37, %v1577_v16  ;;  %v1518_v41 = vmul.f32 %v878_v27, %v6280_v7  ;;  %v1580_v15 = vmul.f32 %v940_v18, %v6239_v61  ;;  %v1133_v42 = vld [vmem:[%s6910_s3 + $0x9f0] sm:$0xff]  ;;  %v1002_v27 = vld [vmem:[%s6910_s3 + $0x5d8] sm:$0xff]  ;;  %v1003_v18 = vld [vmem:[%s6910_s3 + $0x5e0] sm:$0xff] }
 0x1fa   : > { %v2162_v28 = vadd.f32 %v2161_v44, %v1516_v31  ;;  %v1581_v16 = vmul.f32 %v941_v53, %v6242_v48  ;;  %v1132_v31 = vld [vmem:[%s6910_s3 + $0x9e8] sm:$0xff]  ;;  %v2446_v21 = vadd.f32 %v1768_v63, %v1767_v0  ;;  %v1640_v29 = vmul.f32 %v1000_v56, %v5912_v10  ;;  %v1191_v56 = vld [vmem:[%s6910_s3 + $0xbc0] sm:$0xff] }
 0x1fb   : > { %2732 = vadd.xlane.f32.xlu0 %v2731_v43  ;;  %v2232_v5 = vadd.f32 %v2231_v38, %v1578_v17  ;;  %v1582_v20 = vmul.f32 %v942_v57, %v6280_v7  ;;  %v1639_v37 = vmul.f32 %v999_v9, %v6980_v46  ;;  %v1641_v44 = vmul.f32 %v1001_v52, %v6981_v14  ;;  %v1192_v43 = vld [vmem:[%s6910_s3 + $0xbc8] sm:$0xff]  ;;  %v1193_v57 = vld [vmem:[%s6910_s3 + $0xbd0] sm:$0xff] }
 0x1fc   : > { %v2163_v51 = vadd.f32 %v2162_v28, %v1517_v36  ;;  %v1770_v17 = vmul.f32 %v1130_v25, %v6089_v11  ;;  %v1771_v63 = vmul.f32 %v1131_v58, %v6217_v33  ;;  %v2447_v36 = vadd.f32 %v2446_v21, %v1769_v6  ;;  %v1004_v9 = vld [vmem:[%s6910_s3 + $0x5e8] sm:$0xff]  ;;  %v6365_v28 = vpop.xlane.xlu0 %2480 }
 0x1fd   : > { %v2233_v53 = vadd.f32 %v2232_v5, %v1579_v23  ;;  %v1134_v23 = vld [vmem:[%s6910_s3 + $0x9f8] sm:$0xff]  ;;  %v1772_v0 = vmul.f32 %v1132_v31, %v6239_v61  ;;  %v1773_v6 = vmul.f32 %v1133_v42, %v6242_v48  ;;  %v2302_v52 = vadd.f32 %v1640_v29, %v1639_v37  ;;  %v1195_v29 = vld [vmem:[%s6910_s3 + $0xbe0] sm:$0xff] }
 0x1fe   : > { %v2164_v38 = vadd.f32 %v2163_v51, %v1518_v41  ;;  %v2448_v58 = vadd.f32 %v2447_v36, %v1770_v17  ;;  %v1005_v41 = vld [vmem:[%s6910_s3 + $0x5f0] sm:$0xff]  ;;  %v1642_v5 = vmul.f32 %v1002_v27, %v6089_v11  ;;  %v1643_v21 = vmul.f32 %v1003_v18, %v6217_v33  ;;  %v1194_v31 = vld [vmem:[%s6910_s3 + $0xbd8] sm:$0xff]  ;;  %v1064_v27 = vld [vmem:[%s6910_s3 + $0x7c8] sm:$0xff]  ;;  %v6384_v18 = vpop.xlane.xlu1 %2624 }
 0x1ff   : > { %v2234_v25 = vadd.f32 %v2233_v53, %v1580_v15  ;;  %v2303_v42 = vadd.f32 %v2302_v52, %v1641_v44  ;;  %v1831_v15 = vmul.f32 %v1191_v56, %v6980_v46  ;;  %v1832_v51 = vmul.f32 %v1192_v43, %v5912_v10  ;;  %v1063_v56 = vld [vmem:[%s6910_s3 + $0x7c0] sm:$0xff]  ;;  %v1065_v43 = vld [vmem:[%s6910_s3 + $0x7d0] sm:$0xff] }
 0x200   : > { %2165 = vadd.xlane.f32.xlu1 %v2164_v38  ;;  %v1833_v37 = vmul.f32 %v1193_v57, %v6981_v14  ;;  %v1774_v17 = vmul.f32 %v1134_v23, %v6280_v7  ;;  %v2449_v44 = vadd.f32 %v2448_v58, %v1771_v63  ;;  %v1644_v36 = vmul.f32 %v1004_v9, %v6239_v61  ;;  %v1006_v57 = vld [vmem:[%s6910_s3 + $0x5f8] sm:$0xff] }
 0x201   : > { %v2235_v53 = vadd.f32 %v2234_v25, %v1581_v16  ;;  %v1645_v38 = vmul.f32 %v1005_v41, %v6242_v48  ;;  %v2304_v16 = vadd.f32 %v2303_v42, %v1642_v5  ;;  %v1834_v23 = vmul.f32 %v1194_v31, %v6089_v11  ;;  %v1196_v25 = vld [vmem:[%s6910_s3 + $0xbe8] sm:$0xff]  ;;  %v1066_v5 = vld [vmem:[%s6910_s3 + $0x7d8] sm:$0xff]  ;;  %v6412_v31 = vpop.xlane.xlu0 %2696 }
 0x202   : > { %v2518_v63 = vadd.f32 %v1832_v51, %v1831_v15  ;;  %v2450_v9 = vadd.f32 %v2449_v44, %v1772_v0  ;;  %v1835_v58 = vmul.f32 %v1195_v29, %v6217_v33  ;;  %v1704_v45 = vmul.f32 %v1064_v27, %v5912_v10  ;;  %v1383_v15 = vld [vmem:[%s6910_s3 + $0x11c0] sm:$0xff] }
 0x203   : > { %v2236_v52 = vadd.f32 %v2235_v53, %v1582_v20  ;;  %v2305_v22 = vadd.f32 %v2304_v16, %v1643_v21  ;;  %v1703_v20 = vmul.f32 %v1063_v56, %v6980_v46  ;;  %v1705_v0 = vmul.f32 %v1065_v43, %v6981_v14  ;;  %v1067_v21 = vld [vmem:[%s6910_s3 + $0x7e0] sm:$0xff]  ;;  %v1384_v56 = vld [vmem:[%s6910_s3 + $0x11c8] sm:$0xff]  ;;  %v6431_v43 = vpop.xlane.xlu1 %2768  ;;  %v1385_v16 = vld [vmem:[%s6910_s3 + $0x11d0] sm:$0xff] }
 0x204   : > { %v2519_v41 = vadd.f32 %v2518_v63, %v1833_v37  ;;  %v2451_v42 = vadd.f32 %v2450_v9, %v1773_v6  ;;  %v1646_v29 = vmul.f32 %v1006_v57, %v6280_v7  ;;  %v1198_v37 = vld [vmem:[%s6910_s3 + $0xbf8] sm:$0xff]  ;;  %v1836_v27 = vmul.f32 %v1196_v25, %v6239_v61  ;;  %v1068_v6 = vld [vmem:[%s6910_s3 + $0x7e8] sm:$0xff] }
 0x205   : > { %2237 = vadd.xlane.f32.xlu0 %v2236_v52  ;;  %v2306_v51 = vadd.f32 %v2305_v22, %v1644_v36  ;;  %v2374_v44 = vadd.f32 %v1704_v45, %v1703_v20  ;;  %v1837_v22 = vmul.f32 %v1197_v34, %v6242_v48  ;;  %v1706_v36 = vmul.f32 %v1066_v5, %v6089_v11  ;;  %v1069_v45 = vld [vmem:[%s6910_s3 + $0x7f0] sm:$0xff]  ;;  %v1070_v34 = vld [vmem:[%s6910_s3 + $0x7f8] sm:$0xff] }
 0x206   : > { %v2520_v53 = vadd.f32 %v2519_v41, %v1834_v23  ;;  %v2452_v57 = vadd.f32 %v2451_v42, %v1774_v17  ;;  %v1707_v52 = vmul.f32 %v1067_v21, %v6217_v33  ;;  %v1838_v17 = vmul.f32 %v1198_v37, %v6280_v7  ;;  %v1255_v21 = vld [vmem:[%s6910_s3 + $0xdc0] sm:$0xff]  ;;  %v1257_v37 = vld [vmem:[%s6910_s3 + $0xdd0] sm:$0xff] }
 0x207   : > { %v2307_v23 = vadd.f32 %v2306_v51, %v1645_v38  ;;  %v2375_v9 = vadd.f32 %v2374_v44, %v1705_v0  ;;  %v1708_v25 = vmul.f32 %v1068_v6, %v6239_v61  ;;  %v1386_v38 = vld [vmem:[%s6910_s3 + $0x11d8] sm:$0xff]  ;;  %v2024_v41 = vmul.f32 %v1384_v56, %v5912_v10  ;;  %v1256_v51 = vld [vmem:[%s6910_s3 + $0xdc8] sm:$0xff] }
 0x208   : > { %v2521_v63 = vadd.f32 %v2520_v53, %v1835_v58  ;;  %2453 = vadd.xlane.f32.xlu1 %v2452_v57  ;;  %v2023_v58 = vmul.f32 %v1383_v15, %v6980_v46  ;;  %v2025_v42 = vmul.f32 %v1385_v16, %v6981_v14  ;;  %v6462_v15 = vpop.xlane.xlu0 %2201  ;;  %v1710_v6 = vmul.f32 %v1070_v34, %v6280_v7  ;;  %v6469_v57 = vpop.xlane.xlu1 %2129  ;;  %v1389_v16 = vld [vmem:[%s6910_s3 + $0x11f0] sm:$0xff] }
 0x209   : > { %v2308_v5 = vadd.f32 %v2307_v23, %v1646_v29  ;;  %v2376_v0 = vadd.f32 %v2375_v9, %v1706_v36  ;;  %v1709_v29 = vmul.f32 %v1069_v45, %v6242_v48  ;;  %v1388_v36 = vld [vmem:[%s6910_s3 + $0x11e8] sm:$0xff]  ;;  %v2026_v23 = vmul.f32 %v1386_v38, %v6089_v11 }
 0x20a   : > { %v2522_v20 = vadd.f32 %v2521_v63, %v1836_v27  ;;  %v1387_v27 = vld [vmem:[%s6910_s3 + $0x11e0] sm:$0xff]  ;;  %v2734_v56 = vadd.f32 %v2024_v41, %v2023_v58  ;;  %v1895_v63 = vmul.f32 %v1255_v21, %v6980_v46  ;;  %v1897_v45 = vmul.f32 %v1257_v37, %v6981_v14  ;;  %v1258_v41 = vld [vmem:[%s6910_s3 + $0xdd8] sm:$0xff]  ;;  %v1320_v38 = vld [vmem:[%s6910_s3 + $0xfc8] sm:$0xff] }
 0x20b   : > { %2309 = vadd.xlane.f32.xlu0 %v2308_v5  ;;  %v2377_v44 = vadd.f32 %v2376_v0, %v1707_v52  ;;  %v2027_v34 = vmul.f32 %v1387_v27, %v6217_v33  ;;  %v1259_v5 = vld [vmem:[%s6910_s3 + $0xde0] sm:$0xff]  ;;  %v2028_v21 = vmul.f32 %v1388_v36, %v6239_v61  ;;  %v1260_v27 = vld [vmem:[%s6910_s3 + $0xde8] sm:$0xff]  ;;  %v1960_v36 = vmul.f32 %v1320_v38, %v5912_v10 }
 0x20c   : > { %v2523_v53 = vadd.f32 %v2522_v20, %v1837_v22  ;;  %v1896_v22 = vmul.f32 %v1256_v51, %v5912_v10  ;;  %v2735_v58 = vadd.f32 %v2734_v56, %v2025_v42  ;;  %v2895_v20 = vlaneseq  ;;  %v1323_v38 = vld [vmem:[%s6910_s3 + $0xfe0] sm:$0xff] }
 0x20d   : > { %v2378_v9 = vadd.f32 %v2377_v44, %v1708_v25  ;;  %v1321_v25 = vld [vmem:[%s6910_s3 + $0xfd0] sm:$0xff]  ;;  %v2029_v51 = vmul.f32 %v1389_v16, %v6242_v48  ;;  %v1390_v44 = vld [vmem:[%s6910_s3 + $0x11f8] sm:$0xff]  ;;  %v1898_v56 = vmul.f32 %v1258_v41, %v6089_v11  ;;  %v6518_v41 = vpop.xlane.xlu1 %2345 }
 0x20e   : > { %v2524_v52 = vadd.f32 %v2523_v53, %v1838_v17  ;;  %v2590_v0 = vadd.f32 %v1896_v22, %v1895_v63  ;;  %v1319_v17 = vld [vmem:[%s6910_s3 + $0xfc0] sm:$0xff]  ;;  %v2736_v37 = vadd.f32 %v2735_v58, %v2026_v23  ;;  %v6502_v53 = vpop.xlane.xlu0 %2273  ;;  %v1899_v63 = vmul.f32 %v1259_v5, %v6217_v33  ;;  %v1261_v23 = vld [vmem:[%s6910_s3 + $0xdf0] sm:$0xff]  ;;  %v1448_v58 = vld [vmem:[%s6910_s3 + $0x13c8] sm:$0xff]  ;;  %6984 = vst [vmem:[#allocation8_spill] sm:$0xff] %v6518_v41 }
 0x20f   : > { %v2379_v42 = vadd.f32 %v2378_v9, %v1709_v29  ;;  %6983 = vst [vmem:[#allocation6_spill] sm:$0xff] %v6502_v53  ;;  %v1961_v9 = vmul.f32 %v1321_v25, %v6981_v14  ;;  %v6520_v5 = vand.u32 127, %v2895_v20 }
 0x210   : > { %2525 = vadd.xlane.f32.xlu1 %v2524_v52  ;;  %v2591_v29 = vadd.f32 %v2590_v0, %v1897_v45  ;;  %v2737_v16 = vadd.f32 %v2736_v37, %v2027_v34  ;;  %v1959_v52 = vmul.f32 %v1319_v17, %v6980_v46  ;;  %v1900_v45 = vmul.f32 %v1260_v27, %v6239_v61  ;;  %v1322_v34 = vld [vmem:[%s6910_s3 + $0xfd8] sm:$0xff]  ;;  %v1447_v27 = vld [vmem:[%s6910_s3 + $0x13c0] sm:$0xff] }
 0x211   : > { %v2380_v22 = vadd.f32 %v2379_v42, %v1710_v6  ;;  %v6529_v0 = vshrl.u32 %v2895_v20, 7  ;;  %v2030_v17 = vmul.f32 %v1390_v44, %v6280_v7  ;;  %v1262_v42 = vld [vmem:[%s6910_s3 + $0xdf8] sm:$0xff]  ;;  %v2901_v20 = vadd.s32 4294967288, %v6520_v5 }
 0x212   : > { %v2592_v6 = vadd.f32 %v2591_v29, %v1898_v56  ;;  %v2738_v25 = vadd.f32 %v2737_v16, %v2028_v21  ;;  %v2662_v37 = vadd.f32 %v1960_v36, %v1959_v52  ;;  %v1449_v56 = vld [vmem:[%s6910_s3 + $0x13d0] sm:$0xff]  ;;  %v1901_v29 = vmul.f32 %v1261_v23, %v6242_v48  ;;  %v1324_v21 = vld [vmem:[%s6910_s3 + $0xfe8] sm:$0xff]  ;;  %v6549_v53 = vpop.xlane.xlu0 %2489 }
 0x213   : > { %2381 = vadd.xlane.f32.xlu0 %v2380_v22  ;;  %v2088_v44 = vmul.f32 %v1448_v58, %v5912_v10  ;;  %v1962_v16 = vmul.f32 %v1322_v34, %v6089_v11  ;;  %v1963_v52 = vmul.f32 %v1323_v38, %v6217_v33  ;;  %v1902_v1 = vmul.f32 %v1262_v42, %v6280_v7  ;;  %v1451_v34 = vld [vmem:[%s6910_s3 + $0x13e0] sm:$0xff]  ;;  %v6568_v38 = vpop.xlane.xlu1 %2417 }
 0x214   : > { %v2593_v22 = vadd.f32 %v2592_v6, %v1899_v63  ;;  %v2739_v36 = vadd.f32 %v2738_v25, %v2029_v51  ;;  %v2663_v41 = vadd.f32 %v2662_v37, %v1961_v9  ;;  %v1325_v63 = vld [vmem:[%s6910_s3 + $0xff0] sm:$0xff]  ;;  %v2087_v23 = vmul.f32 %v1447_v27, %v6980_v46  ;;  %v1452_v27 = vld [vmem:[%s6910_s3 + $0x13e8] sm:$0xff] }
 0x215   : > { %v2089_v6 = vmul.f32 %v1449_v56, %v6981_v14  ;;  %v6559_v10 = vsub.s32 %v6520_v5, %v6529_v0  ;;  %v1964_v9 = vmul.f32 %v1324_v21, %v6239_v61  ;;  %v1326_v14 = vld [vmem:[%s6910_s3 + $0xff8] sm:$0xff]  ;;  %v1965_v42 = vmul.f32 %v1325_v63, %v6242_v48  ;;  %v1453_v56 = vld [vmem:[%s6910_s3 + $0x13f0] sm:$0xff] }
 0x216   : > { %v2594_v40 = vadd.f32 %v2593_v22, %v1900_v45  ;;  %v2740_v51 = vadd.f32 %v2739_v36, %v2030_v17  ;;  %v2664_v58 = vadd.f32 %v2663_v41, %v1962_v16  ;;  %v1450_v45 = vld [vmem:[%s6910_s3 + $0x13d8] sm:$0xff]  ;;  %v2806_v25 = vadd.f32 %v2088_v44, %v2087_v23  ;;  %v6592_v16 = vpop.xlane.xlu0 %2561 }
 0x217   : > { %v3109_v17 = vrot.slane %v5721_v39, %v6559_v10  ;;  %v6576_v41 = vsub.s32 %v2901_v20, %v6529_v0  ;;  %v2091_v39 = vmul.f32 %v1451_v34, %v6217_v33  ;;  %v2953_v20 = vrot.slane %v5700_v3, %v6559_v10 }
 0x218   : > { %v2595_v46 = vadd.f32 %v2594_v40, %v1901_v29  ;;  %2741 = vadd.xlane.f32.xlu1 %v2740_v51  ;;  %v2665_v37 = vadd.f32 %v2664_v58, %v1963_v52  ;;  %v2090_v29 = vmul.f32 %v1450_v45, %v6089_v11  ;;  %v2807_v22 = vadd.f32 %v2806_v25, %v2089_v6  ;;  %v2706_v6 = vpop.xlane.xlu1 %2705 }
 0x219   : > { %v2957_v21 = vrot.slane %v5884_v19, %v6576_v41  ;;  %v1966_v44 = vmul.f32 %v1326_v14, %v6280_v7  ;;  %v2092_v11 = vmul.f32 %v1452_v27, %v6239_v61  ;;  %v3070_v52 = vrot.slane %v5812_v26, %v6559_v10  ;;  %v1454_v19 = vld [vmem:[%s6910_s3 + $0x13f8] sm:$0xff] }
 0x21a   : > { %v2596_v40 = vadd.f32 %v2595_v46, %v1902_v1  ;;  %v2666_v36 = vadd.f32 %v2665_v37, %v1964_v9  ;;  %v3148_v1 = vrot.slane %v5773_v47, %v6559_v10  ;;  %v2808_v33 = vadd.f32 %v2807_v22, %v2090_v29  ;;  %v2634_v25 = vpop.xlane.xlu0 %2633 }
 0x21b   : > { %v2093_v63 = vmul.f32 %v1453_v56, %v6242_v48  ;;  %v2908_v23 = vadd.s32 4294967280, %v6520_v5  ;;  %v3074_v47 = vrot.slane %v5996_v49, %v6576_v41  ;;  %v3191_v61 = vrot.slane %v6051_v59, %v6576_v41 }
 0x21c   : > { %2597 = vadd.xlane.f32.xlu0 %v2596_v40  ;;  %v2667_v3 = vadd.f32 %v2666_v36, %v1965_v42  ;;  %v2809_v51 = vadd.f32 %v2808_v33, %v2091_v39  ;;  %v3230_v26 = vrot.slane %v6106_v60, %v6576_v41  ;;  %v2958_v9 = vsel %vm2906_vm2, %v2957_v21, %v2953_v20  ;;  %v2211_v40 = vpop.xlane.xlu1 %2210 }
 0x21d   : > { %v3187_v58 = vrot.slane %v5865_v54, %v6559_v10  ;;  %v3113_v48 = vrot.slane %v6085_v8, %v6576_v41  ;;  %v3226_v34 = vrot.slane %v5922_v30, %v6559_v10  ;;  %v2094_v49 = vmul.f32 %v1454_v19, %v6280_v7 }
 0x21e   : > { %v2668_v45 = vadd.f32 %v2667_v3, %v1966_v44  ;;  %v2810_v46 = vadd.f32 %v2809_v51, %v2092_v11  ;;  %v2915_v59 = vadd.s32 4294967272, %v6520_v5  ;;  %v3265_v60 = vrot.slane %v5975_v2, %v6559_v10 }
 0x21f   : > { %v3269_v14 = vrot.slane %v6160_v35, %v6576_v41  ;;  %v3152_v54 = vrot.slane %v6141_v62, %v6576_v41  ;;  %v6626_v8 = vsub.s32 %v2908_v23, %v6529_v0  ;;  %v3075_v7 = vsel %vm2906_vm2, %v3074_v47, %v3070_v52 }
 0x220   : > { %2669 = vadd.xlane.f32.xlu0 %v2668_v45  ;;  %v2811_v30 = vadd.f32 %v2810_v46, %v2093_v63  ;;  %v3192_v42 = vsel %vm2906_vm2, %v3191_v61, %v3187_v58  ;;  %v3231_v37 = vsel %vm2906_vm2, %v3230_v26, %v3226_v34  ;;  %v3114_v27 = vsel %vm2906_vm2, %v3113_v48, %v3109_v17  ;;  %v2427_v19 = vpop.xlane.xlu1 %2426 }
 0x221   : > { %v2962_v2 = vrot.slane %v6250_v55, %v6626_v8  ;;  %v3157_v35 = vrot.slane %v6327_v4, %v6626_v8  ;;  %v3079_v62 = vrot.slane %v6306_v13, %v6626_v8  ;;  %v3196_v29 = vrot.slane %v6384_v18, %v6626_v8 }
 0x222   : > { %v2812_v56 = vadd.f32 %v2811_v30, %v2094_v49  ;;  %v6641_v39 = vsub.s32 %v2915_v59, %v6529_v0  ;;  %v3270_v17 = vsel %vm2906_vm2, %v3269_v14, %v3265_v60  ;;  %v3153_v22 = vsel %vm2906_vm2, %v3152_v54, %v3148_v1 }
 0x223   : > { %v3118_v55 = vrot.slane %v6365_v28, %v6626_v8  ;;  %v2922_v4 = vadd.s32 4294967264, %v6520_v5  ;;  %v3274_v13 = vrot.slane %v6431_v43, %v6626_v8  ;;  %v3235_v20 = vrot.slane %v6412_v31, %v6626_v8  ;;  %v2778_v28 = vpop.xlane.xlu0 %2777 }
 0x224   : > { %2813 = vadd.xlane.f32.xlu0 %v2812_v56  ;;  %v3084_v18 = vrot.slane %v6568_v38, %v6641_v39  ;;  %v2963_v21 = vsel %vm2913_vm3, %v2962_v2, %v2958_v9  ;;  %v3158_v44 = vsel %vm2913_vm3, %v3157_v35, %v3153_v22  ;;  %v3080_v36 = vsel %vm2913_vm3, %v3079_v62, %v3075_v7  ;;  %v6696_v34 = vpop.xlane.xlu1 %2498 }
 0x225   : > { %v3197_v1 = vsel %vm2913_vm3, %v3196_v29, %v3192_v42  ;;  %v3119_v11 = vsel %vm2913_vm3, %v3118_v55, %v3114_v27  ;;  %v2967_v43 = vrot.slane %v6462_v15, %v6641_v39  ;;  %v3123_v38 = vrot.slane %v6549_v53, %v6641_v39 }
 0x226   : > { %v3085_v31 = vsel %vm2920_vm4, %v3084_v18, %v3080_v36  ;;  %v3240_v33 = vrot.slane %v2706_v6, %v6641_v39  ;;  %v3162_v52 = vrot.slane %v6592_v16, %v6641_v39  ;;  %v6668_v3 = vsub.s32 %v2922_v4, %v6529_v0 }
 0x227   : > { %v3275_v63 = vsel %vm2913_vm3, %v3274_v13, %v3270_v17  ;;  %v3236_v23 = vsel %vm2913_vm3, %v3235_v20, %v3231_v37  ;;  %v3201_v15 = vrot.slane %v2634_v25, %v6641_v39  ;;  %v3279_v51 = vrot.slane %v2778_v28, %v6641_v39  ;;  %v2139_v49 = vpop.xlane.xlu0 %2138 }
 0x228   : > { %v6675_v47 = vsel %vm2920_vm4, %v3123_v38, %v3119_v11  ;;  %v6678_v53 = vsel %vm2920_vm4, %v3240_v33, %v3236_v23  ;;  %v6681_v16 = vsel %vm2920_vm4, %v3162_v52, %v3158_v44  ;;  %v2972_v6 = vrot.slane %v2211_v40, %v6668_v3  ;;  %v6698_v46 = vpop.xlane.xlu1 %2570 }
 0x229   : > { %v2968_v61 = vsel %vm2920_vm4, %v2967_v43, %v2963_v21  ;;  %v6686_v26 = vsel %vm2920_vm4, %v3201_v15, %v3197_v1  ;;  %v3089_v9 = vrot.slane %v2427_v19, %v6668_v3  ;;  %v6690_v58 = vsel %vm2920_vm4, %v3279_v51, %v3275_v63 }
 0x22a   : > { %v2973_v45 = vsel %vm2927_vm5, %v2972_v6, %v2968_v61  ;;  %v2936_v18 = vadd.s32 4294967248, %v6520_v5  ;;  %v2929_v44 = vadd.s32 4294967256, %v6520_v5  ;;  %v2943_v28 = vadd.s32 4294967240, %v6520_v5 }
 0x22b   : > { %v6694_v48 = vsel %vm2927_vm5, %v3089_v9, %v3085_v31  ;;  %v6700_v59 = vpop.xlane.xlu0 %2282  ;;  %v2905_v1 = vrot.slane %v5830_v32, %v6576_v41  ;;  %v2912_v11 = vrot.slane %v6195_v50, %v6626_v8  ;;  %v2900_v31 = vrot.slane %v5647_v24, %v6559_v10 }
 0x22c   : > { %v6748_v43 = vsub.s32 %v2936_v18, %v6529_v0  ;;  %v2919_v38 = vrot.slane %v6469_v57, %v6641_v39  ;;  %v6755_v33 = vsub.s32 %v2929_v44, %v6529_v0  ;;  %v6758_v5 = vsub.s32 %v2943_v28, %v6529_v0 }
 0x22d   : > { %v2926_v32 = vrot.slane %v2139_v49, %v6668_v3  ;;  %v2907_v50 = vsel %vm2906_vm2, %v2905_v1, %v2900_v31  ;;  %v2996_v9 = vrot.slane %v6033_v12, %v6576_v41  ;;  %v6985_v49 = vld [vmem:[#allocation3_spill] sm:$0xff] }
 0x22e   : > { %v6702_v60 = vpop.xlane.xlu1 %2714  ;;  %v2914_v24 = vsel %vm2913_vm3, %v2912_v11, %v2907_v50  ;;  %v6987_v11 = vld [vmem:[#allocation6_spill] sm:$0xff] }
 0x22f   : > { %v2921_v57 = vsel %vm2920_vm4, %v2919_v38, %v2914_v24  ;;  %v3006_v31 = vrot.slane %v6987_v11, %v6641_v39  ;;  %v3011_v38 = vrot.slane %v6700_v59, %v6668_v3 }
 0x230   : > { %v2928_v51 = vsel %vm2927_vm5, %v2926_v32, %v2921_v57 }
 0x231   : > { %v6704_v14 = vpop.xlane.xlu0 %2354 }
 0x235   : > { %v2220_v54 = vpop.xlane.xlu1 %2219 }
 0x236   : > { %v2977_v15 = vrot.slane %v2220_v54, %v6755_v33 }
 0x238   : > { %v2978_v18 = vsel %vm2934_vm7, %v2977_v15, %v2973_v45 }
 0x239   : > { %v6706_v25 = vpop.xlane.xlu0 %2642 }
 0x23d   : > { %v6708_v30 = vpop.xlane.xlu1 %2291 }
 0x23e   : > { %v3016_v50 = vrot.slane %v6708_v30, %v6755_v33 }
 0x240   : > { %v6710_v7 = vpop.xlane.xlu0 %2786 }
 0x244   : > { %v6712_v42 = vpop.xlane.xlu1 %2579 }
 0x248   : > { %v2148_v37 = vpop.xlane.xlu0 %2147 }
 0x249   : > { %v2933_v19 = vrot.slane %v2148_v37, %v6755_v33  ;;  %v3001_v37 = vrot.slane %v6985_v49, %v6626_v8 }
 0x24b   : > { %v2935_v61 = vsel %vm2934_vm7, %v2933_v19, %v2928_v51 }
 0x24c   : > { %v6714_v27 = vpop.xlane.xlu1 %2651 }
 0x24f   : > { %v6716_v2 = vpop.xlane.xlu0 %2363 }
 0x253   : > { %v6718_v35 = vpop.xlane.xlu1 %2795 }
 0x257   : > { %v6720_v62 = vpop.xlane.xlu0 %2435 }
 0x25b   : > { %v2157_v40 = vpop.xlane.xlu1 %2156 }
 0x25c   : > { %v2940_v23 = vrot.slane %v2157_v40, %v6748_v43 }
 0x25e   : > { %v6722_v56 = vpop.xlane.xlu0 %2507  ;;  %v2942_v40 = vsel %vm2941_vm6, %v2940_v23, %v2935_v61  ;;  %v6989_v61 = vld [vmem:[#allocation5_spill] sm:$0xff] }
 0x262   : > { %v6724_v29 = vpop.xlane.xlu1 %2300 }
 0x263   : > { %v3021_v24 = vrot.slane %v6724_v29, %v6748_v43  ;;  %v6990_v29 = vld [vmem:[#allocation2_spill] sm:$0xff] }
 0x266   : > { %v6726_v17 = vpop.xlane.xlu0 %2723 }
 0x26a   : > { %v6728_v22 = vpop.xlane.xlu1 %2372 }
 0x26d   : > { %v2229_v55 = vpop.xlane.xlu0 %2228 }
 0x26e   : > { %v2982_v6 = vrot.slane %v2229_v55, %v6748_v43  ;;  %v6986_v55 = vld [vmem:[#allocation23_spill] sm:$0xff] }
 0x26f   : > { %v2992_v1 = vrot.slane %v6986_v55, %v6559_v10  ;;  %v3055_v55 = vrot.slane %v6716_v2, %v6755_v33 }
 0x270   : > { %v2983_v12 = vsel %vm2941_vm6, %v2982_v6, %v2978_v18 }
 0x271   : > { %v6730_v4 = vpop.xlane.xlu1 %2444  ;;  %v2997_v45 = vsel %vm2906_vm2, %v2996_v9, %v2992_v1  ;;  %v3040_v9 = vrot.slane %v6989_v61, %v6626_v8  ;;  %v3128_v1 = vrot.slane %v6696_v34, %v6668_v3  ;;  %v3206_v61 = vrot.slane %v6706_v25, %v6668_v3 }
 0x272   : > { %v3099_v2 = vrot.slane %v6730_v4, %v6748_v43 }
 0x273   : > { %v3207_v25 = vsel %vm2927_vm5, %v3206_v61, %v6686_v26 }
 0x275   : > { %v6732_v13 = vpop.xlane.xlu0 %2516 }
 0x276   : > { %v3138_v34 = vrot.slane %v6732_v13, %v6748_v43 }
 0x279   : > { %v6734_v20 = vpop.xlane.xlu1 %2660 }
 0x27c   : > { %v6737_v21 = vpop.xlane.xlu0 %2588 }
 0x280   : > { %v6740_v36 = vpop.xlane.xlu1 %2804 }
 0x281   : > { %v3294_v26 = vrot.slane %v6740_v36, %v6748_v43 }
 0x284   : > { %v6761_v52 = vpop.xlane.xlu0 %2732 }
 0x289   : > { %v2166_v63 = vpop.xlane.xlu1 %2165 }
 0x28a   : > { %v2947_v0 = vrot.slane %v2166_v63, %v6758_v5  ;;  %v3002_v63 = vsel %vm2913_vm3, %v3001_v37, %v2997_v45  ;;  %v3031_v37 = vrot.slane %v6990_v29, %v6559_v10  ;;  %v3094_v10 = vrot.slane %v6720_v62, %v6755_v33 }
 0x28b   : > { %v3007_v23 = vsel %vm2920_vm4, %v3006_v31, %v3002_v63  ;;  %v3133_v31 = vrot.slane %v6722_v56, %v6755_v33  ;;  %v3129_v56 = vsel %vm2927_vm5, %v3128_v1, %v6675_v47  ;;  %v3167_v47 = vrot.slane %v6698_v46, %v6668_v3 }
 0x28c   : > { %v2949_v44 = vsel %vm2948_vm8, %v2947_v0, %v2942_v40  ;;  %v3012_v57 = vsel %vm2927_vm5, %v3011_v38, %v3007_v23  ;;  %v6988_v0 = vld [vmem:[#allocation4_spill] sm:$0xff]  ;;  %v3095_v4 = vsel %vm2934_vm7, %v3094_v10, %v6694_v48 }
 0x28d   : > { %v3035_v51 = vrot.slane %v6988_v0, %v6576_v41  ;;  %v3017_v6 = vsel %vm2934_vm7, %v3016_v50, %v3012_v57  ;;  %v6991_v40 = vld [vmem:[#allocation8_spill] sm:$0xff]  ;;  %v3050_v41 = vrot.slane %v6704_v14, %v6668_v3  ;;  %v3134_v13 = vsel %vm2934_vm7, %v3133_v31, %v3129_v56 }
 0x28e   : > { %v2238_v54 = vpop.xlane.xlu0 %2237  ;;  %v3022_v49 = vsel %vm2941_vm6, %v3021_v24, %v3017_v6  ;;  %v3139_v24 = vsel %vm2941_vm6, %v3138_v34, %v3134_v13  ;;  %v3168_v6 = vsel %vm2927_vm5, %v3167_v47, %v6681_v16 }
 0x28f   : > { %v2987_v28 = vrot.slane %v2238_v54, %v6758_v5  ;;  %v3045_v54 = vrot.slane %v6991_v40, %v6641_v39  ;;  %v3060_v39 = vrot.slane %v6728_v22, %v6748_v43 }
 0x291   : > { %v2988_v32 = vsel %vm2948_vm8, %v2987_v28, %v2983_v12  ;;  %v2454_v15 = vpop.xlane.xlu1 %2453  ;;  %v3036_v28 = vsel %vm2906_vm2, %v3035_v51, %v3031_v37  ;;  %v3177_v51 = vrot.slane %v6737_v21, %v6748_v43  ;;  %v3216_v21 = vrot.slane %v6734_v20, %v6748_v43 }
 0x292   : > { %v3302_v19 = vsel %vm3301_vm9, %v2988_v32, %v2949_v44  ;;  %v3041_v8 = vsel %vm2913_vm3, %v3040_v9, %v3036_v28  ;;  %v3104_v38 = vrot.slane %v2454_v15, %v6758_v5  ;;  %v3245_v37 = vrot.slane %v6702_v60, %v6668_v3 }
 0x293   : > { %v3046_v14 = vsel %vm2920_vm4, %v3045_v54, %v3041_v8  ;;  %v3284_v54 = vrot.slane %v6710_v7, %v6668_v3  ;;  %v3289_v20 = vrot.slane %v6718_v35, %v6755_v33  ;;  %v3255_v3 = vrot.slane %v6761_v52, %v6748_v43 }
 0x294   : > { %v2310_v59 = vpop.xlane.xlu0 %2309  ;;  %v3051_v12 = vsel %vm2927_vm5, %v3050_v41, %v3046_v14  ;;  %v3246_v35 = vsel %vm2927_vm5, %v3245_v37, %v6678_v53  ;;  %v3326_v14 = vld [vmem:[%s6911_s4] sm:$0xff]  ;;  %vm3330_vm2 = vcmask 7168   ;;  %vm3332_vm3 = vcmask 1024  }
 0x295   : > { %v3026_v30 = vrot.slane %v2310_v59, %v6758_v5  ;;  %v3056_v32 = vsel %vm2934_vm7, %v3055_v55, %v3051_v12  ;;  %v3172_v59 = vrot.slane %v6712_v42, %v6755_v33 }
 0x296   : > { %v3061_v50 = vsel %vm2941_vm6, %v3060_v39, %v3056_v32 }
 0x297   : > { %v3027_v18 = vsel %vm2948_vm8, %v3026_v30, %v3022_v49  ;;  %v3173_v9 = vsel %vm2934_vm7, %v3172_v59, %v3168_v6  ;;  %v3211_v49 = vrot.slane %v6714_v27, %v6755_v33 }
 0x298   : > { %v3304_v44 = vsel %vm3303_vm10, %v3027_v18, %v3302_v19  ;;  %v3100_v19 = vsel %vm2941_vm6, %v3099_v2, %v3095_v4  ;;  %v3178_v42 = vsel %vm2941_vm6, %v3177_v51, %v3173_v9  ;;  %v3327_v2 = vld [vmem:[%s6911_s4 + $0x8] sm:$0x3] }
 0x299   : > { %v2526_v11 = vpop.xlane.xlu1 %2525  ;;  %v3105_v23 = vsel %vm2948_vm8, %v3104_v38, %v3100_v19  ;;  %v3212_v27 = vsel %vm2934_vm7, %v3211_v49, %v3207_v25 }
 0x29a   : > { %v3143_v22 = vrot.slane %v2526_v11, %v6758_v5  ;;  %v3217_v60 = vsel %vm2941_vm6, %v3216_v21, %v3212_v27 }
 0x29c   : > { %v2382_v62 = vpop.xlane.xlu0 %2381  ;;  %v3144_v48 = vsel %vm2948_vm8, %v3143_v22, %v3139_v24 }
 0x29d   : > { %v3065_v45 = vrot.slane %v2382_v62, %v6758_v5 }
 0x29f   : > { %v3066_v63 = vsel %vm2948_vm8, %v3065_v45, %v3061_v50 }
 0x2a0   : > { %v3306_v57 = vsel %vm3305_vm11, %v3066_v63, %v3304_v44  ;;  %v3250_v44 = vrot.slane %v6726_v17, %v6755_v33  ;;  %v3285_v17 = vsel %vm2927_vm5, %v3284_v54, %v6690_v58 }
 0x2a1   : > { %v3308_v15 = vsel %vm3307_vm12, %v3105_v23, %v3306_v57  ;;  %v2742_v18 = vpop.xlane.xlu1 %2741  ;;  %v3290_v1 = vsel %vm2934_vm7, %v3289_v20, %v3285_v17 }
 0x2a2   : > { %v3310_v0 = vsel %vm3309_vm13, %v3144_v48, %v3308_v15  ;;  %v3260_v28 = vrot.slane %v2742_v18, %v6758_v5  ;;  %v3251_v36 = vsel %vm2934_vm7, %v3250_v44, %v3246_v35  ;;  %v3295_v52 = vsel %vm2941_vm6, %v3294_v26, %v3290_v1 }
 0x2a3   : > { %v3256_v10 = vsel %vm2941_vm6, %v3255_v3, %v3251_v36 }
 0x2a4   : > { %v3261_v53 = vsel %vm2948_vm8, %v3260_v28, %v3256_v10 }
 0x2a5   : > { %v2598_v30 = vpop.xlane.xlu0 %2597 }
 0x2a6   : > { %v3182_v46 = vrot.slane %v2598_v30, %v6758_v5 }
 0x2a8   : > { %v3183_v29 = vsel %vm2948_vm8, %v3182_v46, %v3178_v42 }
 0x2a9   : > { %v3312_v16 = vsel %vm3311_vm14, %v3183_v29, %v3310_v0  ;;  %v2670_v40 = vpop.xlane.xlu0 %2669 }
 0x2aa   : > { %v3221_v41 = vrot.slane %v2670_v40, %v6758_v5 }
 0x2ac   : > { %v3222_v7 = vsel %vm2948_vm8, %v3221_v41, %v3217_v60 }
 0x2ad   : > { %v3314_v55 = vsel %vm3313_vm15, %v3222_v7, %v3312_v16  ;;  %v2814_v33 = vpop.xlane.xlu0 %2813 }
 0x2ae   : > { %v3319_v8 = vsel %vm3318_vm0, %v3314_v55, 0.0  ;;  %v3299_v43 = vrot.slane %v2814_v33, %v6758_v5 }
 0x2af   : > { %3320 = vadd.xlane.f32.xlu1 %v3319_v8 }
 0x2b0   : > { %v3300_v39 = vsel %vm2948_vm8, %v3299_v43, %v3295_v52 }
 0x2b1   : > { %v3315_v58 = vsel %vm3301_vm9, %v3300_v39, %v3261_v53 }
 0x2b2   : > { %v3323_v11 = vsel %vm3322_vm1, %v3315_v58, 0.0 }
 0x2b3   : > { %3324 = vadd.xlane.f32.xlu0 %v3323_v11 }
 0x338   : > { %v3321_v5 = vpop.xlane.xlu1 %3320 }
 0x339   : > { %v3328_v31 = vadd.f32 %v3326_v14, %v3321_v5 }
 0x33b   : > { %3331 = vst.msk [vmem:[%s224_s30] sm:$0xff] %vm3330_vm2, %v3328_v31 }
 0x33c   : > { %v3325_v12 = vpop.xlane.xlu0 %3324 }
 0x33d   : > { %v3329_v34 = vadd.f32 %v3327_v2, %v3325_v12 }
 0x33f   : > { %3333 = vst.msk [vmem:[%s224_s30 + $0x8] sm:$0x3] %vm3332_vm3, %v3329_v34 }
 0x340 PF: > { %s15_s18 = sadd.s32 1, %s3460_s18  }
 0x341   : > { %p12_p4 = scmp.ge.s32.totalorder %s15_s18, 4  }
 0x343   :  { %14 = sbr.rel (!%p12_p4) target bundleno = 1 (0x1), region = 70 }

</bundles_post_ra>
